<compile_context>
chip_gen: v5e
topology: v5e:2x2
jax: 0.10.0
libtpu: 0.0.40
codegen_flags: <defaults>
</compile_context>

<pallas_src>
import functools

import jax
import jax.numpy as jnp
from jax import lax
from jax.experimental import pallas as pl
from jax.experimental.pallas import tpu as pltpu


_LC_TARGET = 1024  # pixel-chunk width (lanes) processed per matmul


def _fused_kernel(x_ref, w1_ref, b1_ref, w2_ref, b2_ref, w3_ref, b3_ref,
                  o_ref, h1_ref, h2_ref, *, H, W, lc):
    """Fused conv1+ReLU -> conv2+ReLU -> conv3 for one batch element.

    x_ref : (1, 8, P)   f32   zero-padded flattened input (3 real + 5 zero ch)
    w1_ref: (64, 72)    bf16  conv1 weights, columns ordered (tap, cin)
    w2_ref: (64, 576)   bf16  conv2 weights
    w3_ref: (8, 576)    bf16  conv3 weights (Cout zero-padded 3->8)
    b*_ref: (Cout, 1)   f32   biases
    o_ref : (1, 3, L)         flattened output, L = H*(W+2) - 2
    h1_ref, h2_ref: (64, P) bf16  zero-padded hidden activations (VMEM scratch)

    Flat indexing: padded pixel (r, c) lives at r*(W+2)+c.  Output pixel (y, x)
    uses accumulator coordinate j = y*(W+2)+x, and tap (dy, dx) reads source
    position j + dy*(W+2) + dx.  Columns with x in {W, W+1} are "garbage" and
    are masked to zero before being written into the next layer's halo.
    """
    Wp = W + 2
    P = (H + 2) * Wp
    L = H * Wp - 2                  # flat range containing every output pixel
    n_chunks = -(-L // lc)
    edge = W + 3                    # top/bottom border strips

    # --- border-only zeroing.  The interior and the per-row halo columns are
    # fully rewritten by the masked chunk stores below, so only these two thin
    # strips need an explicit fill (O(W) instead of O(H*W) stores).
    for ref in (h1_ref, h2_ref):
        z = jnp.zeros((ref.shape[0], edge), ref.dtype)
        ref[:, pl.ds(0, edge)] = z
        ref[:, pl.ds(P - edge, edge)] = z

    # 3x3 tap offsets in flat padded coordinates; order matches the (Cout, 9*Cin)
    # weight layout built by the wrapper.
    offs = tuple(dy * Wp + dx for dy in range(3) for dx in range(3))
    lane = lax.broadcasted_iota(jnp.int32, (1, lc), 1)

    def make_hidden_write(dst_ref):
        def write(c0, acc):
            # Zero the two per-row garbage columns so the next layer's shifted
            # reads see proper "same" padding (jnp.where, not multiply, so no
            # NaN/Inf can leak from garbage lanes).
            keep = ((c0 + lane) % Wp) < W
            dst_ref[:, pl.ds((W + 3) + c0, lc)] = (
                jnp.where(keep, acc, 0.0).astype(dst_ref.dtype))
        return write

    def write_output(c0, acc):
        c_out = o_ref.shape[1]
        o_ref[0, :, pl.ds(c0, lc)] = acc[:c_out, :].astype(o_ref.dtype)

    def conv_layer(read_tap, w_ref, b_ref, relu, write):
        w = w_ref[...]              # hoisted: loaded once per layer
        b = b_ref[...]

        def chunk(c0):
            # Stack the 9 shifted taps along the channel axis -> one K-deep
            # bf16 matmul per chunk, f32 accumulation.
            rhs = jnp.concatenate([read_tap(c0 + off) for off in offs], axis=0)
            acc = jnp.dot(w, rhs.astype(jnp.bfloat16),
                          preferred_element_type=jnp.float32)
            acc = acc + b
            if relu:
                acc = jnp.maximum(acc, 0.0)
            write(c0, acc)

        if n_chunks <= 8:           # small images: fully unrolled, static offsets
            for c in range(n_chunks):
                chunk(min(c * lc, L - lc))
        else:
            def body(c, carry):
                chunk(jnp.minimum(c * lc, L - lc))
                return carry
            lax.fori_loop(0, n_chunks, body, 0)

    # conv1 (K = 9*8 = 72): taps read straight from the padded input block.
    conv_layer(lambda s: x_ref[0, :, pl.ds(s, lc)], w1_ref, b1_ref, True,
               make_hidden_write(h1_ref))
    # conv2 (K = 9*64 = 576).
    conv_layer(lambda s: h1_ref[:, pl.ds(s, lc)], w2_ref, b2_ref, True,
               make_hidden_write(h2_ref))
    # conv3 (K = 576, no ReLU); garbage columns are sliced off by the wrapper.
    conv_layer(lambda s: h2_ref[:, pl.ds(s, lc)], w3_ref, b3_ref, False,
               write_output)


def _cat_weight(w_hwio, cin_pad=None, cout_pad=None):
    """HWIO (3,3,Cin,Cout) -> (Cout, 9*Cin) with column order (dy, dx, cin)."""
    kh, kw, cin, cout = w_hwio.shape
    if cin_pad is not None and cin_pad > cin:
        w_hwio = jnp.pad(w_hwio, ((0, 0), (0, 0), (0, cin_pad - cin), (0, 0)))
        cin = cin_pad
    if cout_pad is not None and cout_pad > cout:
        w_hwio = jnp.pad(w_hwio, ((0, 0), (0, 0), (0, 0), (0, cout_pad - cout)))
        cout = cout_pad
    return jnp.transpose(w_hwio, (3, 0, 1, 2)).reshape(cout, kh * kw * cin)


def _round_up(v, m):
    return -(-v // m) * m


def _vmem_limit_bytes(P, L, lc, c_in_pad, c_mid, c_out_pad):
    """Scratch + double-buffered I/O blocks + per-chunk temporaries, with margin."""
    lanes_p = _round_up(P, 128)
    lanes_l = _round_up(L, 128)
    lanes_c = _round_up(lc, 128)
    need = 0
    need += 2 * c_mid * lanes_p * 2                              # h1/h2 bf16 scratch
    need += 2 * c_in_pad * lanes_p * 4                           # input block x2
    need += 2 * _round_up(c_out_pad, 8) * lanes_l * 4            # output block x2
    need += 2 * 2 * (c_mid * _round_up(9 * c_in_pad, 128)
                     + c_mid * _round_up(9 * c_mid, 128)
                     + c_out_pad * _round_up(9 * c_mid, 128))    # bf16 weights x2
    need += 2 * (9 * c_mid) * lanes_c * 2                        # K-stacked chunk
    need += 3 * c_mid * lanes_c * 4                              # f32 accumulators
    need += 8 << 20                                              # compiler temps / margin
    return int(min(need, 128 * 1024 * 1024))


@jax.jit
def image_restoration_net(x_nchw, params):
    """Forward pass. Input NCHW (like PyTorch), output NCHW. Single fused kernel."""
    N, c_in, H, W = x_nchw.shape
    c_in_pad, c_out_pad = 8, 8
    c_mid = params["w1"].shape[3]
    c_out = params["w3"].shape[3]
    Wp = W + 2
    P = (H + 2) * Wp
    L = H * Wp - 2
    lc = L if L <= _LC_TARGET else _LC_TARGET

    # Zero-padded (channels->8, 1-px spatial halo), channel-major flattened input.
    xp = jnp.pad(x_nchw, ((0, 0), (0, c_in_pad - c_in), (1, 1), (1, 1)))
    xp = xp.reshape(N, c_in_pad, P)

    w1 = _cat_weight(params["w1"], cin_pad=c_in_pad).astype(jnp.bfloat16)    # (64, 72)
    w2 = _cat_weight(params["w2"]).astype(jnp.bfloat16)                      # (64, 576)
    w3 = _cat_weight(params["w3"], cout_pad=c_out_pad).astype(jnp.bfloat16)  # (8, 576)
    b1 = params["b1"].reshape(c_mid, 1).astype(jnp.float32)
    b2 = params["b2"].reshape(c_mid, 1).astype(jnp.float32)
    b3 = jnp.pad(params["b3"], (0, c_out_pad - c_out)).reshape(
        c_out_pad, 1).astype(jnp.float32)

    kernel = functools.partial(_fused_kernel, H=H, W=W, lc=lc)

    out_flat = pl.pallas_call(
        kernel,
        out_shape=jax.ShapeDtypeStruct((N, c_out, L), x_nchw.dtype),
        grid=(N,),
        in_specs=[
            pl.BlockSpec((1, c_in_pad, P), lambda n: (n, 0, 0)),  # padded flat input
            pl.BlockSpec(w1.shape, lambda n: (0, 0)),
            pl.BlockSpec(b1.shape, lambda n: (0, 0)),
            pl.BlockSpec(w2.shape, lambda n: (0, 0)),
            pl.BlockSpec(b2.shape, lambda n: (0, 0)),
            pl.BlockSpec(w3.shape, lambda n: (0, 0)),
            pl.BlockSpec(b3.shape, lambda n: (0, 0)),
        ],
        out_specs=pl.BlockSpec((1, c_out, L), lambda n: (n, 0, 0)),
        scratch_shapes=[
            pltpu.VMEM((c_mid, P), jnp.bfloat16),   # padded conv1 activation
            pltpu.VMEM((c_mid, P), jnp.bfloat16),   # padded conv2 activation
        ],
        compiler_params=pltpu.CompilerParams(
            dimension_semantics=("parallel",),
            vmem_limit_bytes=_vmem_limit_bytes(P, L, lc, c_in_pad, c_mid,
                                               c_out_pad),
        ),
    )(xp, w1, b1, w2, b2, w3, b3)

    # Undo the flat padded-row layout: pad the 2 missing trailing positions,
    # reshape to rows of width W+2, drop the 2 halo columns per row.
    out = jnp.pad(out_flat, ((0, 0), (0, 0), (0, H * Wp - L)))
    return out.reshape(N, c_out, H, Wp)[..., :W]


def init_params(key):
    """kaiming_normal_(mode='fan_out', nonlinearity='relu'), zero biases —
    matches the PyTorch module's _initialize_weights. Weights stored HWIO."""
    def kaiming(k, kh, kw, cin, cout):
        fan_out = cout * kh * kw
        std = (2.0 / fan_out) ** 0.5
        return jax.random.normal(k, (kh, kw, cin, cout), jnp.float32) * std

    k1, k2, k3 = jax.random.split(key, 3)
    return {
        "w1": kaiming(k1, 3, 3, 3, 64),  "b1": jnp.zeros((64,), jnp.float32),
        "w2": kaiming(k2, 3, 3, 64, 64), "b2": jnp.zeros((64,), jnp.float32),
        "w3": kaiming(k3, 3, 3, 64, 3),  "b3": jnp.zeros((3,), jnp.float32),
    }


def _reference_forward(x_nchw, params):
    """Pure-JAX f32 reference using lax.conv_general_dilated (NHWC/HWIO)."""
    x = jnp.transpose(x_nchw, (0, 2, 3, 1))
    dn = ("NHWC", "HWIO", "NHWC")

    def conv(x, w, b, relu):
        y = jax.lax.conv_general_dilated(x, w, (1, 1), "SAME",
                                         dimension_numbers=dn) + b
        return jnp.maximum(y, 0.0) if relu else y

    x = conv(x, params["w1"], params["b1"], True)
    x = conv(x, params["w2"], params["b2"], True)
    x = conv(x, params["w3"], params["b3"], False)
    return jnp.transpose(x, (0, 3, 1, 2))


if __name__ == "__main__":
    key = jax.random.PRNGKey(0)
    pkey, xkey = jax.random.split(key)

    params = init_params(pkey)
    # Small deterministic input: batch=2, RGB channels=3, 16x16 spatial (NCHW).
    x = jax.random.normal(xkey, (2, 3, 16, 16), jnp.float32)

    out = jax.block_until_ready(image_restoration_net(x, params))

    assert out.shape == (2, 3, 16, 16), out.shape
    assert bool(jnp.all(jnp.isfinite(out)))

    # bf16 MXU operands (f32 accumulation) -> relaxed tolerance vs f32 reference.
    ref = _reference_forward(x, params)
    max_err = float(jnp.max(jnp.abs(out - ref)))
    scale = float(jnp.max(jnp.abs(ref))) + 1e-6
    assert max_err / scale < 5e-2, (max_err, scale)

    print("KERNEL_OK")
</pallas_src>

<mosaic_0001>
module attributes {stable_mosaic.version = 11 : i64} {
  func.func @_fused_kernel(%arg0: i32, %arg1: memref<1x8x324xf32, #tpu.memory_space<vmem>>, %arg2: memref<64x72xbf16, #tpu.memory_space<vmem>>, %arg3: memref<64x1xf32, #tpu.memory_space<vmem>>, %arg4: memref<64x576xbf16, #tpu.memory_space<vmem>>, %arg5: memref<64x1xf32, #tpu.memory_space<vmem>>, %arg6: memref<8x576xbf16, #tpu.memory_space<vmem>>, %arg7: memref<8x1xf32, #tpu.memory_space<vmem>>, %arg8: memref<1x3x286xf32, #tpu.memory_space<vmem>>, %arg9: memref<64x324xbf16, #tpu.memory_space<vmem>>, %arg10: memref<64x324xbf16, #tpu.memory_space<vmem>>) attributes {dimension_semantics = [#tpu.dimension_semantics<parallel>], iteration_bounds = array<i64: 2>, scalar_prefetch = 0 : i64, scratch_operands = 2 : i64, tpu.core_type = #tpu.core_type<tc>, window_params = [{transform_indices = @transform_0, window_bounds = array<i64: 1, 8, 324>}, {pipeline_mode = #tpu.pipeline_mode<synchronous>, transform_indices = @transform_1, window_bounds = array<i64: 64, 72>}, {pipeline_mode = #tpu.pipeline_mode<synchronous>, transform_indices = @transform_2, window_bounds = array<i64: 64, 1>}, {pipeline_mode = #tpu.pipeline_mode<synchronous>, transform_indices = @transform_3, window_bounds = array<i64: 64, 576>}, {pipeline_mode = #tpu.pipeline_mode<synchronous>, transform_indices = @transform_4, window_bounds = array<i64: 64, 1>}, {pipeline_mode = #tpu.pipeline_mode<synchronous>, transform_indices = @transform_5, window_bounds = array<i64: 8, 576>}, {pipeline_mode = #tpu.pipeline_mode<synchronous>, transform_indices = @transform_6, window_bounds = array<i64: 8, 1>}, {transform_indices = @transform_7, window_bounds = array<i64: 1, 3, 286>}]} {
    %cst = arith.constant 0.000000e+00 : bf16
    %0 = vector.broadcast %cst : bf16 to vector<64x19xbf16>
    %c0 = arith.constant 0 : index
    %c0_0 = arith.constant 0 : index
    %1 = vector.load %arg9[%c0, %c0_0] : memref<64x324xbf16, #tpu.memory_space<vmem>>, vector<64x19xbf16>
    tpu.vector_store %arg9[%c0, %c0_0], %0 {strides = array<i32>} : memref<64x324xbf16, #tpu.memory_space<vmem>>, vector<64x19xbf16>,
    %c0_1 = arith.constant 0 : index
    %c305 = arith.constant 305 : index
    %2 = vector.load %arg9[%c0_1, %c305] : memref<64x324xbf16, #tpu.memory_space<vmem>>, vector<64x19xbf16>
    tpu.vector_store %arg9[%c0_1, %c305], %0 {strides = array<i32>} : memref<64x324xbf16, #tpu.memory_space<vmem>>, vector<64x19xbf16>,
    %cst_2 = arith.constant 0.000000e+00 : bf16
    %3 = vector.broadcast %cst_2 : bf16 to vector<64x19xbf16>
    %c0_3 = arith.constant 0 : index
    %c0_4 = arith.constant 0 : index
    %4 = vector.load %arg10[%c0_3, %c0_4] : memref<64x324xbf16, #tpu.memory_space<vmem>>, vector<64x19xbf16>
    tpu.vector_store %arg10[%c0_3, %c0_4], %3 {strides = array<i32>} : memref<64x324xbf16, #tpu.memory_space<vmem>>, vector<64x19xbf16>,
    %c0_5 = arith.constant 0 : index
    %c305_6 = arith.constant 305 : index
    %5 = vector.load %arg10[%c0_5, %c305_6] : memref<64x324xbf16, #tpu.memory_space<vmem>>, vector<64x19xbf16>
    tpu.vector_store %arg10[%c0_5, %c305_6], %3 {strides = array<i32>} : memref<64x324xbf16, #tpu.memory_space<vmem>>, vector<64x19xbf16>,
    %6 = tpu.iota {dimensions = array<i32: 1>} : vector<1x286xi32>
    %c0_7 = arith.constant 0 : index
    %c0_8 = arith.constant 0 : index
    %7 = vector.load %arg2[%c0_7, %c0_8] : memref<64x72xbf16, #tpu.memory_space<vmem>>, vector<64x72xbf16>
    %c0_9 = arith.constant 0 : index
    %c0_10 = arith.constant 0 : index
    %8 = vector.load %arg3[%c0_9, %c0_10] : memref<64x1xf32, #tpu.memory_space<vmem>>, vector<64x1xf32>
    %c0_11 = arith.constant 0 : index
    %c0_12 = arith.constant 0 : index
    %c0_13 = arith.constant 0 : index
    %9 = vector.load %arg1[%c0_11, %c0_12, %c0_13] : memref<1x8x324xf32, #tpu.memory_space<vmem>>, vector<1x8x286xf32>
    %10 = vector.shape_cast %9 : vector<1x8x286xf32> to vector<8x286xf32>
    %c0_14 = arith.constant 0 : index
    %c0_15 = arith.constant 0 : index
    %c1 = arith.constant 1 : index
    %11 = vector.load %arg1[%c0_14, %c0_15, %c1] : memref<1x8x324xf32, #tpu.memory_space<vmem>>, vector<1x8x286xf32>
    %12 = vector.shape_cast %11 : vector<1x8x286xf32> to vector<8x286xf32>
    %c0_16 = arith.constant 0 : index
    %c0_17 = arith.constant 0 : index
    %c2 = arith.constant 2 : index
    %13 = vector.load %arg1[%c0_16, %c0_17, %c2] : memref<1x8x324xf32, #tpu.memory_space<vmem>>, vector<1x8x286xf32>
    %14 = vector.shape_cast %13 : vector<1x8x286xf32> to vector<8x286xf32>
    %c0_18 = arith.constant 0 : index
    %c0_19 = arith.constant 0 : index
    %c18 = arith.constant 18 : index
    %15 = vector.load %arg1[%c0_18, %c0_19, %c18] : memref<1x8x324xf32, #tpu.memory_space<vmem>>, vector<1x8x286xf32>
    %16 = vector.shape_cast %15 : vector<1x8x286xf32> to vector<8x286xf32>
    %c0_20 = arith.constant 0 : index
    %c0_21 = arith.constant 0 : index
    %c19 = arith.constant 19 : index
    %17 = vector.load %arg1[%c0_20, %c0_21, %c19] : memref<1x8x324xf32, #tpu.memory_space<vmem>>, vector<1x8x286xf32>
    %18 = vector.shape_cast %17 : vector<1x8x286xf32> to vector<8x286xf32>
    %c0_22 = arith.constant 0 : index
    %c0_23 = arith.constant 0 : index
    %c20 = arith.constant 20 : index
    %19 = vector.load %arg1[%c0_22, %c0_23, %c20] : memref<1x8x324xf32, #tpu.memory_space<vmem>>, vector<1x8x286xf32>
    %20 = vector.shape_cast %19 : vector<1x8x286xf32> to vector<8x286xf32>
    %c0_24 = arith.constant 0 : index
    %c0_25 = arith.constant 0 : index
    %c36 = arith.constant 36 : index
    %21 = vector.load %arg1[%c0_24, %c0_25, %c36] : memref<1x8x324xf32, #tpu.memory_space<vmem>>, vector<1x8x286xf32>
    %22 = vector.shape_cast %21 : vector<1x8x286xf32> to vector<8x286xf32>
    %c0_26 = arith.constant 0 : index
    %c0_27 = arith.constant 0 : index
    %c37 = arith.constant 37 : index
    %23 = vector.load %arg1[%c0_26, %c0_27, %c37] : memref<1x8x324xf32, #tpu.memory_space<vmem>>, vector<1x8x286xf32>
    %24 = vector.shape_cast %23 : vector<1x8x286xf32> to vector<8x286xf32>
    %c0_28 = arith.constant 0 : index
    %c0_29 = arith.constant 0 : index
    %c38 = arith.constant 38 : index
    %25 = vector.load %arg1[%c0_28, %c0_29, %c38] : memref<1x8x324xf32, #tpu.memory_space<vmem>>, vector<1x8x286xf32>
    %26 = vector.shape_cast %25 : vector<1x8x286xf32> to vector<8x286xf32>
    %27 = tpu.concatenate %10, %12, %14, %16, %18, %20, %22, %24, %26 in 0 : vector<8x286xf32>, vector<8x286xf32>, vector<8x286xf32>, vector<8x286xf32>, vector<8x286xf32>, vector<8x286xf32>, vector<8x286xf32>, vector<8x286xf32>, vector<8x286xf32> -> vector<72x286xf32>
    %28 = arith.truncf %27 : vector<72x286xf32> to vector<72x286xbf16>
    %cst_30 = arith.constant dense<0.000000e+00> : vector<64x286xf32>
    %29 = tpu.matmul %7, %28, %cst_30 {dimension_numbers = #tpu.dot_dimension_numbers<[1], [0], [0], [1], [0, 0, 1, 1], [], []>} : vector<64x72xbf16>, vector<72x286xbf16>, vector<64x286xf32> -> vector<64x286xf32>
    %30 = vector.broadcast %8 : vector<64x1xf32> to vector<64x286xf32>
    %31 = arith.addf %29, %30 : vector<64x286xf32>
    %cst_31 = arith.constant 0.000000e+00 : f32
    %32 = vector.broadcast %cst_31 : f32 to vector<64x286xf32>
    %33 = arith.maximumf %31, %32 : vector<64x286xf32>
    %c0_i32 = arith.constant 0 : i32
    %34 = vector.broadcast %c0_i32 : i32 to vector<1x286xi32>
    %35 = arith.addi %34, %6 : vector<1x286xi32>
    %c18_i32 = arith.constant 18 : i32
    %c0_i32_32 = arith.constant 0 : i32
    %36 = arith.cmpi eq, %c18_i32, %c0_i32_32 : i32
    %c1_i32 = arith.constant 1 : i32
    %37 = arith.select %36, %c1_i32, %c18_i32 : i32
    %38 = vector.broadcast %37 : i32 to vector<1x286xi32>
    %39 = arith.remsi %35, %38 : vector<1x286xi32>
    %c0_i32_33 = arith.constant 0 : i32
    %40 = vector.broadcast %c0_i32_33 : i32 to vector<1x286xi32>
    %41 = arith.cmpi ne, %39, %40 : vector<1x286xi32>
    %c0_i32_34 = arith.constant 0 : i32
    %42 = vector.broadcast %c0_i32_34 : i32 to vector<1x286xi32>
    %43 = arith.cmpi slt, %39, %42 : vector<1x286xi32>
    %c0_i32_35 = arith.constant 0 : i32
    %44 = arith.cmpi slt, %37, %c0_i32_35 : i32
    %45 = vector.broadcast %44 : i1 to vector<1x286xi1>
    %46 = vector.broadcast %45 : vector<1x286xi1> to vector<1x286xi1>
    %47 = arith.xori %43, %46 : vector<1x286xi1>
    %48 = arith.andi %47, %41 : vector<1x286xi1>
    %49 = vector.broadcast %37 : i32 to vector<1x286xi32>
    %50 = arith.addi %39, %49 : vector<1x286xi32>
    %51 = arith.select %48, %50, %39 : vector<1x286xi1>, vector<1x286xi32>
    %c16_i32 = arith.constant 16 : i32
    %52 = vector.broadcast %c16_i32 : i32 to vector<1x286xi32>
    %53 = arith.cmpi slt, %51, %52 : vector<1x286xi32>
    %cst_36 = arith.constant 0.000000e+00 : f32
    %54 = vector.shape_cast %53 : vector<1x286xi1> to vector<1x286xi1>
    %55 = vector.broadcast %54 : vector<1x286xi1> to vector<64x286xi1>
    %56 = vector.broadcast %cst_36 : f32 to vector<64x286xf32>
    %57 = arith.select %55, %33, %56 : vector<64x286xi1>, vector<64x286xf32>
    %58 = arith.truncf %57 : vector<64x286xf32> to vector<64x286xbf16>
    %c0_37 = arith.constant 0 : index
    %c19_38 = arith.constant 19 : index
    %59 = vector.load %arg9[%c0_37, %c19_38] : memref<64x324xbf16, #tpu.memory_space<vmem>>, vector<64x286xbf16>
    tpu.vector_store %arg9[%c0_37, %c19_38], %58 {strides = array<i32>} : memref<64x324xbf16, #tpu.memory_space<vmem>>, vector<64x286xbf16>,
    %c0_39 = arith.constant 0 : index
    %c0_40 = arith.constant 0 : index
    %60 = vector.load %arg4[%c0_39, %c0_40] : memref<64x576xbf16, #tpu.memory_space<vmem>>, vector<64x576xbf16>
    %c0_41 = arith.constant 0 : index
    %c0_42 = arith.constant 0 : index
    %61 = vector.load %arg5[%c0_41, %c0_42] : memref<64x1xf32, #tpu.memory_space<vmem>>, vector<64x1xf32>
    %c0_43 = arith.constant 0 : index
    %c0_44 = arith.constant 0 : index
    %62 = vector.load %arg9[%c0_43, %c0_44] : memref<64x324xbf16, #tpu.memory_space<vmem>>, vector<64x286xbf16>
    %c0_45 = arith.constant 0 : index
    %c1_46 = arith.constant 1 : index
    %63 = vector.load %arg9[%c0_45, %c1_46] : memref<64x324xbf16, #tpu.memory_space<vmem>>, vector<64x286xbf16>
    %c0_47 = arith.constant 0 : index
    %c2_48 = arith.constant 2 : index
    %64 = vector.load %arg9[%c0_47, %c2_48] : memref<64x324xbf16, #tpu.memory_space<vmem>>, vector<64x286xbf16>
    %c0_49 = arith.constant 0 : index
    %c18_50 = arith.constant 18 : index
    %65 = vector.load %arg9[%c0_49, %c18_50] : memref<64x324xbf16, #tpu.memory_space<vmem>>, vector<64x286xbf16>
    %c0_51 = arith.constant 0 : index
    %c19_52 = arith.constant 19 : index
    %66 = vector.load %arg9[%c0_51, %c19_52] : memref<64x324xbf16, #tpu.memory_space<vmem>>, vector<64x286xbf16>
    %c0_53 = arith.constant 0 : index
    %c20_54 = arith.constant 20 : index
    %67 = vector.load %arg9[%c0_53, %c20_54] : memref<64x324xbf16, #tpu.memory_space<vmem>>, vector<64x286xbf16>
    %c0_55 = arith.constant 0 : index
    %c36_56 = arith.constant 36 : index
    %68 = vector.load %arg9[%c0_55, %c36_56] : memref<64x324xbf16, #tpu.memory_space<vmem>>, vector<64x286xbf16>
    %c0_57 = arith.constant 0 : index
    %c37_58 = arith.constant 37 : index
    %69 = vector.load %arg9[%c0_57, %c37_58] : memref<64x324xbf16, #tpu.memory_space<vmem>>, vector<64x286xbf16>
    %c0_59 = arith.constant 0 : index
    %c38_60 = arith.constant 38 : index
    %70 = vector.load %arg9[%c0_59, %c38_60] : memref<64x324xbf16, #tpu.memory_space<vmem>>, vector<64x286xbf16>
    %71 = tpu.concatenate %62, %63, %64, %65, %66, %67, %68, %69, %70 in 0 : vector<64x286xbf16>, vector<64x286xbf16>, vector<64x286xbf16>, vector<64x286xbf16>, vector<64x286xbf16>, vector<64x286xbf16>, vector<64x286xbf16>, vector<64x286xbf16>, vector<64x286xbf16> -> vector<576x286xbf16>
    %cst_61 = arith.constant dense<0.000000e+00> : vector<64x286xf32>
    %72 = tpu.matmul %60, %71, %cst_61 {dimension_numbers = #tpu.dot_dimension_numbers<[1], [0], [0], [1], [0, 0, 1, 1], [], []>} : vector<64x576xbf16>, vector<576x286xbf16>, vector<64x286xf32> -> vector<64x286xf32>
    %73 = vector.broadcast %61 : vector<64x1xf32> to vector<64x286xf32>
    %74 = arith.addf %72, %73 : vector<64x286xf32>
    %cst_62 = arith.constant 0.000000e+00 : f32
    %75 = vector.broadcast %cst_62 : f32 to vector<64x286xf32>
    %76 = arith.maximumf %74, %75 : vector<64x286xf32>
    %c0_i32_63 = arith.constant 0 : i32
    %77 = vector.broadcast %c0_i32_63 : i32 to vector<1x286xi32>
    %78 = arith.addi %77, %6 : vector<1x286xi32>
    %c18_i32_64 = arith.constant 18 : i32
    %c0_i32_65 = arith.constant 0 : i32
    %79 = arith.cmpi eq, %c18_i32_64, %c0_i32_65 : i32
    %c1_i32_66 = arith.constant 1 : i32
    %80 = arith.select %79, %c1_i32_66, %c18_i32_64 : i32
    %81 = vector.broadcast %80 : i32 to vector<1x286xi32>
    %82 = arith.remsi %78, %81 : vector<1x286xi32>
    %c0_i32_67 = arith.constant 0 : i32
    %83 = vector.broadcast %c0_i32_67 : i32 to vector<1x286xi32>
    %84 = arith.cmpi ne, %82, %83 : vector<1x286xi32>
    %c0_i32_68 = arith.constant 0 : i32
    %85 = vector.broadcast %c0_i32_68 : i32 to vector<1x286xi32>
    %86 = arith.cmpi slt, %82, %85 : vector<1x286xi32>
    %c0_i32_69 = arith.constant 0 : i32
    %87 = arith.cmpi slt, %80, %c0_i32_69 : i32
    %88 = vector.broadcast %87 : i1 to vector<1x286xi1>
    %89 = vector.broadcast %88 : vector<1x286xi1> to vector<1x286xi1>
    %90 = arith.xori %86, %89 : vector<1x286xi1>
    %91 = arith.andi %90, %84 : vector<1x286xi1>
    %92 = vector.broadcast %80 : i32 to vector<1x286xi32>
    %93 = arith.addi %82, %92 : vector<1x286xi32>
    %94 = arith.select %91, %93, %82 : vector<1x286xi1>, vector<1x286xi32>
    %c16_i32_70 = arith.constant 16 : i32
    %95 = vector.broadcast %c16_i32_70 : i32 to vector<1x286xi32>
    %96 = arith.cmpi slt, %94, %95 : vector<1x286xi32>
    %cst_71 = arith.constant 0.000000e+00 : f32
    %97 = vector.shape_cast %96 : vector<1x286xi1> to vector<1x286xi1>
    %98 = vector.broadcast %97 : vector<1x286xi1> to vector<64x286xi1>
    %99 = vector.broadcast %cst_71 : f32 to vector<64x286xf32>
    %100 = arith.select %98, %76, %99 : vector<64x286xi1>, vector<64x286xf32>
    %101 = arith.truncf %100 : vector<64x286xf32> to vector<64x286xbf16>
    %c0_72 = arith.constant 0 : index
    %c19_73 = arith.constant 19 : index
    %102 = vector.load %arg10[%c0_72, %c19_73] : memref<64x324xbf16, #tpu.memory_space<vmem>>, vector<64x286xbf16>
    tpu.vector_store %arg10[%c0_72, %c19_73], %101 {strides = array<i32>} : memref<64x324xbf16, #tpu.memory_space<vmem>>, vector<64x286xbf16>,
    %c0_74 = arith.constant 0 : index
    %c0_75 = arith.constant 0 : index
    %103 = vector.load %arg6[%c0_74, %c0_75] : memref<8x576xbf16, #tpu.memory_space<vmem>>, vector<8x576xbf16>
    %c0_76 = arith.constant 0 : index
    %c0_77 = arith.constant 0 : index
    %104 = vector.load %arg7[%c0_76, %c0_77] : memref<8x1xf32, #tpu.memory_space<vmem>>, vector<8x1xf32>
    %c0_78 = arith.constant 0 : index
    %c0_79 = arith.constant 0 : index
    %105 = vector.load %arg10[%c0_78, %c0_79] : memref<64x324xbf16, #tpu.memory_space<vmem>>, vector<64x286xbf16>
    %c0_80 = arith.constant 0 : index
    %c1_81 = arith.constant 1 : index
    %106 = vector.load %arg10[%c0_80, %c1_81] : memref<64x324xbf16, #tpu.memory_space<vmem>>, vector<64x286xbf16>
    %c0_82 = arith.constant 0 : index
    %c2_83 = arith.constant 2 : index
    %107 = vector.load %arg10[%c0_82, %c2_83] : memref<64x324xbf16, #tpu.memory_space<vmem>>, vector<64x286xbf16>
    %c0_84 = arith.constant 0 : index
    %c18_85 = arith.constant 18 : index
    %108 = vector.load %arg10[%c0_84, %c18_85] : memref<64x324xbf16, #tpu.memory_space<vmem>>, vector<64x286xbf16>
    %c0_86 = arith.constant 0 : index
    %c19_87 = arith.constant 19 : index
    %109 = vector.load %arg10[%c0_86, %c19_87] : memref<64x324xbf16, #tpu.memory_space<vmem>>, vector<64x286xbf16>
    %c0_88 = arith.constant 0 : index
    %c20_89 = arith.constant 20 : index
    %110 = vector.load %arg10[%c0_88, %c20_89] : memref<64x324xbf16, #tpu.memory_space<vmem>>, vector<64x286xbf16>
    %c0_90 = arith.constant 0 : index
    %c36_91 = arith.constant 36 : index
    %111 = vector.load %arg10[%c0_90, %c36_91] : memref<64x324xbf16, #tpu.memory_space<vmem>>, vector<64x286xbf16>
    %c0_92 = arith.constant 0 : index
    %c37_93 = arith.constant 37 : index
    %112 = vector.load %arg10[%c0_92, %c37_93] : memref<64x324xbf16, #tpu.memory_space<vmem>>, vector<64x286xbf16>
    %c0_94 = arith.constant 0 : index
    %c38_95 = arith.constant 38 : index
    %113 = vector.load %arg10[%c0_94, %c38_95] : memref<64x324xbf16, #tpu.memory_space<vmem>>, vector<64x286xbf16>
    %114 = tpu.concatenate %105, %106, %107, %108, %109, %110, %111, %112, %113 in 0 : vector<64x286xbf16>, vector<64x286xbf16>, vector<64x286xbf16>, vector<64x286xbf16>, vector<64x286xbf16>, vector<64x286xbf16>, vector<64x286xbf16>, vector<64x286xbf16>, vector<64x286xbf16> -> vector<576x286xbf16>
    %cst_96 = arith.constant dense<0.000000e+00> : vector<8x286xf32>
    %115 = tpu.matmul %103, %114, %cst_96 {dimension_numbers = #tpu.dot_dimension_numbers<[1], [0], [0], [1], [0, 0, 1, 1], [], []>} : vector<8x576xbf16>, vector<576x286xbf16>, vector<8x286xf32> -> vector<8x286xf32>
    %116 = vector.broadcast %104 : vector<8x1xf32> to vector<8x286xf32>
    %117 = arith.addf %115, %116 : vector<8x286xf32>
    %118 = vector.extract_strided_slice %117 {offsets = [0, 0], sizes = [3, 286], strides = [1, 1]} : vector<8x286xf32> to vector<3x286xf32>
    %c0_97 = arith.constant 0 : index
    %c0_98 = arith.constant 0 : index
    %c0_99 = arith.constant 0 : index
    %119 = vector.load %arg8[%c0_97, %c0_98, %c0_99] : memref<1x3x286xf32, #tpu.memory_space<vmem>>, vector<1x3x286xf32>
    %120 = vector.shape_cast %119 : vector<1x3x286xf32> to vector<3x286xf32>
    %121 = vector.shape_cast %118 : vector<3x286xf32> to vector<1x3x286xf32>
    tpu.vector_store %arg8[%c0_97, %c0_98, %c0_99], %121 {strides = array<i32>} : memref<1x3x286xf32, #tpu.memory_space<vmem>>, vector<1x3x286xf32>,
    return
  }
  func.func @transform_0(%arg0: i32) -> (i32, i32, i32) {
    %c0_i32 = arith.constant 0 : i32
    %c0_i32_0 = arith.constant 0 : i32
    %c0_i32_1 = arith.constant 0 : i32
    return %arg0, %c0_i32, %c0_i32_0 : i32, i32, i32
  }
  func.func @transform_1(%arg0: i32) -> (i32, i32) {
    %c0_i32 = arith.constant 0 : i32
    %c0_i32_0 = arith.constant 0 : i32
    %c0_i32_1 = arith.constant 0 : i32
    return %c0_i32, %c0_i32_0 : i32, i32
  }
  func.func @transform_2(%arg0: i32) -> (i32, i32) {
    %c0_i32 = arith.constant 0 : i32
    %c0_i32_0 = arith.constant 0 : i32
    %c0_i32_1 = arith.constant 0 : i32
    return %c0_i32, %c0_i32_0 : i32, i32
  }
  func.func @transform_3(%arg0: i32) -> (i32, i32) {
    %c0_i32 = arith.constant 0 : i32
    %c0_i32_0 = arith.constant 0 : i32
    %c0_i32_1 = arith.constant 0 : i32
    return %c0_i32, %c0_i32_0 : i32, i32
  }
  func.func @transform_4(%arg0: i32) -> (i32, i32) {
    %c0_i32 = arith.constant 0 : i32
    %c0_i32_0 = arith.constant 0 : i32
    %c0_i32_1 = arith.constant 0 : i32
    return %c0_i32, %c0_i32_0 : i32, i32
  }
  func.func @transform_5(%arg0: i32) -> (i32, i32) {
    %c0_i32 = arith.constant 0 : i32
    %c0_i32_0 = arith.constant 0 : i32
    %c0_i32_1 = arith.constant 0 : i32
    return %c0_i32, %c0_i32_0 : i32, i32
  }
  func.func @transform_6(%arg0: i32) -> (i32, i32) {
    %c0_i32 = arith.constant 0 : i32
    %c0_i32_0 = arith.constant 0 : i32
    %c0_i32_1 = arith.constant 0 : i32
    return %c0_i32, %c0_i32_0 : i32, i32
  }
  func.func @transform_7(%arg0: i32) -> (i32, i32, i32) {
    %c0_i32 = arith.constant 0 : i32
    %c0_i32_0 = arith.constant 0 : i32
    %c0_i32_1 = arith.constant 0 : i32
    return %arg0, %c0_i32, %c0_i32_0 : i32, i32, i32
  }
}

</mosaic_0001>

<bundles_post_ra>
// kernel: image_restoration_net.1
= control target key start
LH: loop header
LB: loop body
LE: loop exit
PB: predicated region body
PF: predicated region fallthrough
CT: control target
= control target key end

     0   :  { %s3249_s24 = smov 0   ;;  %s5391_s0 = inlined_call_operand.vmem [shape: f32[2,8,324], index: 0, kind: input, shape index: {}]   ;;  %s5392_s1 = inlined_call_operand.vmem [shape: bf16[64,72], index: 1, kind: input, shape index: {}]   ;;  %s5393_s2 = inlined_call_operand.vmem [shape: f32[64,1], index: 2, kind: input, shape index: {}]   ;;  %s5394_s3 = inlined_call_operand.vmem [shape: bf16[64,576], index: 3, kind: input, shape index: {}]   ;;  %s5395_s4 = inlined_call_operand.vmem [shape: f32[64,1], index: 4, kind: input, shape index: {}]   ;;  %s5396_s5 = inlined_call_operand.vmem [shape: bf16[8,576], index: 5, kind: input, shape index: {}]   ;;  %s5397_s6 = inlined_call_operand.vmem [shape: f32[8,1], index: 6, kind: input, shape index: {}]   ;;  %s5398_s7 = inlined_call_operand.vmem [shape: f32[2,3,286], index: 7, kind: output, shape index: {}]  }
   0x1 LB: > { %s2852_s25 = sadd.s32 4294967295, %s3197_s24   ;;  %p2856_p0 = scmp.ge.s32.totalorder %s3197_s24, 1  ;;  %s3197_s24 = sphi %s3249_s24, %s17_s24  }
   0x2   : > { %p237_p1 = scmp.lt.s32.totalorder %s3197_s24, 3 }
   0x4   : > { %p238_p2 = pnand %p2856_p0, %p237_p1 }
   0x6   : > { %241 = sbr.rel (%p238_p2) target bundleno = 1655 (0x677), region = 48 }
   0xb   : > { %p269_p3 = scmp.lt.s32.totalorder %s2852_s25, 1  ;;  %s3199_s30 = smov 92   ;;  %vm5400_vm0 = vcmask 736256   ;;  %vm406_vm1 = vcmask 752640   ;;  %vm418_vm2 = vcmask 744448   ;;  %vm5399_vm3 = vcmask 1043456  }
   0xc   : > { %s3200_s8 = smov 90   ;;  %s3201_s9 = smov 91   ;;  %vm394_vm4 = vcmask 883712   ;;  %v333_v34 = vld [vmem:[%s5393_s2 + $0x38] sm:$0xff]  ;;  %v332_v35 = vld [vmem:[%s5393_s2 + $0x30] sm:$0xff]  ;;  %vm382_vm5 = vcmask 891904  }
   0xd   : > { %s5491_s25 = smov (!%p269_p3, %s2852_s25), 1  ;;  %s3202_s10 = smov 109   ;;  %v3207_v38 = vmov 0   ;;  %v330_v43 = vld [vmem:[%s5393_s2 + $0x20] sm:$0xff]  ;;  %v328_v46 = vld [vmem:[%s5393_s2 + $0x10] sm:$0xff]  ;;  %v331_v47 = vld [vmem:[%s5393_s2 + $0x28] sm:$0xff] }
   0xe   : > { %s3128_s26 = smul.u32 24, %s5491_s25  ;;  %s3203_s11 = smov 108   ;;  %3189 = vset.pattern.permute.xlu2 %v3207_v38  ;;  %3188 = vset.pattern.permute.xlu1 %v3207_v38  ;;  %vm346_vm6 = vcmask 1039360   ;;  %v327_v59 = vld [vmem:[%s5393_s2 + $0x8] sm:$0xff]  ;;  %v326_v60 = vld [vmem:[%s5393_s2] sm:$0xff]  ;;  %v329_v61 = vld [vmem:[%s5393_s2 + $0x18] sm:$0xff] }
   0xf   : > { %s3204_s12 = smov 126   ;;  %s3205_s13 = smov 110   ;;  %3190 = vset.pattern.permute.xlu0 %v3207_v38  ;;  %vm358_vm7 = vcmask 1031168   ;;  %vm370_vm8 = vcmask 900096   ;;  %vm511_vm9 = vcmask 588800  }
  0x10   : > { %s273_s29 = scalar_lea.vmem %s5391_s0, %s3128_s26  ;;  %s3206_s14 = smov 127  }
  0x11   : > { %v3263_v0 = vld [vmem:[%s273_s29] sm:$0xff]  ;;  %v3265_v1 = vld [vmem:[%s273_s29 + $0x8] sm:$0xff]  ;;  %v3272_v3 = vld [vmem:[%s273_s29 + $0x10] sm:$0xff]  ;;  %s3208_s28 = smov 19  }
  0x12   : > { %v3153_v2 = vpack.i.bf16 %v3265_v1, %v3263_v0 }
  0x14   : > { %3154 = vrot.lane.b32.xlu1 %v3153_v2, %s3199_s30  ;;  %3149 = vrot.lane.b32.xlu0 %v3153_v2, %s3200_s8 }
  0x15   : > { %3159 = vrot.lane.b32.xlu2 %v3153_v2, %s3201_s9 }
  0x1c   : > { %404 = vrot.lane.b32.xlu1 %v3272_v3, %s3199_s30  ;;  %428 = vrot.lane.b32.xlu0 %v3272_v3, %s3200_s8 }
  0x1d   : > { %416 = vrot.lane.b32.xlu2 %v3272_v3, %s3201_s9 }
  0x24   : > { %380 = vrot.lane.b32.xlu1 %v3272_v3, %s3202_s10  ;;  %3164 = vrot.lane.b32.xlu0 %v3153_v2, %s3202_s10 }
  0x25   : > { %3169 = vrot.lane.b32.xlu2 %v3153_v2, %s3203_s11 }
  0x2c   : > { %3174 = vrot.lane.b32.xlu1 %v3153_v2, %s3204_s12  ;;  %392 = vrot.lane.b32.xlu0 %v3272_v3, %s3203_s11 }
  0x2d   : > { %356 = vrot.lane.b32.xlu2 %v3272_v3, %s3204_s12 }
  0x34   : > { %368 = vrot.lane.b32.xlu1 %v3272_v3, %s3205_s13  ;;  %3179 = vrot.lane.b32.xlu0 %v3153_v2, %s3205_s13 }
  0x35   : > { %3184 = vrot.lane.b32.xlu2 %v3153_v2, %s3206_s14 }
  0x3c   : > { %344 = vrot.lane.b32.xlu0 %v3272_v3, %s3206_s14  ;;  %483 = vperm.xlu1 %3188, %v332_v35  }
  0x3d   : > { %488 = vperm.xlu2 %3189, %v333_v34  }
  0x44   : > { %473 = vperm.xlu0 %3190, %v330_v43   ;;  %478 = vperm.xlu1 %3188, %v331_v47  }
  0x45   : > { %463 = vperm.xlu2 %3189, %v328_v46  }
  0x4c   : > { %458 = vperm.xlu0 %3190, %v327_v59   ;;  %468 = vperm.xlu1 %3188, %v329_v61  }
  0x4d   : > { %453 = vperm.xlu2 %3189, %v326_v60  }
  0x6f   : > { %v3160_v4 = vpop.permute.xlu2 %3159 }
  0x70   : > { %v3162_v6 = vunpack.i.h.bf16 %v3160_v4  ;;  %v3161_v7 = vunpack.i.l.bf16 %v3160_v4 }
  0x72   : > { %v419_v17 = vsel %vm418_vm2, %v3161_v7, %v3162_v6 }
  0x77   : > { %v417_v5 = vpop.permute.xlu2 %416 }
  0x78   : > { %v420_v30 = vsel %vm418_vm2, %v3162_v6, %v417_v5 }
  0x7f   : > { %v3170_v24 = vpop.permute.xlu2 %3169 }
  0x80   : > { %v3172_v31 = vunpack.i.h.bf16 %v3170_v24  ;;  %v3171_v32 = vunpack.i.l.bf16 %v3170_v24 }
  0x82   : > { %v395_v41 = vsel %vm394_vm4, %v3171_v32, %v3172_v31 }
  0x86   : > { %v3155_v8 = vpop.permute.xlu1 %3154  ;;  %v3150_v9 = vpop.permute.xlu0 %3149 }
  0x87   : > { %v3157_v10 = vunpack.i.h.bf16 %v3155_v8  ;;  %v3156_v11 = vunpack.i.l.bf16 %v3155_v8  ;;  %v3152_v12 = vunpack.i.h.bf16 %v3150_v9  ;;  %v3151_v13 = vunpack.i.l.bf16 %v3150_v9  ;;  %v357_v42 = vpop.permute.xlu2 %356 }
  0x89   : > { %v431_v14 = vsel %vm5400_vm0, %v3151_v13, %v3152_v12  ;;  %v407_v16 = vsel %vm406_vm1, %v3156_v11, %v3157_v10 }
  0x8a   : > { %v448_v15 = vpack.c.bf16 %v431_v14, %v431_v14  ;;  %v445_v19 = vpack.c.bf16 %v419_v17, %v407_v16  ;;  %v3080_v17 = vld [vmem:[%s5392_s1] sm:$0xff] }
  0x8c   : > { %v526_v18 = vsel %vm5399_vm3, %v448_v15, 0 }
  0x8d   : > { %537 = vmatpush.bf16.msra.mxu0 %v526_v18 }
  0x8e   : > { %v405_v20 = vpop.permute.xlu1 %404  ;;  %v429_v21 = vpop.permute.xlu0 %428 }
  0x8f   : > { %v450_v22 = vpack.c.bf16 %v429_v21, %v429_v21  ;;  %v432_v23 = vsel %vm5400_vm0, %v3152_v12, %v429_v21  ;;  %v447_v28 = vpack.c.bf16 %v417_v5, %v405_v20  ;;  %v408_v29 = vsel %vm406_vm1, %v3157_v10, %v405_v20  ;;  %v3185_v54 = vpop.permute.xlu2 %3184 }
  0x90   : > { %v449_v25 = vpack.c.bf16 %v432_v23, %v432_v23  ;;  %v446_v33 = vpack.c.bf16 %v420_v30, %v408_v29  ;;  %v3187_v55 = vunpack.i.h.bf16 %v3185_v54  ;;  %v3186_v56 = vunpack.i.l.bf16 %v3185_v54 }
  0x91   : > { %538 = vmatpush.bf16.msra.mxu0 %v445_v19  ;;  %v532_v26 = vsel %vm5399_vm3, %v450_v22, 0  ;;  %v314_v19 = vlaneseq  ;;  %vm889_vm0 = vcmask 396288  }
  0x92   : > { %595 = vmatpush.bf16.msra.mxu2 %v532_v26  ;;  %v529_v27 = vsel %vm5399_vm3, %v449_v25, 0  ;;  %v347_v6 = vsel %vm346_vm6, %v3186_v56, %v3187_v55 }
  0x93   : > { %566 = vmatpush.bf16.msra.mxu1 %v529_v27  ;;  %v436_v13 = vpack.c.bf16 %v347_v6, %v3263_v0  ;;  %v3081_v0 = vld [vmem:[%s5392_s1 + $0x8] sm:$0xff]  ;;  %v3368_v20 = vand.u32 127, %v314_v19 }
  0x95   : > { %v648_v21 = vand.u32 65535, %v3368_v20  ;;  %v3372_v22 = vadd.s32 128, %v3368_v20  ;;  %v649_v24 = vshrl.u32 %v3368_v20, 16  ;;  %v3377_v26 = vadd.s32 256, %v3368_v20 }
  0x96   : > { %v381_v36 = vpop.permute.xlu1 %380  ;;  %596 = vmatpush.bf16.msra.mxu2 %v447_v28  ;;  %v3165_v37 = vpop.permute.xlu0 %3164 }
  0x97   : > { %v3167_v39 = vunpack.i.h.bf16 %v3165_v37  ;;  %v3166_v40 = vunpack.i.l.bf16 %v3165_v37  ;;  %567 = vmatpush.bf16.msra.mxu1 %v446_v33  ;;  %v677_v23 = vand.u32 65535, %v3372_v22  ;;  %v652_v25 = vmul.u32 58254, %v648_v21 }
  0x98   : > { %v678_v27 = vshrl.u32 %v3372_v22, 16  ;;  %v651_v29 = vmul.u32 14564, %v648_v21  ;;  %v653_v30 = vmul.u32 14564, %v649_v24  ;;  %v706_v32 = vand.u32 65535, %v3377_v26 }
  0x99   : > { %v383_v44 = vsel %vm382_vm5, %v3166_v40, %v3167_v39  ;;  %v384_v51 = vsel %vm382_vm5, %v3167_v39, %v381_v36  ;;  %v681_v28 = vmul.u32 58254, %v677_v23  ;;  %v680_v33 = vmul.u32 14564, %v677_v23 }
  0x9a   : > { %v442_v45 = vpack.c.bf16 %v395_v41, %v383_v44  ;;  %v682_v34 = vmul.u32 14564, %v678_v27  ;;  %v707_v39 = vshrl.u32 %v3377_v26, 16  ;;  %v710_v40 = vmul.u32 58254, %v706_v32 }
  0x9b   : > { %v684_v35 = vshll.u32 %v681_v28, 16  ;;  %v654_v43 = vmul.u32 58254, %v649_v24  ;;  %v709_v46 = vmul.u32 14564, %v706_v32  ;;  %v685_v60 = vshrl.u32 %v681_v28, 16 }
  0x9c   : > { %539 = vmatpush.bf16.msra.mxu0 %v442_v45  ;;  %v686_v41 = vshll.u32 %v682_v34, 16  ;;  %v683_v45 = vmul.u32 58254, %v678_v27  ;;  %v711_v47 = vmul.u32 14564, %v707_v39  ;;  %v712_v56 = vmul.u32 58254, %v707_v39 }
  0x9d   : > { %vm688_vm11 = vc.u32 %v680_v33, %v684_v35 }
  0x9e   : > { %v3175_v48 = vpop.permute.xlu1 %3174  ;;  %v393_v49 = vpop.permute.xlu0 %392 }
  0x9f   : > { %v444_v50 = vpack.c.bf16 %v393_v49, %v381_v36  ;;  %v396_v52 = vsel %vm394_vm4, %v3172_v31, %v393_v49  ;;  %v3177_v57 = vunpack.i.h.bf16 %v3175_v48  ;;  %v3176_v58 = vunpack.i.l.bf16 %v3175_v48 }
  0xa0   : > { %v443_v53 = vpack.c.bf16 %v396_v52, %v384_v51  ;;  %v655_v31 = vshll.u32 %v652_v25, 16  ;;  %v657_v36 = vshll.u32 %v653_v30, 16  ;;  %v713_v48 = vshll.u32 %v710_v40, 16 }
  0xa1   : > { %597 = vmatpush.bf16.msra.mxu2 %v444_v50  ;;  %v359_v7 = vsel %vm358_vm7, %v3176_v58, %v3177_v57  ;;  %v360_v9 = vsel %vm358_vm7, %v3177_v57, %v357_v42  ;;  %v689_v49 = vsel %vm688_vm11, 1, %v3207_v38  ;;  %v656_v57 = vshrl.u32 %v652_v25, 16 }
  0xa2   : > { %568 = vmatpush.bf16.msra.mxu1 %v443_v53  ;;  %v661_v37 = vadd.s32 %v655_v31, %v651_v29  ;;  %vm659_vm10 = vc.u32 %v651_v29, %v655_v31  ;;  %v691_v52 = vadd.s32 %v689_v49, %v683_v45  ;;  %v715_v53 = vshll.u32 %v711_v47, 16 }
  0xa3   : > { %v660_v44 = vsel %vm659_vm10, 1, %v3207_v38  ;;  %vm717_vm14 = vc.u32 %v709_v46, %v713_v48  ;;  %v719_v54 = vadd.s32 %v713_v48, %v709_v46 }
  0xa4   : > { %vm663_vm12 = vc.u32 %v661_v37, %v657_v36  ;;  %v662_v50 = vadd.s32 %v660_v44, %v654_v43  ;;  %v718_v59 = vsel %vm717_vm14, 1, %v3207_v38  ;;  %v5428_v37 = vmov 0 }
  0xa5   : > { %v664_v51 = vsel %vm663_vm12, 1, %v3207_v38  ;;  %vm721_vm15 = vc.u32 %v719_v54, %v715_v53 }
  0xa6   : > { %v369_v62 = vpop.permute.xlu1 %368  ;;  %v3180_v63 = vpop.permute.xlu0 %3179  ;;  %v666_v58 = vadd.s32 %v664_v51, %v662_v50  ;;  %v5434_v50 = vmov 0 }
  0xa7   : > { %v3182_v2 = vunpack.i.h.bf16 %v3180_v63  ;;  %v3181_v4 = vunpack.i.l.bf16 %v3180_v63  ;;  %v441_v5 = vpack.c.bf16 %v369_v62, %v357_v42  ;;  %v690_v42 = vadd.s32 %v684_v35, %v680_v33 }
  0xa8   : > { %v658_v63 = vshrl.u32 %v653_v30, 16 }
  0xa9   : > { %598 = vmatpush.bf16.msra.mxu2 %v441_v5  ;;  %v371_v8 = vsel %vm370_vm8, %v3181_v4, %v3182_v2  ;;  %v372_v10 = vsel %vm370_vm8, %v3182_v2, %v369_v62  ;;  %vm692_vm13 = vc.u32 %v690_v42, %v686_v41  ;;  %v720_v62 = vadd.s32 %v718_v59, %v712_v56 }
  0xaa   : > { %v439_v11 = vpack.c.bf16 %v371_v8, %v359_v7  ;;  %v440_v12 = vpack.c.bf16 %v372_v10, %v360_v9  ;;  %v667_v2 = vadd.s32 %v666_v58, %v656_v57  ;;  %v722_v4 = vsel %vm721_vm15, 1, %v3207_v38 }
  0xab   : > { %v687_v5 = vshrl.u32 %v682_v34, 16  ;;  %v714_v7 = vshrl.u32 %v710_v40, 16  ;;  %v724_v8 = vadd.s32 %v722_v4, %v720_v62 }
  0xac   : > { %540 = vmatpush.bf16.msra.mxu0 %v439_v11  ;;  %569 = vmatpush.bf16.msra.mxu1 %v440_v12  ;;  %v668_v9 = vadd.s32 %v667_v2, %v658_v63  ;;  %v3388_v11 = vpop.permute.xlu2 %488  ;;  %v716_v12 = vshrl.u32 %v711_v47, 16 }
  0xae   : > { %v345_v14 = vpop.permute.xlu0 %344  ;;  %v3403_v36 = vpop.permute.xlu1 %483 }
  0xaf   : > { %v438_v15 = vpack.c.bf16 %v345_v14, %v3272_v3  ;;  %v348_v16 = vsel %vm346_vm6, %v3187_v55, %v345_v14  ;;  %v3083_v3 = vld [vmem:[%s5392_s1 + $0x18] sm:$0xff]  ;;  %v693_v55 = vsel %vm692_vm13, 1, %v3207_v38  ;;  %v669_v14 = vshrl.u32 %v668_v9, 4 }
  0xb0   : > { %541 = vmatpush.bf16.msra.mxu0 %v436_v13  ;;  %v437_v18 = vpack.c.bf16 %v348_v16, %v3265_v1  ;;  %v3082_v1 = vld [vmem:[%s5392_s1 + $0x10] sm:$0xff]  ;;  %v695_v61 = vadd.s32 %v693_v55, %v691_v52  ;;  %v725_v13 = vadd.s32 %v724_v8, %v714_v7 }
  0xb1   : > { %599 = vmatpush.bf16.msra.mxu2 %v438_v15 }
  0xb2   : > { %570 = vmatpush.bf16.msra.mxu1 %v437_v18  ;;  %v696_v6 = vadd.s32 %v695_v61, %v685_v60  ;;  %v726_v16 = vadd.s32 %v725_v13, %v716_v12 }
  0xb3   : > { %2875 = vmatmul.msk.bf16.vlgmr.msra.gmra.mxu0 %vm511_vm9, %v3080_v17 }
  0xb4   : > { %2883 = vmatmul.msk.bf16.vlgmr.msra.gmra.mxu2 %vm511_vm9, %v3080_v17  ;;  %v697_v10 = vadd.s32 %v696_v6, %v687_v5 }
  0xb5   : > { %2879 = vmatmul.msk.bf16.vlgmr.msra.gmra.mxu1 %vm511_vm9, %v3080_v17  ;;  %v670_v17 = vmul.u32 18, %v669_v14 }
  0xb6   : > { %v698_v15 = vshrl.u32 %v697_v10, 4  ;;  %v3394_v23 = vpop.permute.xlu0 %473  ;;  %v3424_v56 = vpop.permute.xlu1 %478 }
  0xb8   : > { %v699_v18 = vmul.u32 18, %v698_v15 }
  0xba   : > { %v700_v19 = vsub.s32 %v3372_v22, %v699_v18 }
  0xbc   : > { %vm733_vm11 = vcmp.ne.s32.totalorder %v700_v19, 0  ;;  %vm736_vm12 = vcmp.lt.s32.totalorder %v700_v19, 0  ;;  %v742_v27 = vadd.s32 18, %v700_v19 }
  0xbd   : > { %vm739_vm14 = vmand %vm736_vm12, %vm733_vm11 }
  0xbe   : > { %v745_v31 = vsel %vm739_vm14, %v742_v27, %v700_v19  ;;  %v459_v40 = vpop.permute.xlu0 %458  ;;  %v469_v9 = vpop.permute.xlu1 %468  ;;  %vm885_vm14 = vcmask 1043608  }
  0xc3   : > { %2876 = vmatmul.msk.bf16.gmra.mxu0 %vm511_vm9, %v3081_v0 }
  0xc4   : > { %2884 = vmatmul.msk.bf16.gmra.mxu2 %vm511_vm9, %v3081_v0 }
  0xc5   : > { %2880 = vmatmul.msk.bf16.gmra.mxu1 %vm511_vm9, %v3081_v0  ;;  %v727_v0 = vshrl.u32 %v726_v16, 4 }
  0xc7   : > { %v728_v21 = vmul.u32 18, %v727_v0 }
  0xc9   : > { %v729_v28 = vsub.s32 %v3377_v26, %v728_v21  ;;  %v5431_v26 = vmov 0 }
  0xcb   : > { %vm734_vm15 = vcmp.ne.s32.totalorder %v729_v28, 0  ;;  %vm737_vm3 = vcmp.lt.s32.totalorder %v729_v28, 0  ;;  %v743_v35 = vadd.s32 18, %v729_v28 }
  0xcc   : > { %vm740_vm11 = vmand %vm737_vm3, %vm734_vm15  ;;  %vm280_vm3 = vcmask 150528   ;;  %vm886_vm15 = vcmask 1047556  }
  0xcd   : > { %v746_v44 = vsel %vm740_vm11, %v743_v35, %v729_v28  ;;  %282 = vst.msk [vmem:[#allocation2 + $0xc] sm:$0xf] %vm280_vm3, %v3207_v38  ;;  %vm852_vm11 = vcmask 154624  }
  0xce   : > { %vm3417_vm12 = vcmp.lt.s32.totalorder %v746_v44, 16  ;;  %281 = vst.msk [vmem:[#allocation2] sm:$0xf] %vm280_vm3, %v3207_v38 }
  0xcf   : > { %v5435_v50 = vsel %vm3417_vm12, 4294967295, %v5434_v50  ;;  %283 = vst.msk [vmem:[#allocation2 + $0x18] sm:$0xf] %vm280_vm3, %v3207_v38 }
  0xd0   : > { %5436 = vst [vmem:[#allocation6_spill] sm:$0xff] %v5435_v50 }
  0xd1   : > { %284 = vst.msk [vmem:[#allocation2 + $0x24] sm:$0xf] %vm280_vm3, %v3207_v38 }
  0xd2   : > { %285 = vst.msk [vmem:[#allocation2 + $0x30] sm:$0xf] %vm280_vm3, %v3207_v38 }
  0xd3   : > { %2877 = vmatmul.msk.bf16.gmra.mxu0 %vm511_vm9, %v3082_v1  ;;  %286 = vst.msk [vmem:[#allocation2 + $0x3c] sm:$0xf] %vm280_vm3, %v3207_v38 }
  0xd4   : > { %2885 = vmatmul.msk.bf16.gmra.mxu2 %vm511_vm9, %v3082_v1  ;;  %287 = vst.msk [vmem:[#allocation2 + $0x48] sm:$0xf] %vm280_vm3, %v3207_v38 }
  0xd5   : > { %2881 = vmatmul.msk.bf16.gmra.mxu1 %vm511_vm9, %v3082_v1  ;;  %v3390_v1 = vpop.permute.xlu2 %463  ;;  %288 = vst.msk [vmem:[#allocation2 + $0x54] sm:$0xf] %vm280_vm3, %v3207_v38 }
  0xd6   : > { %298 = vst.msk [vmem:[#allocation3] sm:$0xf] %vm280_vm3, %v3207_v38 }
  0xd7   : > { %299 = vst.msk [vmem:[#allocation3 + $0xc] sm:$0xf] %vm280_vm3, %v3207_v38 }
  0xd8   : > { %300 = vst.msk [vmem:[#allocation3 + $0x18] sm:$0xf] %vm280_vm3, %v3207_v38 }
  0xd9   : > { %301 = vst.msk [vmem:[#allocation3 + $0x24] sm:$0xf] %vm280_vm3, %v3207_v38 }
  0xda   : > { %302 = vst.msk [vmem:[#allocation3 + $0x30] sm:$0xf] %vm280_vm3, %v3207_v38 }
  0xdb   : > { %303 = vst.msk [vmem:[#allocation3 + $0x3c] sm:$0xf] %vm280_vm3, %v3207_v38 }
  0xdc   : > { %304 = vst.msk [vmem:[#allocation3 + $0x48] sm:$0xf] %vm280_vm3, %v3207_v38 }
  0xdd   : > { %v454_v29 = vpop.permute.xlu2 %453  ;;  %305 = vst.msk [vmem:[#allocation3 + $0x54] sm:$0xf] %vm280_vm3, %v3207_v38  ;;  %vm3562_vm3 = vmor %vm886_vm15, %vm885_vm14 }
  0xe3   : > { %2878 = vmatmul.msk.bf16.gmra.mxu0 %vm511_vm9, %v3083_v3 }
  0xe4   : > { %2886 = vmatmul.msk.bf16.gmra.mxu2 %vm511_vm9, %v3083_v3 }
  0xe5   : > { %2882 = vmatmul.msk.bf16.gmra.mxu1 %vm511_vm9, %v3083_v3  ;;  %v671_v3 = vsub.s32 %v3368_v20, %v670_v17 }
  0xe7   : > { %vm732_vm9 = vcmp.ne.s32.totalorder %v671_v3, 0  ;;  %vm735_vm10 = vcmp.lt.s32.totalorder %v671_v3, 0  ;;  %v741_v24 = vadd.s32 18, %v671_v3 }
  0xe8   : > { %vm3396_vm13 = vmand %vm735_vm10, %vm732_vm9  ;;  %vm3409_vm10 = vcmp.lt.s32.totalorder %v745_v31, 16 }
  0xe9   : > { %v744_v22 = vsel %vm3396_vm13, %v741_v24, %v671_v3  ;;  %v5432_v26 = vsel %vm3409_vm10, 4294967295, %v5431_v26  ;;  %vm289_vm13 = vcmask 552328  }
  0xea   : > { %vm3405_vm9 = vcmp.lt.s32.totalorder %v744_v22, 16  ;;  %5433 = vst [vmem:[#allocation5_spill] sm:$0xff] %v5432_v26 }
  0xeb   : > { %v5429_v37 = vsel %vm3405_vm9, 4294967295, %v5428_v37  ;;  %291 = vst.msk [vmem:[#allocation2 + $0x14] sm:$0xf] %vm289_vm13, %v3207_v38 }
  0xec   : > { %5430 = vst [vmem:[#allocation4_spill] sm:$0xff] %v5429_v37 }
  0xed   : > { %290 = vst.msk [vmem:[#allocation2 + $0x8] sm:$0xf] %vm289_vm13, %v3207_v38 }
  0xee   : > { %292 = vst.msk [vmem:[#allocation2 + $0x20] sm:$0xf] %vm289_vm13, %v3207_v38 }
  0xef   : > { %293 = vst.msk [vmem:[#allocation2 + $0x2c] sm:$0xf] %vm289_vm13, %v3207_v38 }
  0xf0   : > { %294 = vst.msk [vmem:[#allocation2 + $0x38] sm:$0xf] %vm289_vm13, %v3207_v38 }
  0xf1   : > { %295 = vst.msk [vmem:[#allocation2 + $0x44] sm:$0xf] %vm289_vm13, %v3207_v38 }
  0xf2   : > { %296 = vst.msk [vmem:[#allocation2 + $0x50] sm:$0xf] %vm289_vm13, %v3207_v38 }
  0xf3   : > { %297 = vst.msk [vmem:[#allocation2 + $0x5c] sm:$0xf] %vm289_vm13, %v3207_v38 }
  0xf4   : > { %306 = vst.msk [vmem:[#allocation3 + $0x8] sm:$0xf] %vm289_vm13, %v3207_v38 }
  0xf5   : > { %307 = vst.msk [vmem:[#allocation3 + $0x14] sm:$0xf] %vm289_vm13, %v3207_v38 }
  0xf6   : > { %308 = vst.msk [vmem:[#allocation3 + $0x20] sm:$0xf] %vm289_vm13, %v3207_v38 }
  0xf7   : > { %309 = vst.msk [vmem:[#allocation3 + $0x2c] sm:$0xf] %vm289_vm13, %v3207_v38 }
  0xf8   : > { %310 = vst.msk [vmem:[#allocation3 + $0x38] sm:$0xf] %vm289_vm13, %v3207_v38 }
  0xf9   : > { %311 = vst.msk [vmem:[#allocation3 + $0x44] sm:$0xf] %vm289_vm13, %v3207_v38 }
  0xfa   : > { %312 = vst.msk [vmem:[#allocation3 + $0x50] sm:$0xf] %vm289_vm13, %v3207_v38 }
  0xfb   : > { %313 = vst.msk [vmem:[#allocation3 + $0x5c] sm:$0xf] %vm289_vm13, %v3207_v38  ;;  %vm5446_vm13 = vcmask 736256  }
  0xfc   : > { %vm5447_vm14 = vmmov %vm5446_vm13 }
  0xfd   : > { %vm5449_vm15 = vmmov %vm5446_vm13 }
 0x130   : > { %v543_v20 = vpop.f32.mrf.mxu0 }
 0x131   : > { %v544_v30 = vadd.f32 %v543_v20, %v454_v29 }
 0x132   : > { %v572_v32 = vpop.f32.mrf.mxu1 }
 0x133   : > { %v621_v33 = vmax.f32 %v544_v30, 0.0  ;;  %v573_v34 = vadd.f32 %v572_v32, %v454_v29 }
 0x135   : > { %v622_v39 = vmax.f32 %v573_v34, 0.0  ;;  %v756_v41 = vsel %vm3405_vm9, %v621_v33, 0.0 }
 0x137   : > { %v757_v42 = vsel %vm3409_vm10, %v622_v39, 0.0  ;;  %v601_v43 = vpop.f32.mrf.mxu2 }
 0x138   : > { %v602_v45 = vadd.f32 %v601_v43, %v454_v29  ;;  %v545_v46 = vpop.f32.mrf.mxu0  ;;  %v780_v47 = vpack.c.bf16 %v757_v42, %v756_v41 }
 0x139   : > { %v546_v48 = vadd.f32 %v545_v46, %v459_v40 }
 0x13a   : > { %v623_v49 = vmax.f32 %v602_v45, 0.0  ;;  %v574_v51 = vpop.f32.mrf.mxu1  ;;  %812 = vrot.lane.b32.xlu1 %v780_v47, %s3208_s28 }
 0x13b   : > { %v624_v52 = vmax.f32 %v546_v48, 0.0  ;;  %v575_v53 = vadd.f32 %v574_v51, %v459_v40 }
 0x13c   : > { %v758_v54 = vsel %vm3417_vm12, %v623_v49, 0.0 }
 0x13d   : > { %v625_v55 = vmax.f32 %v575_v53, 0.0  ;;  %v759_v57 = vsel %vm3405_vm9, %v624_v52, 0.0  ;;  %v781_v60 = vpack.c.bf16 %v758_v54, %v758_v54 }
 0x13f   : > { %v760_v58 = vsel %vm3409_vm10, %v625_v55, 0.0  ;;  %v603_v59 = vpop.f32.mrf.mxu2 }
 0x140   : > { %v604_v61 = vadd.f32 %v603_v59, %v459_v40  ;;  %v548_v62 = vpop.f32.mrf.mxu0  ;;  %v782_v63 = vpack.c.bf16 %v760_v58, %v759_v57 }
 0x141   : > { %v549_v7 = vadd.f32 %v548_v62, %v3390_v1 }
 0x142   : > { %v626_v2 = vmax.f32 %v604_v61, 0.0  ;;  %v577_v4 = vpop.f32.mrf.mxu1  ;;  %816 = vrot.lane.b32.xlu2 %v782_v63, %s3208_s28  ;;  %814 = vrot.lane.b32.xlu1 %v781_v60, %s3208_s28 }
 0x143   : > { %v578_v5 = vadd.f32 %v577_v4, %v3390_v1  ;;  %v627_v18 = vmax.f32 %v549_v7, 0.0 }
 0x144   : > { %v761_v6 = vsel %vm3417_vm12, %v626_v2, 0.0 }
 0x145   : > { %v783_v13 = vpack.c.bf16 %v761_v6, %v761_v6  ;;  %v628_v14 = vmax.f32 %v578_v5, 0.0 }
 0x147   : > { %v606_v8 = vpop.f32.mrf.mxu2  ;;  %v763_v21 = vsel %vm3409_vm10, %v628_v14, 0.0 }
 0x148   : > { %v607_v10 = vadd.f32 %v606_v8, %v3390_v1  ;;  %v550_v12 = vpop.f32.mrf.mxu0  ;;  %v762_v1 = vsel %vm3405_vm9, %v627_v18, 0.0 }
 0x149   : > { %v551_v15 = vadd.f32 %v550_v12, %v469_v9  ;;  %v784_v31 = vpack.c.bf16 %v763_v21, %v762_v1 }
 0x14a   : > { %v629_v16 = vmax.f32 %v607_v10, 0.0  ;;  %v579_v17 = vpop.f32.mrf.mxu1  ;;  %818 = vrot.lane.b32.xlu2 %v783_v13, %s3208_s28 }
 0x14b   : > { %v630_v0 = vmax.f32 %v551_v15, 0.0  ;;  %v580_v3 = vadd.f32 %v579_v17, %v469_v9 }
 0x14c   : > { %v764_v19 = vsel %vm3417_vm12, %v629_v16, 0.0 }
 0x14d   : > { %v785_v24 = vpack.c.bf16 %v764_v19, %v764_v19  ;;  %v631_v25 = vmax.f32 %v580_v3, 0.0  ;;  %v765_v27 = vsel %vm3405_vm9, %v630_v0, 0.0 }
 0x14f   : > { %v766_v28 = vsel %vm3409_vm10, %v631_v25, 0.0  ;;  %v608_v29 = vpop.f32.mrf.mxu2  ;;  %822 = vrot.lane.b32.xlu1 %v785_v24, %s3208_s28 }
 0x150   : > { %v609_v20 = vadd.f32 %v608_v29, %v469_v9  ;;  %v553_v22 = vpop.f32.mrf.mxu0  ;;  %v786_v30 = vpack.c.bf16 %v766_v28, %v765_v27 }
 0x151   : > { %v554_v32 = vadd.f32 %v553_v22, %v3394_v23 }
 0x152   : > { %v632_v33 = vmax.f32 %v609_v20, 0.0  ;;  %v582_v34 = vpop.f32.mrf.mxu1  ;;  %824 = vrot.lane.b32.xlu0 %v786_v30, %s3208_s28  ;;  %820 = vrot.lane.b32.xlu2 %v784_v31, %s3208_s28  ;;  %v5437_v31 = vmov 0 }
 0x153   : > { %v633_v35 = vmax.f32 %v554_v32, 0.0  ;;  %v583_v39 = vadd.f32 %v582_v34, %v3394_v23  ;;  %v5438_v31 = vsel %vm3562_vm3, 4294967295, %v5437_v31 }
 0x154   : > { %v767_v41 = vsel %vm3417_vm12, %v632_v33, 0.0  ;;  %5439 = vst [vmem:[#allocation7_spill] sm:$0xff] %v5438_v31 }
 0x155   : > { %v634_v40 = vmax.f32 %v583_v39, 0.0  ;;  %v768_v42 = vsel %vm3405_vm9, %v633_v35, 0.0  ;;  %v787_v48 = vpack.c.bf16 %v767_v41, %v767_v41 }
 0x157   : > { %v769_v43 = vsel %vm3409_vm10, %v634_v40, 0.0  ;;  %v611_v44 = vpop.f32.mrf.mxu2 }
 0x158   : > { %v612_v45 = vadd.f32 %v611_v44, %v3394_v23  ;;  %v555_v46 = vpop.f32.mrf.mxu0  ;;  %v788_v47 = vpack.c.bf16 %v769_v43, %v768_v42 }
 0x159   : > { %v556_v23 = vadd.f32 %v555_v46, %v3424_v56 }
 0x15a   : > { %v635_v49 = vmax.f32 %v612_v45, 0.0  ;;  %v584_v51 = vpop.f32.mrf.mxu1  ;;  %828 = vrot.lane.b32.xlu0 %v788_v47, %s3208_s28  ;;  %826 = vrot.lane.b32.xlu2 %v787_v48, %s3208_s28 }
 0x15b   : > { %v585_v52 = vadd.f32 %v584_v51, %v3424_v56  ;;  %v636_v58 = vmax.f32 %v556_v23, 0.0 }
 0x15c   : > { %v770_v53 = vsel %vm3417_vm12, %v635_v49, 0.0 }
 0x15d   : > { %v789_v54 = vpack.c.bf16 %v770_v53, %v770_v53  ;;  %v637_v55 = vmax.f32 %v585_v52, 0.0 }
 0x15f   : > { %v613_v57 = vpop.f32.mrf.mxu2  ;;  %830 = vrot.lane.b32.xlu1 %v789_v54, %s3208_s28  ;;  %v772_v61 = vsel %vm3409_vm10, %v637_v55, 0.0 }
 0x160   : > { %v614_v59 = vadd.f32 %v613_v57, %v3424_v56  ;;  %v558_v60 = vpop.f32.mrf.mxu0  ;;  %v771_v56 = vsel %vm3405_vm9, %v636_v58, 0.0 }
 0x161   : > { %v559_v4 = vadd.f32 %v558_v60, %v3403_v36  ;;  %v790_v7 = vpack.c.bf16 %v772_v61, %v771_v56 }
 0x162   : > { %v638_v62 = vmax.f32 %v614_v59, 0.0  ;;  %v587_v63 = vpop.f32.mrf.mxu1 }
 0x163   : > { %v588_v2 = vadd.f32 %v587_v63, %v3403_v36  ;;  %v639_v10 = vmax.f32 %v559_v4, 0.0 }
 0x164   : > { %v773_v5 = vsel %vm3417_vm12, %v638_v62, 0.0 }
 0x165   : > { %v791_v6 = vpack.c.bf16 %v773_v5, %v773_v5  ;;  %v640_v8 = vmax.f32 %v588_v2, 0.0  ;;  %v774_v0 = vsel %vm3405_vm9, %v639_v10, 0.0 }
 0x167   : > { %v616_v9 = vpop.f32.mrf.mxu2  ;;  %834 = vrot.lane.b32.xlu2 %v791_v6, %s3208_s28  ;;  %832 = vrot.lane.b32.xlu1 %v790_v7, %s3208_s28  ;;  %v775_v14 = vsel %vm3409_vm10, %v640_v8, 0.0 }
 0x168   : > { %v560_v12 = vpop.f32.mrf.mxu0  ;;  %v617_v15 = vadd.f32 %v616_v9, %v3403_v36  ;;  %v792_v19 = vpack.c.bf16 %v775_v14, %v774_v0 }
 0x169   : > { %v561_v13 = vadd.f32 %v560_v12, %v3388_v11 }
 0x16a   : > { %v589_v16 = vpop.f32.mrf.mxu1  ;;  %v641_v21 = vmax.f32 %v617_v15, 0.0 }
 0x16b   : > { %v642_v17 = vmax.f32 %v561_v13, 0.0  ;;  %v590_v18 = vadd.f32 %v589_v16, %v3388_v11 }
 0x16c   : > { %v776_v28 = vsel %vm3417_vm12, %v641_v21, 0.0 }
 0x16d   : > { %v643_v3 = vmax.f32 %v590_v18, 0.0  ;;  %v777_v24 = vsel %vm3405_vm9, %v642_v17, 0.0  ;;  %v793_v20 = vpack.c.bf16 %v776_v28, %v776_v28 }
 0x16f   : > { %v778_v25 = vsel %vm3409_vm10, %v643_v3, 0.0  ;;  %v618_v36 = vpop.f32.mrf.mxu2  ;;  %836 = vrot.lane.b32.xlu1 %v792_v19, %s3208_s28 }
 0x170   : > { %v619_v1 = vadd.f32 %v618_v36, %v3388_v11  ;;  %v794_v27 = vpack.c.bf16 %v778_v25, %v777_v24 }
 0x172   : > { %v644_v29 = vmax.f32 %v619_v1, 0.0  ;;  %840 = vrot.lane.b32.xlu2 %v794_v27, %s3208_s28 }
 0x174   : > { %v779_v22 = vsel %vm3417_vm12, %v644_v29, 0.0 }
 0x175   : > { %v795_v30 = vpack.c.bf16 %v779_v22, %v779_v22 }
 0x177   : > { %838 = vrot.lane.b32.xlu1 %v793_v20, %s3208_s28 }
 0x17a   : > { %842 = vrot.lane.b32.xlu2 %v795_v30, %s3208_s28 }
 0x19c   : > { %v817_v11 = vpop.permute.xlu2 %816 }
 0x19d   : > { %v845_v32 = vrot.slane %v817_v11, 4 }
 0x19f   : > { %v855_v33 = vsel %vm852_vm11, %v845_v32, %v817_v11 }
 0x1a0   : > { %891 = vst.msk [vmem:[#allocation2 + $0xc] sm:$0xff] %vm3562_vm3, %v855_v33 }
 0x1a4   : > { %v819_v34 = vpop.permute.xlu2 %818 }
 0x1a5   : > { %v856_v35 = vsel %vm852_vm11, %v845_v32, %v819_v34 }
 0x1a6   : > { %892 = vst.msk [vmem:[#allocation2 + $0x14] sm:$0xf] %vm889_vm0, %v856_v35 }
 0x1a7   : > { %v2891_v46 = vld [vmem:[#allocation2 + $0xc] sm:$0xf0]  ;;  %v3105_v47 = vld [vmem:[#allocation2 + $0x8] sm:$0xf0] }
 0x1ac   : > { %v821_v38 = vpop.permute.xlu2 %820  ;;  %v813_v39 = vpop.permute.xlu1 %812 }
 0x1ad   : > { %v846_v40 = vrot.slane %v821_v38, 4  ;;  %v844_v41 = vrot.slane %v813_v39, 4 }
 0x1af   : > { %v857_v42 = vsel %vm852_vm11, %v846_v40, %v821_v38  ;;  %v853_v43 = vsel %vm852_vm11, %v844_v41, %v813_v39 }
 0x1b0   : > { %893 = vst.msk [vmem:[#allocation2 + $0x18] sm:$0xff] %vm3562_vm3, %v857_v42 }
 0x1b1   : > { %888 = vst.msk [vmem:[#allocation2] sm:$0xff] %vm3562_vm3, %v853_v43 }
 0x1b4   : > { %v815_v44 = vpop.permute.xlu1 %814  ;;  %v827_v53 = vpop.permute.xlu2 %826 }
 0x1b5   : > { %v854_v45 = vsel %vm852_vm11, %v844_v41, %v815_v44 }
 0x1b6   : > { %890 = vst.msk [vmem:[#allocation2 + $0x8] sm:$0xf] %vm889_vm0, %v854_v45 }
 0x1b7   : > { %v2901_v56 = vld [vmem:[#allocation2 + $0x18] sm:$0xf]  ;;  %v3107_v14 = vld [vmem:[#allocation2 + $0x1c] sm:$0xf] }
 0x1b8   : > { %v3104_v48 = vld [vmem:[#allocation2 + $0x4] sm:$0xf]  ;;  %v2889_v49 = vld [vmem:[#allocation2] sm:$0xf] }
 0x1b9   : > { %v3579_v51 = vor.u32 %v3105_v47, %v2889_v49  ;;  %v3581_v52 = vor.u32 %v3104_v48, %v2891_v46 }
 0x1bb   : > { %1017 = vrot.lane.b32.xlu1 %v3579_v51, %s3206_s14  ;;  %1109 = vrot.lane.b32.xlu0 %v3581_v52, %s3205_s13 }
 0x1bc   : > { %1019 = vrot.lane.b32.xlu2 %v3581_v52, %s3206_s14 }
 0x1c1   : > { %v823_v23 = vpop.permute.xlu1 %822  ;;  %v835_v55 = vpop.permute.xlu2 %834 }
 0x1c2   : > { %v858_v54 = vsel %vm852_vm11, %v846_v40, %v823_v23 }
 0x1c3   : > { %894 = vst.msk [vmem:[#allocation2 + $0x20] sm:$0xf] %vm889_vm0, %v858_v54  ;;  %1199 = vrot.lane.b32.xlu1 %v3581_v52, %s3203_s11  ;;  %1197 = vrot.lane.b32.xlu0 %v3579_v51, %s3203_s11 }
 0x1c4   : > { %1107 = vrot.lane.b32.xlu2 %v3579_v51, %s3205_s13  ;;  %v825_v57 = vpop.permute.xlu0 %824 }
 0x1c5   : > { %v847_v58 = vrot.slane %v825_v57, 4 }
 0x1c7   : > { %v859_v59 = vsel %vm852_vm11, %v847_v58, %v825_v57  ;;  %v860_v60 = vsel %vm852_vm11, %v847_v58, %v827_v53 }
 0x1c8   : > { %895 = vst.msk [vmem:[#allocation2 + $0x24] sm:$0xff] %vm3562_vm3, %v859_v59 }
 0x1c9   : > { %896 = vst.msk [vmem:[#allocation2 + $0x2c] sm:$0xf] %vm889_vm0, %v860_v60 }
 0x1ca   : > { %v2909_v53 = vld [vmem:[#allocation2 + $0x20] sm:$0xf] }
 0x1cb   : > { %1152 = vrot.lane.b32.xlu1 %v3579_v51, %s3202_s10  ;;  %1064 = vrot.lane.b32.xlu0 %v3581_v52, %s3204_s12 }
 0x1cc   : > { %1062 = vrot.lane.b32.xlu2 %v3579_v51, %s3204_s12  ;;  %v829_v61 = vpop.permute.xlu0 %828  ;;  %v841_v62 = vpop.permute.xlu2 %840 }
 0x1cd   : > { %v848_v63 = vrot.slane %v829_v61, 4  ;;  %v851_v2 = vrot.slane %v841_v62, 4 }
 0x1cf   : > { %v3108_v4 = vld [vmem:[#allocation2 + $0x20] sm:$0xf0]  ;;  %v861_v5 = vsel %vm852_vm11, %v848_v63, %v829_v61  ;;  %v867_v6 = vsel %vm852_vm11, %v851_v2, %v841_v62  ;;  %v2903_v13 = vld [vmem:[#allocation2 + $0x24] sm:$0xf0]  ;;  %v3106_v62 = vld [vmem:[#allocation2 + $0x10] sm:$0xf0] }
 0x1d0   : > { %v3610_v7 = vor.u32 %v3108_v4, %v2901_v56  ;;  %897 = vst.msk [vmem:[#allocation2 + $0x30] sm:$0xff] %vm3562_vm3, %v861_v5  ;;  %v3626_v15 = vor.u32 %v3107_v14, %v2903_v13  ;;  %v3109_v49 = vld [vmem:[#allocation2 + $0x28] sm:$0xf0]  ;;  %v2897_v61 = vld [vmem:[#allocation2 + $0x8] sm:$0xf] }
 0x1d1   : > { %903 = vst.msk [vmem:[#allocation2 + $0x54] sm:$0xff] %vm3562_vm3, %v867_v6  ;;  %v831_v8 = vpop.permute.xlu1 %830  ;;  %v3738_v23 = vor.u32 %v3109_v49, %v2909_v53 }
 0x1d2   : > { %v862_v9 = vsel %vm852_vm11, %v848_v63, %v831_v8  ;;  %v3764_v63 = vor.u32 %v3106_v62, %v2897_v61 }
 0x1d3   : > { %898 = vst.msk [vmem:[#allocation2 + $0x38] sm:$0xf] %vm889_vm0, %v862_v9  ;;  %1023 = vrot.lane.b32.xlu1 %v3610_v7, %s3206_s14  ;;  %1203 = vrot.lane.b32.xlu0 %v3610_v7, %s3203_s11 }
 0x1d4   : > { %1154 = vrot.lane.b32.xlu2 %v3581_v52, %s3202_s10  ;;  %v843_v10 = vpop.permute.xlu2 %842 }
 0x1d5   : > { %v868_v12 = vsel %vm852_vm11, %v851_v2, %v843_v10 }
 0x1d6   : > { %904 = vst.msk [vmem:[#allocation2 + $0x5c] sm:$0xf] %vm889_vm0, %v868_v12 }
 0x1d7   : > { %v3110_v25 = vld [vmem:[#allocation2 + $0x34] sm:$0xf]  ;;  %v2913_v29 = vld [vmem:[#allocation2 + $0x30] sm:$0xf] }
 0x1d8   : > { %v2927_v30 = vld [vmem:[#allocation2 + $0x54] sm:$0xf0]  ;;  %v3114_v33 = vld [vmem:[#allocation2 + $0x50] sm:$0xf0] }
 0x1d9   : > { %v833_v16 = vpop.permute.xlu1 %832 }
 0x1da   : > { %v849_v17 = vrot.slane %v833_v16, 4  ;;  %v2921_v39 = vld [vmem:[#allocation2 + $0x38] sm:$0xf] }
 0x1db   : > { %1113 = vrot.lane.b32.xlu1 %v3610_v7, %s3205_s13  ;;  %1070 = vrot.lane.b32.xlu0 %v3626_v15, %s3204_s12 }
 0x1dc   : > { %v863_v18 = vsel %vm852_vm11, %v849_v17, %v833_v16  ;;  %v864_v0 = vsel %vm852_vm11, %v849_v17, %v835_v55  ;;  %1025 = vrot.lane.b32.xlu2 %v3626_v15, %s3206_s14 }
 0x1dd   : > { %899 = vst.msk [vmem:[#allocation2 + $0x3c] sm:$0xff] %vm3562_vm3, %v863_v18  ;;  %v3115_v10 = vld [vmem:[#allocation2 + $0x58] sm:$0xf0] }
 0x1de   : > { %900 = vst.msk [vmem:[#allocation2 + $0x44] sm:$0xf] %vm889_vm0, %v864_v0 }
 0x1e1   : > { %v837_v3 = vpop.permute.xlu1 %836 }
 0x1e2   : > { %v850_v19 = vrot.slane %v837_v3, 4 }
 0x1e3   : > { %1205 = vrot.lane.b32.xlu1 %v3626_v15, %s3203_s11  ;;  %1158 = vrot.lane.b32.xlu0 %v3610_v7, %s3202_s10 }
 0x1e4   : > { %v865_v21 = vsel %vm852_vm11, %v850_v19, %v837_v3  ;;  %1115 = vrot.lane.b32.xlu2 %v3626_v15, %s3205_s13  ;;  %v2915_v24 = vld [vmem:[#allocation2 + $0x3c] sm:$0xf0]  ;;  %v3111_v28 = vld [vmem:[#allocation2 + $0x38] sm:$0xf0] }
 0x1e5   : > { %901 = vst.msk [vmem:[#allocation2 + $0x48] sm:$0xff] %vm3562_vm3, %v865_v21  ;;  %v3648_v36 = vor.u32 %v3110_v25, %v2915_v24  ;;  %v3658_v20 = vor.u32 %v3111_v28, %v2913_v29  ;;  %v3112_v38 = vld [vmem:[#allocation2 + $0x40] sm:$0xf0] }
 0x1e6   : > { %v3696_v40 = vor.u32 %v3112_v38, %v2921_v39 }
 0x1e9   : > { %v839_v1 = vpop.permute.xlu1 %838 }
 0x1ea   : > { %v866_v27 = vsel %vm852_vm11, %v850_v19, %v839_v1 }
 0x1eb   : > { %902 = vst.msk [vmem:[#allocation2 + $0x50] sm:$0xf] %vm889_vm0, %v866_v27  ;;  %1160 = vrot.lane.b32.xlu1 %v3626_v15, %s3202_s10  ;;  %1031 = vrot.lane.b32.xlu0 %v3648_v36, %s3206_s14 }
 0x1ec   : > { %1068 = vrot.lane.b32.xlu2 %v3610_v7, %s3204_s12  ;;  %v3113_v22 = vld [vmem:[#allocation2 + $0x4c] sm:$0xf]  ;;  %v2925_v32 = vld [vmem:[#allocation2 + $0x48] sm:$0xf] }
 0x1ed   : > { %v3678_v11 = vor.u32 %v3113_v22, %v2927_v30  ;;  %v3686_v34 = vor.u32 %v3114_v33, %v2925_v32 }
 0x1f2   : > { %v2933_v8 = vld [vmem:[#allocation2 + $0x50] sm:$0xf] }
 0x1f3   : > { %1293 = vrot.lane.b32.xlu1 %v3610_v7, %s3201_s9  ;;  %1119 = vrot.lane.b32.xlu0 %v3658_v20, %s3205_s13  ;;  %v3788_v12 = vor.u32 %v3115_v10, %v2933_v8 }
 0x1f4   : > { %1029 = vrot.lane.b32.xlu2 %v3658_v20, %s3206_s14 }
 0x1fb   : > { %1121 = vrot.lane.b32.xlu1 %v3648_v36, %s3205_s13  ;;  %1211 = vrot.lane.b32.xlu0 %v3648_v36, %s3203_s11 }
 0x1fc   : > { %1209 = vrot.lane.b32.xlu2 %v3658_v20, %s3203_s11 }
 0x203   : > { %1166 = vrot.lane.b32.xlu1 %v3648_v36, %s3202_s10  ;;  %1076 = vrot.lane.b32.xlu0 %v3648_v36, %s3204_s12 }
 0x204   : > { %1074 = vrot.lane.b32.xlu2 %v3658_v20, %s3204_s12 }
 0x20b   : > { %1164 = vrot.lane.b32.xlu0 %v3658_v20, %s3202_s10  ;;  %1037 = vrot.lane.b32.xlu1 %v3678_v11, %s3206_s14 }
 0x20c   : > { %1299 = vrot.lane.b32.xlu2 %v3658_v20, %s3201_s9 }
 0x213   : > { %1301 = vrot.lane.b32.xlu0 %v3648_v36, %s3201_s9  ;;  %1127 = vrot.lane.b32.xlu1 %v3678_v11, %s3205_s13 }
 0x214   : > { %1215 = vrot.lane.b32.xlu2 %v3686_v34, %s3203_s11 }
 0x216   : > { %v3694_v35 = vpop.permute.xlu2 %1019 }
 0x21b   : > { %1035 = vrot.lane.b32.xlu0 %v3686_v34, %s3206_s14  ;;  %1033 = vrot.lane.b32.xlu1 %v3696_v40, %s3206_s14 }
 0x21c   : > { %1295 = vrot.lane.b32.xlu2 %v3626_v15, %s3201_s9 }
 0x21e   : > { %v3704_v41 = vpop.permute.xlu2 %1107 }
 0x223   : > { %1125 = vrot.lane.b32.xlu0 %v3686_v34, %s3205_s13  ;;  %1256 = vrot.lane.b32.xlu1 %v3648_v36, %s3199_s30 }
 0x224   : > { %1080 = vrot.lane.b32.xlu2 %v3686_v34, %s3204_s12 }
 0x226   : > { %v3712_v42 = vpop.permute.xlu2 %1062 }
 0x22b   : > { %1217 = vrot.lane.b32.xlu0 %v3678_v11, %s3203_s11  ;;  %1172 = vrot.lane.b32.xlu1 %v3678_v11, %s3202_s10 }
 0x22c   : > { %1287 = vrot.lane.b32.xlu2 %v3579_v51, %s3201_s9 }
 0x22d   : > { %v3720_v43 = vpop.permute.xlu0 %1109  ;;  %v3722_v44 = vpop.permute.xlu1 %1017 }
 0x22e   : > { %v3724_v45 = vpop.permute.xlu2 %1154 }
 0x22f   : > { %5440 = vst [vmem:[#allocation8_spill] sm:$0xff] %v3724_v45 }
 0x233   : > { %1289 = vrot.lane.b32.xlu0 %v3581_v52, %s3201_s9  ;;  %1346 = vrot.lane.b32.xlu1 %v3648_v36, %s3200_s8 }
 0x234   : > { %1123 = vrot.lane.b32.xlu2 %v3696_v40, %s3205_s13 }
 0x235   : > { %v3732_v46 = vpop.permute.xlu0 %1197  ;;  %v3734_v47 = vpop.permute.xlu1 %1199 }
 0x236   : > { %v3736_v48 = vpop.permute.xlu2 %1025 }
 0x23b   : > { %1254 = vrot.lane.b32.xlu0 %v3658_v20, %s3199_s30  ;;  %1250 = vrot.lane.b32.xlu1 %v3626_v15, %s3199_s30 }
 0x23c   : > { %1027 = vrot.lane.b32.xlu2 %v3738_v23, %s3206_s14 }
 0x23d   : > { %v3746_v54 = vpop.permute.xlu0 %1064  ;;  %v3748_v55 = vpop.permute.xlu1 %1152 }
 0x23e   : > { %v3750_v57 = vpop.permute.xlu2 %1115 }
 0x243   : > { %1082 = vrot.lane.b32.xlu0 %v3678_v11, %s3204_s12  ;;  %1307 = vrot.lane.b32.xlu1 %v3678_v11, %s3201_s9 }
 0x244   : > { %1117 = vrot.lane.b32.xlu2 %v3738_v23, %s3205_s13 }
 0x245   : > { %v3758_v58 = vpop.permute.xlu0 %1203  ;;  %v3760_v59 = vpop.permute.xlu1 %1023 }
 0x246   : > { %v3762_v60 = vpop.permute.xlu2 %1068 }
 0x24b   : > { %1170 = vrot.lane.b32.xlu0 %v3686_v34, %s3202_s10  ;;  %1262 = vrot.lane.b32.xlu1 %v3678_v11, %s3199_s30 }
 0x24c   : > { %1021 = vrot.lane.b32.xlu2 %v3764_v63, %s3206_s14 }
 0x24d   : > { %v3772_v2 = vpop.permute.xlu0 %1070  ;;  %v3774_v56 = vpop.permute.xlu1 %1113 }
 0x24e   : > { %v1030_v4 = vpop.permute.xlu2 %1029  ;;  %v1089_v26 = vsel %vm358_vm7, %v3762_v60, %v3772_v2 }
 0x253   : > { %1344 = vrot.lane.b32.xlu0 %v3658_v20, %s3200_s8  ;;  %1352 = vrot.lane.b32.xlu1 %v3678_v11, %s3200_s8 }
 0x254   : > { %1111 = vrot.lane.b32.xlu2 %v3764_v63, %s3205_s13 }
 0x255   : > { %v3782_v5 = vpop.permute.xlu0 %1158  ;;  %v3784_v6 = vpop.permute.xlu1 %1205 }
 0x256   : > { %v3786_v9 = vpop.permute.xlu2 %1209 }
 0x25b   : > { %1248 = vrot.lane.b32.xlu0 %v3610_v7, %s3199_s30  ;;  %1129 = vrot.lane.b32.xlu1 %v3788_v12, %s3205_s13 }
 0x25c   : > { %1338 = vrot.lane.b32.xlu2 %v3610_v7, %s3200_s8 }
 0x25d   : > { %v3796_v13 = vpop.permute.xlu0 %1031  ;;  %v3798_v14 = vpop.permute.xlu1 %1160 }
 0x25e   : > { %5441 = vst [vmem:[#allocation9_spill] sm:$0xff] %v3798_v14  ;;  %v3800_v16 = vpop.permute.xlu2 %1074  ;;  %v1046_v53 = vsel %vm346_vm6, %v1030_v4, %v3796_v13  ;;  %v1042_v4 = vsel %vm346_vm6, %v3722_v44, %v3694_v35  ;;  %v1134_v44 = vsel %vm370_vm8, %v3774_v56, %v3750_v57 }
 0x263   : > { %1305 = vrot.lane.b32.xlu0 %v3686_v34, %s3201_s9  ;;  %1332 = vrot.lane.b32.xlu1 %v3579_v51, %s3200_s8 }
 0x264   : > { %1242 = vrot.lane.b32.xlu2 %v3579_v51, %s3199_s30 }
 0x265   : > { %v1120_v17 = vpop.permute.xlu0 %1119  ;;  %v3808_v18 = vpop.permute.xlu1 %1293 }
 0x266   : > { %v3810_v0 = vpop.permute.xlu2 %1299 }
 0x26b   : > { %1260 = vrot.lane.b32.xlu0 %v3686_v34, %s3199_s30  ;;  %1084 = vrot.lane.b32.xlu1 %v3788_v12, %s3204_s12 }
 0x26c   : > { %1334 = vrot.lane.b32.xlu2 %v3581_v52, %s3200_s8 }
 0x26d   : > { %v3818_v3 = vpop.permute.xlu0 %1211  ;;  %v3820_v19 = vpop.permute.xlu1 %1121 }
 0x26e   : > { %v1216_v21 = vpop.permute.xlu2 %1215 }
 0x273   : > { %1350 = vrot.lane.b32.xlu0 %v3686_v34, %s3200_s8  ;;  %1072 = vrot.lane.b32.xlu1 %v3738_v23, %s3204_s12 }
 0x274   : > { %1066 = vrot.lane.b32.xlu2 %v3764_v63, %s3204_s12 }
 0x275   : > { %v3828_v24 = vpop.permute.xlu0 %1076  ;;  %v3830_v25 = vpop.permute.xlu1 %1166 }
 0x276   : > { %v3832_v1 = vpop.permute.xlu2 %1295 }
 0x27b   : > { %1207 = vrot.lane.b32.xlu1 %v3738_v23, %s3203_s11  ;;  %1039 = vrot.lane.b32.xlu0 %v3788_v12, %s3206_s14 }
 0x27c   : > { %1213 = vrot.lane.b32.xlu2 %v3696_v40, %s3203_s11 }
 0x27d   : > { %v3840_v27 = vpop.permute.xlu0 %1164  ;;  %v3842_v28 = vpop.permute.xlu1 %1037 }
 0x27e   : > { %v3844_v29 = vpop.permute.xlu2 %1080  ;;  %v1181_v60 = vsel %vm382_vm5, %v3840_v27, %v3830_v25  ;;  %v2945_v27 = vld [vmem:[%s5394_s3 + $0x8] sm:$0xf] }
 0x283   : > { %1309 = vrot.lane.b32.xlu1 %v3788_v12, %s3201_s9  ;;  %1340 = vrot.lane.b32.xlu0 %v3626_v15, %s3200_s8 }
 0x284   : > { %1297 = vrot.lane.b32.xlu2 %v3738_v23, %s3201_s9 }
 0x285   : > { %v3852_v22 = vpop.permute.xlu0 %1301  ;;  %v3854_v30 = vpop.permute.xlu1 %1127 }
 0x286   : > { %v3856_v32 = vpop.permute.xlu2 %1287 }
 0x28b   : > { %1291 = vrot.lane.b32.xlu1 %v3764_v63, %s3201_s9  ;;  %1244 = vrot.lane.b32.xlu0 %v3581_v52, %s3199_s30 }
 0x28c   : > { %1258 = vrot.lane.b32.xlu2 %v3696_v40, %s3199_s30 }
 0x28d   : > { %v1036_v33 = vpop.permute.xlu0 %1035  ;;  %v3864_v38 = vpop.permute.xlu1 %1033 }
 0x28e   : > { %v3866_v39 = vpop.permute.xlu2 %1123  ;;  %v1048_v49 = vsel %vm346_vm6, %v1036_v33, %v3842_v28  ;;  %v1044_v33 = vsel %vm346_vm6, %v3760_v59, %v3736_v48 }
 0x28f   : > { %5442 = vst [vmem:[#allocation10_spill] sm:$0xff] %v3866_v39  ;;  %1530 = vmatpush.bf16.msra.mxu3 %v1048_v49  ;;  %v1136_v49 = vsel %vm370_vm8, %v1120_v17, %v3820_v19  ;;  %v1226_v17 = vsel %vm394_vm4, %v3786_v9, %v3818_v3 }
 0x293   : > { %1168 = vrot.lane.b32.xlu1 %v3696_v40, %s3202_s10  ;;  %1078 = vrot.lane.b32.xlu0 %v3696_v40, %s3204_s12 }
 0x294   : > { %1174 = vrot.lane.b32.xlu2 %v3788_v12, %s3202_s10  ;;  %1531 = vmatpush.bf16.msra.mxu3 %v1046_v53 }
 0x295   : > { %v1126_v61 = vpop.permute.xlu0 %1125  ;;  %v3878_v62 = vpop.permute.xlu1 %1256 }
 0x296   : > { %v3880_v8 = vpop.permute.xlu2 %1027  ;;  %v1138_v10 = vsel %vm370_vm8, %v1126_v61, %v3854_v30 }
 0x297   : > { %1559 = vmatpush.bf16.msrb.mxu0 %v1138_v10 }
 0x298   : > { %1532 = vmatpush.bf16.msra.mxu3 %v1044_v33  ;;  %v1224_v33 = vsel %vm394_vm4, %v3758_v58, %v3784_v6 }
 0x29b   : > { %1252 = vrot.lane.b32.xlu1 %v3738_v23, %s3199_s30  ;;  %1303 = vrot.lane.b32.xlu0 %v3696_v40, %s3201_s9 }
 0x29c   : > { %1354 = vrot.lane.b32.xlu2 %v3788_v12, %s3200_s8  ;;  %1533 = vmatpush.bf16.msra.mxu3 %v1042_v4  ;;  %v3086_v4 = vld [vmem:[%s5394_s3 + $0x10] sm:$0xf0] }
 0x29d   : > { %1560 = vmatpush.bf16.msrb.mxu0 %v1136_v49  ;;  %v3898_v59 = vpop.permute.xlu0 %1217  ;;  %v3900_v53 = vpop.permute.xlu1 %1172  ;;  %v1222_v49 = vsel %vm394_vm4, %v3732_v46, %v3734_v47  ;;  %v935_v46 = vld [vmem:[%s5395_s4 + $0x30] sm:$0xff] }
 0x29e   : > { %v3902_v61 = vpop.permute.xlu2 %1117  ;;  %v1228_v10 = vsel %vm394_vm4, %v1216_v21, %v3898_v59 }
 0x29f   : > { %5443 = vst [vmem:[#allocation11_spill] sm:$0xff] %v3902_v61  ;;  %1588 = vmatpush.bf16.msrb.mxu1 %v1228_v10 }
 0x2a0   : > { %1534 = vmatpush.bf16.msra.mxu3 %v3686_v34  ;;  %v1132_v34 = vsel %vm370_vm8, %v3704_v41, %v3720_v43  ;;  %v929_v41 = vld [vmem:[%s5395_s4] sm:$0xff] }
 0x2a1   : > { %1561 = vmatpush.bf16.msrb.mxu0 %v1134_v44 }
 0x2a3   : > { %1589 = vmatpush.bf16.msrb.mxu1 %v1226_v17  ;;  %1246 = vrot.lane.b32.xlu1 %v3764_v63, %s3199_s30  ;;  %v936_v17 = vld [vmem:[%s5395_s4 + $0x38] sm:$0xff] }
 0x2a4   : > { %1348 = vrot.lane.b32.xlu2 %v3696_v40, %s3200_s8  ;;  %1219 = vrot.lane.b32.xlu0 %v3788_v12, %s3203_s11 }
 0x2a5   : > { %1535 = vmatpush.bf16.msra.mxu3 %v3658_v20  ;;  %1562 = vmatpush.bf16.msrb.mxu0 %v1132_v34  ;;  %v3923_v56 = vpop.permute.xlu0 %1289  ;;  %v3925_v9 = vpop.permute.xlu1 %1346  ;;  %v2937_v20 = vld [vmem:[%s5394_s3] sm:$0xf] }
 0x2a6   : > { %v3927_v21 = vpop.permute.xlu2 %1021 }
 0x2a7   : > { %1590 = vmatpush.bf16.msrb.mxu1 %v1224_v33 }
 0x2a9   : > { %1536 = vmatpush.bf16.msra.mxu3 %v3610_v7  ;;  %v3949_v7 = vor.u32 %v3086_v4, %v2937_v20  ;;  %v934_v20 = vld [vmem:[%s5395_s4 + $0x28] sm:$0xff]  ;;  %v931_v4 = vld [vmem:[%s5395_s4 + $0x10] sm:$0xff] }
 0x2ab   : > { %1336 = vrot.lane.b32.xlu1 %v3764_v63, %s3200_s8  ;;  %1591 = vmatpush.bf16.msrb.mxu1 %v1222_v49  ;;  %v2957_v49 = vld [vmem:[%s5394_s3 + $0x28] sm:$0xf] }
 0x2ac   : > { %1379 = vperm.xlu2 %3189, %v929_v41   ;;  %1201 = vrot.lane.b32.xlu0 %v3764_v63, %s3203_s11 }
 0x2ad   : > { %1537 = vmatpush.bf16.msra.mxu3 %v3579_v51  ;;  %v3952_v58 = vpop.permute.xlu0 %1254  ;;  %v3954_v10 = vpop.permute.xlu1 %1250 }
 0x2ae   : > { %v3956_v44 = vpop.permute.xlu2 %1111 }
 0x2b0   : > { %1538 = vmatmul.bf16.vlgmr.msra.gmra.mxu3 %v3949_v7 }
 0x2b3   : > { %1409 = vperm.xlu1 %3188, %v935_v46   ;;  %v3091_v46 = vld [vmem:[%s5394_s3 + $0x38] sm:$0xf0] }
 0x2b4   : > { %1414 = vperm.xlu2 %3189, %v936_v17   ;;  %1162 = vrot.lane.b32.xlu0 %v3738_v23, %s3202_s10  ;;  %v3993_v17 = vor.u32 %v3091_v46, %v2957_v49  ;;  %v1087_v49 = vsel %vm358_vm7, %v3712_v42, %v3746_v54  ;;  %v1179_v42 = vsel %vm382_vm5, %v3782_v5, %v3798_v14 }
 0x2b5   : > { %v3967_v51 = vpop.permute.xlu0 %1082  ;;  %v3969_v34 = vpop.permute.xlu1 %1307  ;;  %v1177_v5 = vsel %vm382_vm5, %v3748_v55, %v3724_v45  ;;  %v3089_v55 = vld [vmem:[%s5394_s3 + $0x2c] sm:$0xf] }
 0x2b6   : > { %v3971_v33 = vpop.permute.xlu2 %1338  ;;  %v1093_v41 = vsel %vm358_vm7, %v3844_v29, %v3967_v51  ;;  %v1091_v29 = vsel %vm358_vm7, %v3800_v16, %v3828_v24 }
 0x2b7   : > { %1563 = vmatpush.bf16.msrb.mxu0 %v1093_v41 }
 0x2bb   : > { %1404 = vperm.xlu1 %3188, %v934_v20   ;;  %1564 = vmatpush.bf16.msrb.mxu0 %v1091_v29  ;;  %v3084_v20 = vld [vmem:[%s5394_s3 + $0x4] sm:$0xf] }
 0x2bc   : > { %1389 = vperm.xlu2 %3189, %v931_v4   ;;  %1264 = vrot.lane.b32.xlu0 %v3788_v12, %s3199_s30  ;;  %v2939_v4 = vld [vmem:[%s5394_s3 + $0x14] sm:$0xf0] }
 0x2bd   : > { %v1171_v41 = vpop.permute.xlu0 %1170  ;;  %v3995_v31 = vpop.permute.xlu1 %1262 }
 0x2be   : > { %v3997_v50 = vpop.permute.xlu2 %1242  ;;  %v1183_v16 = vsel %vm382_vm5, %v1171_v41, %v3900_v53 }
 0x2bf   : > { %1565 = vmatpush.bf16.msrb.mxu0 %v1089_v26  ;;  %1592 = vmatpush.bf16.msrb.mxu1 %v1183_v16  ;;  %v4017_v26 = vor.u32 %v3084_v20, %v2939_v4  ;;  %v3087_v16 = vld [vmem:[%s5394_s3 + $0x18] sm:$0xf0]  ;;  %v2977_v20 = vld [vmem:[%s5394_s3 + $0x50] sm:$0xf]  ;;  %v3096_v4 = vld [vmem:[%s5394_s3 + $0x60] sm:$0xf0] }
 0x2c0   : > { %1543 = vmatmul.bf16.gmra.mxu3 %v3993_v17 }
 0x2c3   : > { %1566 = vmatpush.bf16.msrb.mxu0 %v1087_v49  ;;  %1593 = vmatpush.bf16.msrb.mxu1 %v1181_v60  ;;  %v4046_v49 = vor.u32 %v3087_v16, %v2945_v27  ;;  %v4050_v60 = vor.u32 %v3096_v4, %v2977_v20  ;;  %v2959_v27 = vld [vmem:[%s5394_s3 + $0x3c] sm:$0xf0]  ;;  %v930_v20 = vld [vmem:[%s5395_s4 + $0x8] sm:$0xff] }
 0x2c4   : > { %1156 = vrot.lane.b32.xlu0 %v3764_v63, %s3202_s10 }
 0x2c5   : > { %v4021_v46 = vpop.permute.xlu0 %1344  ;;  %v4023_v29 = vpop.permute.xlu1 %1352  ;;  %5444 = vst [vmem:[#allocation12_spill] sm:$0xff] %v4046_v49 }
 0x2c6   : > { %v4025_v41 = vpop.permute.xlu2 %1334  ;;  %1567 = vmatmul.bf16.vlgmr.msrb.gmra.mxu0 %v4017_v26 }
 0x2c7   : > { %1594 = vmatpush.bf16.msrb.mxu1 %v1179_v42 }
 0x2cb   : > { %1595 = vmatpush.bf16.msrb.mxu1 %v1177_v5 }
 0x2cc   : > { %1342 = vrot.lane.b32.xlu0 %v3738_v23, %s3200_s8 }
 0x2cd   : > { %v4052_v42 = vpop.permute.xlu0 %1248  ;;  %v4054_v37 = vpop.permute.xlu1 %1129 }
 0x2ce   : > { %5445 = vst [vmem:[#allocation13_spill] sm:$0xff] %v4054_v37  ;;  %1596 = vmatmul.bf16.vlgmr.msrb.gmra.mxu1 %v4046_v49  ;;  %v1139_v14 = vsel %vm370_vm8, %v3854_v30, %v4054_v37  ;;  %v4066_v16 = vpop.permute.xlu2 %1066  ;;  %v4075_v30 = vor.u32 %v3089_v55, %v2959_v27  ;;  %v1135_v37 = vsel %vm370_vm8, %v3750_v57, %v3902_v61  ;;  %v3092_v55 = vld [vmem:[%s5394_s3 + $0x40] sm:$0xf0] }
 0x2cf   : > { %1704 = vmatpush.bf16.msra.mxu1 %v1139_v14  ;;  %v1137_v14 = vsel %vm370_vm8, %v3820_v19, %v3866_v39  ;;  %v2965_v19 = vld [vmem:[%s5394_s3 + $0x30] sm:$0xf]  ;;  %v933_v27 = vld [vmem:[%s5395_s4 + $0x20] sm:$0xff] }
 0x2d0   : > { %1548 = vmatmul.bf16.gmra.mxu3 %v4050_v60 }
 0x2d3   : > { %1705 = vmatpush.bf16.msra.mxu1 %v1137_v14  ;;  %v1133_v14 = vsel %vm370_vm8, %v3720_v43, %v3956_v44 }
 0x2d4   : > { %1384 = vperm.xlu0 %3190, %v930_v20   ;;  %v2997_v20 = vld [vmem:[%s5394_s3 + $0x78] sm:$0xf] }
 0x2d5   : > { %v1306_v4 = vpop.permute.xlu0 %1305  ;;  %v4077_v5 = vpop.permute.xlu1 %1332 }
 0x2d6   : > { %1572 = vmatmul.bf16.gmra.mxu0 %v4075_v30  ;;  %v1318_v49 = vsel %vm418_vm2, %v1306_v4, %v3969_v34  ;;  %v4100_v57 = vpop.permute.xlu2 %1213  ;;  %v4108_v4 = vor.u32 %v3092_v55, %v2965_v19  ;;  %v3094_v19 = vld [vmem:[%s5394_s3 + $0x54] sm:$0xf]  ;;  %v2979_v55 = vld [vmem:[%s5394_s3 + $0x64] sm:$0xf0] }
 0x2d7   : > { %1617 = vmatpush.bf16.msrb.mxu2 %v1318_v49  ;;  %1706 = vmatpush.bf16.msra.mxu1 %v1135_v37  ;;  %v3101_v37 = vld [vmem:[%s5394_s3 + $0x88] sm:$0xf0]  ;;  %v1316_v49 = vsel %vm418_vm2, %v3810_v0, %v3852_v22  ;;  %v1314_v0 = vsel %vm418_vm2, %v3808_v18, %v3832_v1  ;;  %v932_v18 = vld [vmem:[%s5395_s4 + $0x18] sm:$0xff] }
 0x2d8   : > { %v4110_v61 = vor.u32 %v3101_v37, %v2997_v20 }
 0x2db   : > { %1618 = vmatpush.bf16.msrb.mxu2 %v1316_v49  ;;  %1707 = vmatpush.bf16.msra.mxu1 %v1133_v14 }
 0x2dc   : > { %1399 = vperm.xlu0 %3190, %v933_v27   ;;  %v4134_v27 = vor.u32 %v3094_v19, %v2979_v55  ;;  %v1271_v19 = vsel %vm406_vm1, %v3952_v58, %v3878_v62  ;;  %v1269_v58 = vsel %vm406_vm1, %v4052_v42, %v3954_v10 }
 0x2dd   : > { %v1261_v39 = vpop.permute.xlu0 %1260  ;;  %v4112_v45 = vpop.permute.xlu1 %1084 }
 0x2de   : > { %1601 = vmatmul.bf16.gmra.mxu1 %v4108_v4  ;;  %v1094_v43 = vsel %vm358_vm7, %v3967_v51, %v4112_v45  ;;  %v1312_v51 = vsel %vm418_vm2, %v3856_v32, %v3923_v56  ;;  %v4136_v20 = vpop.permute.xlu2 %1297  ;;  %v1273_v14 = vsel %vm406_vm1, %v1261_v39, %v3995_v31  ;;  %v2985_v32 = vld [vmem:[%s5394_s3 + $0x58] sm:$0xf]  ;;  %v1361_v39 = vsel %vm5447_vm14, %v4021_v46, %v3925_v9 }
 0x2df   : > { %1619 = vmatpush.bf16.msrb.mxu2 %v1314_v0  ;;  %1708 = vmatpush.bf16.msra.mxu1 %v1094_v43  ;;  %v3097_v43 = vld [vmem:[%s5394_s3 + $0x68] sm:$0xf0]  ;;  %vm1517_vm14 = vcmask 523264  }
 0x2e0   : > { %1553 = vmatmul.bf16.gmra.mxu3 %v4110_v61  ;;  %v4157_v55 = vor.u32 %v3097_v43, %v2985_v32  ;;  %v1047_v32 = vsel %vm346_vm6, %v3796_v13, %v3864_v38  ;;  %v3102_v13 = vld [vmem:[%s5394_s3 + $0x90] sm:$0xf0] }
 0x2e2   : > { %5448 = vst [vmem:[#allocation14_spill] sm:$0xff] %v4157_v55 }
 0x2e3   : > { %1620 = vmatpush.bf16.msrb.mxu2 %v1312_v51 }
 0x2e4   : > { %1394 = vperm.xlu0 %3190, %v932_v18  }
 0x2e5   : > { %v1351_v37 = vpop.permute.xlu0 %1350  ;;  %v4138_v49 = vpop.permute.xlu1 %1072 }
 0x2e6   : > { %1577 = vmatmul.bf16.gmra.mxu0 %v4134_v27  ;;  %v1363_v0 = vsel %vm5446_vm13, %v1351_v37, %v4023_v29  ;;  %v4161_v51 = vpop.permute.xlu2 %1258 }
 0x2e7   : > { %1621 = vmatpush.bf16.msrb.mxu2 %v1273_v14  ;;  %1650 = vmatpush.bf16.msrb.mxu3 %v1363_v0  ;;  %v3099_v14 = vld [vmem:[%s5394_s3 + $0x7c] sm:$0xf]  ;;  %v2999_v0 = vld [vmem:[%s5394_s3 + $0x8c] sm:$0xf0] }
 0x2e8   : > { %v4181_v43 = vor.u32 %v3099_v14, %v2999_v0  ;;  %v1357_v14 = vsel %vm5446_vm13, %v4077_v5, %v4025_v41  ;;  %v1043_v0 = vsel %vm346_vm6, %v3694_v35, %v3927_v21  ;;  %v2947_v5 = vld [vmem:[%s5394_s3 + $0x1c] sm:$0xf0] }
 0x2eb   : > { %1622 = vmatpush.bf16.msrb.mxu2 %v1271_v19  ;;  %1651 = vmatpush.bf16.msrb.mxu3 %v1361_v39  ;;  %v1045_v19 = vsel %vm346_vm6, %v3736_v48, %v3880_v8  ;;  %v3005_v39 = vld [vmem:[%s5394_s3 + $0x80] sm:$0xf] }
 0x2ed   : > { %v4159_v18 = vpop.permute.xlu0 %1039  ;;  %v4163_v37 = vpop.permute.xlu1 %1207 }
 0x2ee   : > { %1606 = vmatmul.bf16.gmra.mxu1 %v4157_v55  ;;  %v1049_v46 = vsel %vm346_vm6, %v3842_v28, %v4159_v18  ;;  %v3085_v55 = vld [vmem:[%s5394_s3 + $0xc] sm:$0xf] }
 0x2ef   : > { %1623 = vmatpush.bf16.msrb.mxu2 %v1269_v58  ;;  %1675 = vmatpush.bf16.msra.mxu0 %v1049_v46  ;;  %v2953_v58 = vld [vmem:[%s5394_s3 + $0x10] sm:$0xf]  ;;  %v4204_v46 = vpop.permute.xlu2 %1174 }
 0x2f3   : > { %1676 = vmatpush.bf16.msra.mxu0 %v1047_v32  ;;  %v4214_v32 = vor.u32 %v3102_v13, %v3005_v39  ;;  %v4233_v39 = vor.u32 %v3085_v55, %v2947_v5  ;;  %v2973_v55 = vld [vmem:[%s5394_s3 + $0x38] sm:$0xf] }
 0x2f5   : > { %v4183_v42 = vpop.permute.xlu0 %1340  ;;  %v4206_v48 = vpop.permute.xlu1 %1309 }
 0x2f6   : > { %1582 = vmatmul.bf16.gmra.mxu0 %v4181_v43  ;;  %v1359_v28 = vsel %vm5449_vm15, %v3971_v33, %v4183_v42  ;;  %v3088_v33 = vld [vmem:[%s5394_s3 + $0x20] sm:$0xf0]  ;;  %vm5450_vm15 = vmmov %vm5446_vm13 }
 0x2f7   : > { %1652 = vmatpush.bf16.msrb.mxu3 %v1359_v28  ;;  %1677 = vmatpush.bf16.msra.mxu0 %v1045_v19  ;;  %v4216_v28 = vor.u32 %v3088_v33, %v2953_v58  ;;  %v1319_v19 = vsel %vm418_vm2, %v3969_v34, %v4206_v48  ;;  %v4238_v13 = vpop.permute.xlu2 %1354 }
 0x2fb   : > { %1653 = vmatpush.bf16.msrb.mxu3 %v1357_v14  ;;  %1678 = vmatpush.bf16.msra.mxu0 %v1043_v0  ;;  %v2967_v14 = vld [vmem:[%s5394_s3 + $0x44] sm:$0xf0] }
 0x2fd   : > { %v4227_v35 = vpop.permute.xlu0 %1244 }
 0x2fe   : > { %1611 = vmatmul.bf16.gmra.mxu1 %v4214_v32  ;;  %v1267_v34 = vsel %vm406_vm1, %v3997_v50, %v4227_v35  ;;  %3015 = vmatmul.msk.bf16.vlgmr.msrb.gmra.mxu3 %vm1517_vm14, %v4216_v28 }
 0x2ff   : > { %1762 = vmatpush.bf16.msra.mxu3 %v1319_v19  ;;  %1624 = vmatpush.bf16.msrb.mxu2 %v1267_v34  ;;  %v4269_v0 = vpop.permute.xlu2 %1348 }
 0x300   : > { %1679 = vmatpush.bf16.msra.mxu0 %v3678_v11  ;;  %v3093_v11 = vld [vmem:[%s5394_s3 + $0x48] sm:$0xf0]  ;;  %v1362_v5 = vsel %vm5446_vm13, %v3925_v9, %v4269_v0 }
 0x301   : > { %v4257_v33 = vor.u32 %v3093_v11, %v2973_v55  ;;  %v2987_v55 = vld [vmem:[%s5394_s3 + $0x6c] sm:$0xf0] }
 0x302   : > { %1625 = vmatmul.bf16.vlgmr.msrb.gmra.mxu2 %v4233_v39 }
 0x304   : > { %1680 = vmatpush.bf16.msra.mxu0 %v3648_v36  ;;  %v1090_v36 = vsel %vm358_vm7, %v3772_v2, %v4138_v49 }
 0x305   : > { %v4242_v58 = vpop.permute.xlu0 %1078 }
 0x306   : > { %v1092_v50 = vsel %vm358_vm7, %v3828_v24, %v4242_v58  ;;  %v1364_v24 = vsel %vm5450_vm15, %v4023_v29, %v4238_v13  ;;  %vm5455_vm15 = vmmov %vm5446_vm13 }
 0x307   : > { %1709 = vmatpush.bf16.msra.mxu1 %v1092_v50  ;;  %v3098_v50 = vld [vmem:[%s5394_s3 + $0x70] sm:$0xf0] }
 0x308   : > { %1681 = vmatpush.bf16.msra.mxu0 %v3626_v15  ;;  %v3090_v15 = vld [vmem:[%s5394_s3 + $0x34] sm:$0xf] }
 0x309   : > { %v4280_v19 = vor.u32 %v3090_v15, %v2967_v14  ;;  %v3103_v15 = vld [vmem:[%s5394_s3 + $0x98] sm:$0xf0]  ;;  %v3007_v14 = vld [vmem:[%s5394_s3 + $0x94] sm:$0xf0] }
 0x30b   : > { %1710 = vmatpush.bf16.msra.mxu1 %v1090_v36 }
 0x30c   : > { %1682 = vmatpush.bf16.msra.mxu0 %v3581_v52  ;;  %v1088_v52 = vsel %vm358_vm7, %v3746_v54, %v4066_v16  ;;  %v1315_v54 = vsel %vm418_vm2, %v3832_v1, %v4136_v20  ;;  %v2993_v1 = vld [vmem:[%s5394_s3 + $0x60] sm:$0xf] }
 0x30d   : > { %v4271_v2 = vpop.permute.xlu0 %1303 }
 0x30e   : > { %v1317_v29 = vsel %vm418_vm2, %v3852_v22, %v4271_v2  ;;  %3016 = vmatmul.msk.bf16.gmra.mxu3 %vm1517_vm14, %v4257_v33  ;;  %v4293_v22 = vpop.permute.xlu1 %1291 }
 0x30f   : > { %1683 = vmatmul.bf16.vlgmr.msra.gmra.mxu0 %v3949_v7  ;;  %1711 = vmatpush.bf16.msra.mxu1 %v1088_v52  ;;  %v1313_v9 = vsel %vm418_vm2, %v3923_v56, %v4293_v22  ;;  %v1227_v56 = vsel %vm394_vm4, %v3818_v3, %v4100_v57  ;;  %v1225_v3 = vsel %vm394_vm4, %v3784_v6, %v4163_v37 }
 0x310   : > { %1795 = vmatpush.bf16.msrb.mxu0 %v1364_v24  ;;  %1763 = vmatpush.bf16.msra.mxu3 %v1317_v29  ;;  %v1184_v6 = vsel %vm382_vm5, %v3900_v53, %v4204_v46  ;;  %v3100_v53 = vld [vmem:[%s5394_s3 + $0x84] sm:$0xf]  ;;  %v5451_v29 = vld [vmem:[#allocation9_spill] sm:$0xff] }
 0x312   : > { %1630 = vmatmul.bf16.gmra.mxu2 %v4280_v19  ;;  %1712 = vmatmul.bf16.vlgmr.msra.gmra.mxu1 %v4017_v26 }
 0x313   : > { %1820 = vmatpush.bf16.msrb.mxu1 %v4159_v18 }
 0x314   : > { %1796 = vmatpush.bf16.msrb.mxu0 %v1362_v5  ;;  %1764 = vmatpush.bf16.msra.mxu3 %v1315_v54 }
 0x316   : > { %v4296_v34 = vpop.permute.xlu0 %1219  ;;  %v4334_v36 = vpop.permute.xlu1 %1168 }
 0x317   : > { %1821 = vmatpush.bf16.msrb.mxu1 %v3864_v38  ;;  %v1229_v18 = vsel %vm394_vm4, %v3898_v59, %v4296_v34  ;;  %v4311_v38 = vor.u32 %v3098_v50, %v2993_v1  ;;  %v3095_v59 = vld [vmem:[%s5394_s3 + $0x5c] sm:$0xf]  ;;  %v5453_v50 = vld [vmem:[#allocation13_spill] sm:$0xff] }
 0x318   : > { %1765 = vmatpush.bf16.msra.mxu3 %v1313_v9  ;;  %1733 = vmatpush.bf16.msra.mxu2 %v1229_v18 }
 0x31b   : > { %1822 = vmatpush.bf16.msrb.mxu1 %v3880_v8  ;;  %v4326_v8 = vor.u32 %v3095_v59, %v2987_v55  ;;  %v5454_v55 = vld [vmem:[#allocation10_spill] sm:$0xff] }
 0x31c   : > { %1734 = vmatpush.bf16.msra.mxu2 %v1227_v56  ;;  %v4402_v56 = vpop.permute.xlu2 %1379 }
 0x31e   : > { %v4323_v11 = vpop.permute.xlu0 %1201  ;;  %3017 = vmatmul.msk.bf16.gmra.mxu3 %vm1517_vm14, %v4311_v38  ;;  %v4365_v52 = vpop.permute.xlu1 %1252 }
 0x31f   : > { %1823 = vmatpush.bf16.msrb.mxu1 %v3927_v21  ;;  %1688 = vmatmul.bf16.gmra.mxu0 %v3993_v17  ;;  %v1223_v21 = vsel %vm394_vm4, %v3734_v47, %v4323_v11 }
 0x320   : > { %1735 = vmatpush.bf16.msra.mxu2 %v1225_v3 }
 0x322   : > { %1635 = vmatmul.bf16.gmra.mxu2 %v4326_v8  ;;  %1717 = vmatmul.bf16.gmra.mxu1 %v4075_v30 }
 0x323   : > { %1824 = vmatpush.bf16.msrb.mxu1 %v3788_v12  ;;  %v3013_v12 = vld [vmem:[%s5394_s3 + $0x88] sm:$0xf] }
 0x324   : > { %1736 = vmatpush.bf16.msra.mxu2 %v1223_v21  ;;  %v4354_v47 = vor.u32 %v3103_v15, %v3013_v12 }
 0x326   : > { %v4342_v24 = vpop.permute.xlu0 %1162  ;;  %v4388_v9 = vpop.permute.xlu1 %1246 }
 0x327   : > { %1825 = vmatpush.bf16.msrb.mxu1 %v3696_v40  ;;  %v1182_v40 = vsel %vm382_vm5, %v3830_v25, %v4334_v36  ;;  %v4372_v25 = vor.u32 %v3100_v53, %v3007_v14  ;;  %v1180_v5 = vsel %vm382_vm5, %v5451_v29, %v4342_v24 }
 0x328   : > { %1737 = vmatpush.bf16.msra.mxu2 %v1184_v6 }
 0x32b   : > { %1826 = vmatpush.bf16.msrb.mxu1 %v3738_v23 }
 0x32c   : > { %1738 = vmatpush.bf16.msra.mxu2 %v1182_v40 }
 0x32e   : > { %v4369_v23 = vpop.permute.xlu0 %1264  ;;  %3018 = vmatmul.msk.bf16.gmra.mxu3 %vm1517_vm14, %v4354_v47  ;;  %v1337_v21 = vpop.permute.xlu1 %1336 }
 0x32f   : > { %1827 = vmatpush.bf16.msrb.mxu1 %v3764_v63  ;;  %1693 = vmatmul.bf16.gmra.mxu0 %v4050_v60  ;;  %v1274_v54 = vsel %vm406_vm1, %v3995_v31, %v4369_v23  ;;  %v5452_v31 = vld [vmem:[#allocation8_spill] sm:$0xff]  ;;  %v1358_v15 = vsel %vm5446_vm13, %v4025_v41, %v1337_v21 }
 0x330   : > { %1739 = vmatpush.bf16.msra.mxu2 %v1180_v5  ;;  %1766 = vmatpush.bf16.msra.mxu3 %v1274_v54 }
 0x332   : > { %1640 = vmatmul.bf16.gmra.mxu2 %v4372_v25  ;;  %1722 = vmatmul.bf16.gmra.mxu1 %v4134_v27 }
 0x333   : > { %1940 = vmatpush.bf16.msra.mxu1 %v4238_v13  ;;  %v1539_v63 = vpop.f32.mrf.mxu3  ;;  %v1272_v13 = vsel %vm406_vm1, %v3878_v62, %v4161_v51  ;;  %v1268_v62 = vsel %vm406_vm1, %v4227_v35, %v4388_v9  ;;  %v5456_v35 = vld [vmem:[#allocation11_spill] sm:$0xff] }
 0x334   : > { %1767 = vmatpush.bf16.msra.mxu3 %v1272_v13  ;;  %v1540_v6 = vadd.f32 %v1539_v63, %v4402_v56 }
 0x336   : > { %v4390_v18 = vpop.permute.xlu0 %1156 }
 0x337   : > { %1941 = vmatpush.bf16.msra.mxu1 %v4269_v0  ;;  %v1178_v1 = vsel %vm382_vm5, %v5452_v31, %v4390_v18  ;;  %v1270_v0 = vsel %vm406_vm1, %v3954_v10, %v4365_v52 }
 0x338   : > { %1740 = vmatpush.bf16.msra.mxu2 %v1178_v1  ;;  %1768 = vmatpush.bf16.msra.mxu3 %v1270_v0 }
 0x33b   : > { %v1541_v59 = vpop.f32.mrf.mxu3 }
 0x33c   : > { %1849 = vmatpush.bf16.msrb.mxu2 %v5453_v50  ;;  %1769 = vmatpush.bf16.msra.mxu3 %v1268_v62 }
 0x33e   : > { %v1343_v3 = vpop.permute.xlu0 %1342 }
 0x33f   : > { %1698 = vmatmul.bf16.gmra.mxu0 %v4110_v61  ;;  %1942 = vmatpush.bf16.msra.mxu1 %v1343_v3  ;;  %v1360_v10 = vsel %vm5455_vm15, %v4183_v42, %v1343_v3 }
 0x340   : > { %1850 = vmatpush.bf16.msrb.mxu2 %v5454_v55  ;;  %1878 = vmatpush.bf16.msrb.mxu3 %v4296_v34  ;;  %v5457_v34 = vld [vmem:[#allocation12_spill] sm:$0xff] }
 0x341   : > { %1770 = vmatmul.bf16.vlgmr.msra.gmra.mxu3 %v4233_v39  ;;  %1797 = vmatpush.bf16.msrb.mxu0 %v1360_v10 }
 0x342   : > { %1727 = vmatmul.bf16.gmra.mxu1 %v4181_v43  ;;  %1741 = vmatmul.bf16.vlgmr.msra.gmra.mxu2 %v5457_v34 }
 0x343   : > { %1943 = vmatpush.bf16.msra.mxu1 %v1337_v21  ;;  %v1568_v12 = vpop.f32.mrf.mxu0  ;;  %v1544_v40 = vpop.f32.mrf.mxu3 }
 0x344   : > { %1851 = vmatpush.bf16.msrb.mxu2 %v5456_v35  ;;  %1879 = vmatpush.bf16.msrb.mxu3 %v4100_v57  ;;  %v1569_v42 = vadd.f32 %v1568_v12, %v1540_v6  ;;  %v4420_v57 = vpop.permute.xlu2 %1414 }
 0x345   : > { %1798 = vmatpush.bf16.msrb.mxu0 %v1358_v15 }
 0x346   : > { %v4424_v53 = vpop.permute.xlu0 %1384 }
 0x348   : > { %1852 = vmatpush.bf16.msrb.mxu2 %v3956_v44  ;;  %1880 = vmatpush.bf16.msrb.mxu3 %v4163_v37  ;;  %v1542_v44 = vadd.f32 %v1541_v59, %v4424_v53 }
 0x349   : > { %1907 = vmatpush.bf16.msra.mxu0 %v4206_v48 }
 0x34b   : > { %v1570_v41 = vpop.f32.mrf.mxu0  ;;  %v1597_v14 = vpop.f32.mrf.mxu1 }
 0x34c   : > { %1853 = vmatpush.bf16.msrb.mxu2 %v4112_v45  ;;  %1881 = vmatpush.bf16.msrb.mxu3 %v4323_v11  ;;  %v4427_v29 = vadd.f32 %v1597_v14, %v1569_v42  ;;  %v4435_v45 = vpop.permute.xlu2 %1389  ;;  %v1546_v37 = vpop.f32.mrf.mxu3 }
 0x34d   : > { %1908 = vmatpush.bf16.msra.mxu0 %v4271_v2  ;;  %v1545_v48 = vadd.f32 %v1544_v40, %v4435_v45 }
 0x34f   : > { %3019 = vmatmul.msk.bf16.vlgmr.msrb.gmra.mxu0 %vm1517_vm14, %v4216_v28 }
 0x350   : > { %1854 = vmatpush.bf16.msrb.mxu2 %v4242_v58  ;;  %1882 = vmatpush.bf16.msrb.mxu3 %v4204_v46  ;;  %v4444_v58 = vpop.permute.xlu0 %1399 }
 0x351   : > { %1909 = vmatpush.bf16.msra.mxu0 %v4136_v20  ;;  %1775 = vmatmul.bf16.gmra.mxu3 %v4280_v19  ;;  %v1571_v20 = vadd.f32 %v1570_v41, %v1542_v44 }
 0x352   : > { %1746 = vmatmul.bf16.gmra.mxu2 %v4108_v4  ;;  %1828 = vmatmul.bf16.vlgmr.msrb.gmra.mxu1 %v3949_v7 }
 0x353   : > { %v1573_v46 = vpop.f32.mrf.mxu0  ;;  %v1599_v11 = vpop.f32.mrf.mxu1 }
 0x354   : > { %1855 = vmatpush.bf16.msrb.mxu2 %v4138_v49  ;;  %1883 = vmatpush.bf16.msrb.mxu3 %v4334_v36  ;;  %v1574_v2 = vadd.f32 %v1573_v46, %v1545_v48  ;;  %v4446_v5 = vadd.f32 %v1599_v11, %v1571_v20  ;;  %v1549_v49 = vpop.f32.mrf.mxu3 }
 0x355   : > { %1910 = vmatpush.bf16.msra.mxu0 %v4293_v22 }
 0x358   : > { %1856 = vmatpush.bf16.msrb.mxu2 %v4066_v16  ;;  %1884 = vmatpush.bf16.msrb.mxu3 %v4342_v24  ;;  %v4453_v54 = vpop.permute.xlu0 %1394  ;;  %v1550_v24 = vadd.f32 %v1549_v49, %v4444_v58 }
 0x359   : > { %1911 = vmatpush.bf16.msra.mxu0 %v4369_v23  ;;  %v1547_v16 = vadd.f32 %v1546_v37, %v4453_v54 }
 0x35b   : > { %v1575_v22 = vpop.f32.mrf.mxu0  ;;  %v1602_v7 = vpop.f32.mrf.mxu1 }
 0x35c   : > { %1885 = vmatpush.bf16.msrb.mxu3 %v4390_v18  ;;  %v1603_v36 = vadd.f32 %v1602_v7, %v1574_v2  ;;  %v1576_v23 = vadd.f32 %v1575_v22, %v1547_v16 }
 0x35d   : > { %1912 = vmatpush.bf16.msra.mxu0 %v4161_v51  ;;  %v5458_v51 = vld [vmem:[#allocation14_spill] sm:$0xff] }
 0x35f   : > { %3020 = vmatmul.msk.bf16.gmra.mxu0 %vm1517_vm14, %v4257_v33 }
 0x361   : > { %1913 = vmatpush.bf16.msra.mxu0 %v4365_v52  ;;  %1780 = vmatmul.bf16.gmra.mxu3 %v4326_v8  ;;  %v4464_v52 = vpop.f32.mrf.mxu3 }
 0x362   : > { %1751 = vmatmul.bf16.gmra.mxu2 %v5458_v51  ;;  %1833 = vmatmul.bf16.gmra.mxu1 %v3993_v17 }
 0x363   : > { %v1578_v63 = vpop.f32.mrf.mxu0  ;;  %v1604_v18 = vpop.f32.mrf.mxu1 }
 0x364   : > { %v1579_v13 = vadd.f32 %v1578_v63, %v1550_v24  ;;  %v4466_v31 = vadd.f32 %v1604_v18, %v1576_v23 }
 0x365   : > { %1914 = vmatpush.bf16.msra.mxu0 %v4388_v9  ;;  %v4473_v9 = vpop.permute.xlu1 %1409 }
 0x369   : > { %v1554_v62 = vpop.f32.mrf.mxu3 }
 0x36a   : > { %v1555_v17 = vadd.f32 %v1554_v62, %v4473_v9 }
 0x36b   : > { %v4468_v1 = vpop.f32.mrf.mxu0  ;;  %v1607_v0 = vpop.f32.mrf.mxu1 }
 0x36c   : > { %v1608_v50 = vadd.f32 %v1607_v0, %v1579_v13 }
 0x36f   : > { %3021 = vmatmul.msk.bf16.gmra.mxu0 %vm1517_vm14, %v4311_v38 }
 0x371   : > { %1785 = vmatmul.bf16.gmra.mxu3 %v4372_v25  ;;  %v4480_v10 = vpop.f32.mrf.mxu3 }
 0x372   : > { %1756 = vmatmul.bf16.gmra.mxu2 %v4214_v32  ;;  %1838 = vmatmul.bf16.gmra.mxu1 %v4050_v60 }
 0x373   : > { %v1583_v59 = vpop.f32.mrf.mxu0  ;;  %v4478_v3 = vpop.f32.mrf.mxu1 }
 0x374   : > { %v1584_v55 = vadd.f32 %v1583_v59, %v1555_v17 }
 0x37b   : > { %v1612_v21 = vpop.f32.mrf.mxu1  ;;  %v4486_v12 = vpop.f32.mrf.mxu0 }
 0x37c   : > { %v1613_v35 = vadd.f32 %v1612_v21, %v1584_v55 }
 0x37f   : > { %3022 = vmatmul.msk.bf16.gmra.mxu0 %vm1517_vm14, %v4354_v47 }
 0x381   : > { %1886 = vmatmul.bf16.vlgmr.msrb.gmra.mxu3 %v5457_v34  ;;  %v1655_v6 = vpop.f32.mrf.mxu3 }
 0x382   : > { %1857 = vmatmul.bf16.vlgmr.msrb.gmra.mxu2 %v4017_v26  ;;  %1843 = vmatmul.bf16.gmra.mxu1 %v4110_v61 }
 0x383   : > { %v4490_v42 = vpop.f32.mrf.mxu1 }
 0x385   : > { %v1626_v60 = vpop.f32.mrf.mxu2 }
 0x386   : > { %v1627_v15 = vadd.f32 %v1626_v60, %v4427_v29 }
 0x388   : > { %v4492_v40 = vadd.f32 %v1655_v6, %v1627_v15 }
 0x389   : > { %v4494_v41 = vpop.f32.mrf.mxu3 }
 0x38a   : > { %v1965_v60 = vmax.f32 %v4492_v40, 0.0 }
 0x38c   : > { %v1684_v14 = vpop.f32.mrf.mxu0 }
 0x38d   : > { %v1628_v44 = vpop.f32.mrf.mxu2 }
 0x38e   : > { %v1629_v15 = vadd.f32 %v1628_v44, %v4446_v5 }
 0x38f   : > { %1915 = vmatmul.bf16.vlgmr.msra.gmra.mxu0 %v4233_v39  ;;  %v1713_v34 = vpop.f32.mrf.mxu1 }
 0x391   : > { %1891 = vmatmul.bf16.gmra.mxu3 %v4108_v4  ;;  %v1660_v26 = vpop.f32.mrf.mxu3 }
 0x392   : > { %1862 = vmatmul.bf16.gmra.mxu2 %v4075_v30  ;;  %3023 = vmatmul.msk.bf16.vlgmr.msra.gmra.mxu1 %vm1517_vm14, %v4216_v28 }
 0x394   : > { %v1686_v61 = vpop.f32.mrf.mxu0 }
 0x395   : > { %v1631_v29 = vpop.f32.mrf.mxu2 }
 0x396   : > { %v1632_v37 = vadd.f32 %v1631_v29, %v1603_v36 }
 0x397   : > { %v1715_v48 = vpop.f32.mrf.mxu1 }
 0x398   : > { %v4501_v20 = vadd.f32 %v1660_v26, %v1632_v37 }
 0x399   : > { %v4503_v46 = vpop.f32.mrf.mxu3 }
 0x39c   : > { %v1689_v2 = vpop.f32.mrf.mxu0 }
 0x39d   : > { %v4505_v11 = vpop.f32.mrf.mxu2  ;;  %v1690_v40 = vadd.f32 %v1689_v2, %v4435_v45 }
 0x39f   : > { %1920 = vmatmul.bf16.gmra.mxu0 %v4280_v19  ;;  %v1718_v4 = vpop.f32.mrf.mxu1 }
 0x3a1   : > { %1896 = vmatmul.bf16.gmra.mxu3 %v5458_v51  ;;  %v1665_v30 = vpop.f32.mrf.mxu3 }
 0x3a2   : > { %1867 = vmatmul.bf16.gmra.mxu2 %v4134_v27  ;;  %3024 = vmatmul.msk.bf16.gmra.mxu1 %vm1517_vm14, %v4257_v33 }
 0x3a4   : > { %v4512_v28 = vpop.f32.mrf.mxu0 }
 0x3a5   : > { %v1636_v39 = vpop.f32.mrf.mxu2 }
 0x3a6   : > { %v1637_v49 = vadd.f32 %v1636_v39, %v1608_v50  ;;  %v1989_v39 = vsel %vm3405_vm9, %v1965_v60, 0.0 }
 0x3a7   : > { %v4514_v22 = vpop.f32.mrf.mxu1 }
 0x3a8   : > { %v4516_v7 = vadd.f32 %v1665_v30, %v1637_v49  ;;  %v1658_v49 = vadd.f32 %v4494_v41, %v1629_v15 }
 0x3a9   : > { %v4518_v36 = vpop.f32.mrf.mxu3 }
 0x3ac   : > { %v4520_v19 = vpop.f32.mrf.mxu0 }
 0x3ad   : > { %v4522_v16 = vpop.f32.mrf.mxu2 }
 0x3af   : > { %1925 = vmatmul.bf16.gmra.mxu0 %v4326_v8  ;;  %v4525_v27 = vpop.f32.mrf.mxu1 }
 0x3b1   : > { %1901 = vmatmul.bf16.gmra.mxu3 %v4214_v32  ;;  %v1670_v33 = vpop.f32.mrf.mxu3 }
 0x3b2   : > { %1872 = vmatmul.bf16.gmra.mxu2 %v4181_v43  ;;  %3025 = vmatmul.msk.bf16.gmra.mxu1 %vm1517_vm14, %v4311_v38  ;;  %v1685_v38 = vadd.f32 %v1684_v14, %v4402_v56 }
 0x3b4   : > { %v4531_v24 = vpop.f32.mrf.mxu0  ;;  %v1714_v62 = vadd.f32 %v1713_v34, %v1685_v38 }
 0x3b5   : > { %v1641_v51 = vpop.f32.mrf.mxu2 }
 0x3b6   : > { %v1642_v23 = vadd.f32 %v1641_v51, %v1613_v35  ;;  %v1687_v35 = vadd.f32 %v1686_v61, %v4424_v53 }
 0x3b7   : > { %v4533_v63 = vpop.f32.mrf.mxu1 }
 0x3b8   : > { %v4535_v13 = vadd.f32 %v1670_v33, %v1642_v23  ;;  %v1716_v14 = vadd.f32 %v1715_v48, %v1687_v35  ;;  %v1968_v48 = vmax.f32 %v1658_v49, 0.0 }
 0x3b9   : > { %v4537_v18 = vpop.f32.mrf.mxu3 }
 0x3ba   : > { %v1992_v41 = vsel %vm3405_vm9, %v1968_v48, 0.0 }
 0x3bc   : > { %v4539_v8 = vpop.f32.mrf.mxu0 }
 0x3bd   : > { %v4541_v0 = vpop.f32.mrf.mxu2 }
 0x3bf   : > { %1930 = vmatmul.bf16.gmra.mxu0 %v4372_v25  ;;  %v4544_v43 = vpop.f32.mrf.mxu1 }
 0x3c2   : > { %3026 = vmatmul.msk.bf16.gmra.mxu1 %vm1517_vm14, %v4354_v47 }
 0x3c4   : > { %v1771_v32 = vpop.f32.mrf.mxu3  ;;  %v4549_v50 = vpop.f32.mrf.mxu0 }
 0x3c5   : > { %v1742_v17 = vpop.f32.mrf.mxu2 }
 0x3c6   : > { %v1743_v59 = vadd.f32 %v1742_v17, %v1714_v62 }
 0x3c7   : > { %v4551_v55 = vpop.f32.mrf.mxu1 }
 0x3c8   : > { %v1772_v6 = vadd.f32 %v1771_v32, %v1743_v59  ;;  %v1719_v32 = vadd.f32 %v1718_v4, %v1690_v40  ;;  %v1971_v4 = vmax.f32 %v4501_v20, 0.0 }
 0x3cc   : > { %v1773_v21 = vpop.f32.mrf.mxu3  ;;  %v1800_v25 = vpop.f32.mrf.mxu0 }
 0x3cd   : > { %v1801_v26 = vadd.f32 %v1800_v25, %v1772_v6  ;;  %v1744_v29 = vpop.f32.mrf.mxu2 }
 0x3ce   : > { %v1745_v37 = vadd.f32 %v1744_v29, %v1716_v14  ;;  %v1634_v14 = vadd.f32 %v4505_v11, %v4466_v31  ;;  %v1695_v31 = vadd.f32 %v4520_v19, %v4444_v58 }
 0x3cf   : > { %v1966_v47 = vmax.f32 %v1801_v26, 0.0  ;;  %v4556_v30 = vpop.f32.mrf.mxu1 }
 0x3d0   : > { %v1774_v5 = vadd.f32 %v1773_v21, %v1745_v37  ;;  %v1692_v21 = vadd.f32 %v4512_v28, %v4453_v54  ;;  %v1995_v28 = vsel %vm3405_vm9, %v1971_v4, 0.0 }
 0x3d1   : > { %v1990_v61 = vsel %vm3409_vm10, %v1966_v47, 0.0 }
 0x3d2   : > { %v2013_v51 = vpack.c.bf16 %v1990_v61, %v1989_v39  ;;  %v1721_v26 = vadd.f32 %v4514_v22, %v1692_v21  ;;  %v1663_v61 = vadd.f32 %v4503_v46, %v1634_v14 }
 0x3d4   : > { %v1776_v23 = vpop.f32.mrf.mxu3  ;;  %v1802_v44 = vpop.f32.mrf.mxu0  ;;  %2045 = vrot.lane.b32.xlu1 %v2013_v51, %s3208_s28  ;;  %v1974_v40 = vmax.f32 %v1663_v61, 0.0 }
 0x3d5   : > { %v1803_v38 = vadd.f32 %v1802_v44, %v1774_v5  ;;  %v1747_v62 = vpop.f32.mrf.mxu2  ;;  %v1724_v5 = vadd.f32 %v4525_v27, %v1695_v31 }
 0x3d6   : > { %v1748_v59 = vadd.f32 %v1747_v62, %v1719_v32  ;;  %v4589_v32 = vpop.permute.xlu1 %1404 }
 0x3d7   : > { %v1969_v17 = vmax.f32 %v1803_v38, 0.0  ;;  %v4565_v35 = vpop.f32.mrf.mxu1  ;;  %v1552_v46 = vadd.f32 %v4464_v52, %v4589_v32 }
 0x3d8   : > { %v1777_v60 = vadd.f32 %v1776_v23, %v1748_v59  ;;  %v1998_v59 = vsel %vm3405_vm9, %v1974_v40, 0.0 }
 0x3d9   : > { %v1993_v6 = vsel %vm3409_vm10, %v1969_v17, 0.0  ;;  %v1581_v19 = vadd.f32 %v4468_v1, %v1552_v46  ;;  %v1702_v46 = vadd.f32 %v4549_v50, %v4420_v57 }
 0x3da   : > { %v2015_v25 = vpack.c.bf16 %v1993_v6, %v1992_v41 }
 0x3dc   : > { %v1778_v2 = vpop.f32.mrf.mxu3  ;;  %v1805_v15 = vpop.f32.mrf.mxu0  ;;  %2049 = vrot.lane.b32.xlu0 %v2015_v25, %s3208_s28  ;;  %v1610_v25 = vadd.f32 %v4478_v3, %v1581_v19  ;;  %v1731_v19 = vadd.f32 %v4551_v55, %v1702_v46 }
 0x3dd   : > { %v1806_v29 = vadd.f32 %v1805_v15, %v1777_v60  ;;  %v1749_v47 = vpop.f32.mrf.mxu2  ;;  %v1977_v60 = vmax.f32 %v4516_v7, 0.0 }
 0x3de   : > { %v1750_v39 = vadd.f32 %v1749_v47, %v1721_v26  ;;  %v1639_v1 = vadd.f32 %v4522_v16, %v1610_v25  ;;  %v1700_v16 = vadd.f32 %v4539_v8, %v4473_v9 }
 0x3df   : > { %v1972_v37 = vmax.f32 %v1806_v29, 0.0  ;;  %v4578_v49 = vpop.f32.mrf.mxu1  ;;  %v2001_v3 = vsel %vm3405_vm9, %v1977_v60, 0.0 }
 0x3e0   : > { %v1779_v11 = vadd.f32 %v1778_v2, %v1750_v39  ;;  %v1697_v2 = vadd.f32 %v4531_v24, %v4589_v32  ;;  %v1668_v24 = vadd.f32 %v4518_v36, %v1639_v1  ;;  %v1557_v36 = vadd.f32 %v4480_v10, %v4420_v57 }
 0x3e1   : > { %v1996_v51 = vsel %vm3409_vm10, %v1972_v37, 0.0 }
 0x3e2   : > { %v2017_v20 = vpack.c.bf16 %v1996_v51, %v1995_v28  ;;  %v1726_v15 = vadd.f32 %v4533_v63, %v1697_v2  ;;  %v1980_v61 = vmax.f32 %v1668_v24, 0.0  ;;  %v1729_v51 = vadd.f32 %v4544_v43, %v1700_v16 }
 0x3e3   : > { %v1586_v40 = vadd.f32 %v4486_v12, %v1557_v36 }
 0x3e4   : > { %v1781_v23 = vpop.f32.mrf.mxu3  ;;  %v1807_v22 = vpop.f32.mrf.mxu0  ;;  %2053 = vrot.lane.b32.xlu2 %v2017_v20, %s3208_s28  ;;  %v2004_v8 = vsel %vm3405_vm9, %v1980_v61, 0.0 }
 0x3e5   : > { %v1808_v44 = vadd.f32 %v1807_v22, %v1779_v11  ;;  %v1752_v48 = vpop.f32.mrf.mxu2  ;;  %v1615_v43 = vadd.f32 %v4490_v42, %v1586_v40 }
 0x3e6   : > { %v1753_v62 = vadd.f32 %v1752_v48, %v1724_v5 }
 0x3e7   : > { %v1975_v38 = vmax.f32 %v1808_v44, 0.0  ;;  %v4593_v17 = vpop.f32.mrf.mxu1  ;;  %v1644_v12 = vadd.f32 %v4541_v0, %v1615_v43 }
 0x3e8   : > { %v1782_v52 = vadd.f32 %v1781_v23, %v1753_v62  ;;  %v1983_v62 = vmax.f32 %v4535_v13, 0.0 }
 0x3e9   : > { %v1999_v41 = vsel %vm3409_vm10, %v1975_v38, 0.0  ;;  %v1673_v50 = vadd.f32 %v4537_v18, %v1644_v12 }
 0x3ea   : > { %v2019_v27 = vpack.c.bf16 %v1999_v41, %v1998_v59  ;;  %v2007_v42 = vsel %vm3405_vm9, %v1983_v62, 0.0  ;;  %v1837_v62 = vadd.f32 %v4593_v17, %v4453_v54 }
 0x3eb   : > { %v1986_v55 = vmax.f32 %v1673_v50, 0.0 }
 0x3ec   : > { %v1783_v6 = vpop.f32.mrf.mxu3  ;;  %v1810_v21 = vpop.f32.mrf.mxu0  ;;  %2057 = vrot.lane.b32.xlu2 %v2019_v27, %s3208_s28 }
 0x3ed   : > { %v1811_v4 = vadd.f32 %v1810_v21, %v1782_v52  ;;  %v1754_v14 = vpop.f32.mrf.mxu2  ;;  %v2010_v18 = vsel %vm3405_vm9, %v1986_v55, 0.0 }
 0x3ee   : > { %v1755_v29 = vadd.f32 %v1754_v14, %v1726_v15  ;;  %v1830_v15 = vadd.f32 %v4556_v30, %v4402_v56  ;;  %v1832_v56 = vadd.f32 %v4565_v35, %v4424_v53 }
 0x3ef   : > { %v1978_v26 = vmax.f32 %v1811_v4, 0.0  ;;  %v4607_v47 = vpop.f32.mrf.mxu1 }
 0x3f0   : > { %v1784_v63 = vadd.f32 %v1783_v6, %v1755_v29 }
 0x3f1   : > { %v2002_v37 = vsel %vm3409_vm10, %v1978_v26, 0.0 }
 0x3f2   : > { %v2021_v39 = vpack.c.bf16 %v2002_v37, %v2001_v3 }
 0x3f4   : > { %v1786_v7 = vpop.f32.mrf.mxu3  ;;  %v1812_v28 = vpop.f32.mrf.mxu0  ;;  %2061 = vrot.lane.b32.xlu0 %v2021_v39, %s3208_s28 }
 0x3f5   : > { %v1813_v20 = vadd.f32 %v1812_v28, %v1784_v63  ;;  %v1757_v23 = vpop.f32.mrf.mxu2 }
 0x3f6   : > { %v1758_v11 = vadd.f32 %v1757_v23, %v1729_v51 }
 0x3f7   : > { %v1981_v31 = vmax.f32 %v1813_v20, 0.0  ;;  %v4620_v22 = vpop.f32.mrf.mxu1 }
 0x3f8   : > { %v1787_v10 = vadd.f32 %v1786_v7, %v1758_v11  ;;  %v1835_v11 = vadd.f32 %v4578_v49, %v4435_v45 }
 0x3f9   : > { %v2005_v5 = vsel %vm3409_vm10, %v1981_v31, 0.0 }
 0x3fa   : > { %v2023_v44 = vpack.c.bf16 %v2005_v5, %v2004_v8 }
 0x3fc   : > { %v1788_v48 = vpop.f32.mrf.mxu3  ;;  %v1815_v38 = vpop.f32.mrf.mxu0  ;;  %2065 = vrot.lane.b32.xlu1 %v2023_v44, %s3208_s28 }
 0x3fd   : > { %v1816_v59 = vadd.f32 %v1815_v38, %v1787_v10  ;;  %v1759_v41 = vpop.f32.mrf.mxu2 }
 0x3fe   : > { %v1760_v6 = vadd.f32 %v1759_v41, %v1731_v19 }
 0x3ff   : > { %v1984_v27 = vmax.f32 %v1816_v59, 0.0  ;;  %v4634_v25 = vpop.f32.mrf.mxu1 }
 0x400   : > { %v1789_v21 = vadd.f32 %v1788_v48, %v1760_v6 }
 0x401   : > { %v2008_v2 = vsel %vm3409_vm10, %v1984_v27, 0.0 }
 0x402   : > { %v2025_v52 = vpack.c.bf16 %v2008_v2, %v2007_v42 }
 0x404   : > { %v1887_v13 = vpop.f32.mrf.mxu3  ;;  %v1817_v0 = vpop.f32.mrf.mxu0  ;;  %2069 = vrot.lane.b32.xlu1 %v2025_v52, %s3208_s28  ;;  %v1840_v52 = vadd.f32 %v4607_v47, %v4444_v58 }
 0x405   : > { %v1818_v60 = vadd.f32 %v1817_v0, %v1789_v21  ;;  %v1858_v1 = vpop.f32.mrf.mxu2 }
 0x406   : > { %v1859_v29 = vadd.f32 %v1858_v1, %v1830_v15 }
 0x407   : > { %v1987_v4 = vmax.f32 %v1818_v60, 0.0  ;;  %v4644_v14 = vpop.f32.mrf.mxu1 }
 0x408   : > { %v1888_v39 = vadd.f32 %v1887_v13, %v1859_v29 }
 0x409   : > { %v2011_v26 = vsel %vm3409_vm10, %v1987_v4, 0.0 }
 0x40a   : > { %v2027_v3 = vpack.c.bf16 %v2011_v26, %v2010_v18  ;;  %v1842_v26 = vadd.f32 %v4620_v22, %v4589_v32 }
 0x40c   : > { %v1889_v24 = vpop.f32.mrf.mxu3  ;;  %v1916_v37 = vpop.f32.mrf.mxu0  ;;  %2073 = vrot.lane.b32.xlu2 %v2027_v3, %s3208_s28 }
 0x40d   : > { %v1860_v7 = vpop.f32.mrf.mxu2  ;;  %v1917_v30 = vadd.f32 %v1916_v37, %v1888_v39 }
 0x40e   : > { %v1861_v63 = vadd.f32 %v1860_v7, %v1832_v56 }
 0x40f   : > { %v1945_v16 = vpop.f32.mrf.mxu1 }
 0x410   : > { %v1946_v28 = vadd.f32 %v1945_v16, %v1917_v30  ;;  %v1890_v33 = vadd.f32 %v1889_v24, %v1861_v63  ;;  %v1845_v16 = vadd.f32 %v4634_v25, %v4473_v9  ;;  %v1847_v9 = vadd.f32 %v4644_v14, %v4420_v57 }
 0x412   : > { %v1967_v61 = vmax.f32 %v1946_v28, 0.0 }
 0x414   : > { %v1892_v34 = vpop.f32.mrf.mxu3  ;;  %v1918_v51 = vpop.f32.mrf.mxu0  ;;  %v1991_v23 = vsel %vm3417_vm12, %v1967_v61, 0.0 }
 0x415   : > { %v1863_v36 = vpop.f32.mrf.mxu2  ;;  %v2014_v31 = vpack.c.bf16 %v1991_v23, %v1991_v23  ;;  %v1919_v40 = vadd.f32 %v1918_v51, %v1890_v33 }
 0x416   : > { %v1864_v53 = vadd.f32 %v1863_v36, %v1835_v11 }
 0x417   : > { %v1947_v8 = vpop.f32.mrf.mxu1  ;;  %2047 = vrot.lane.b32.xlu2 %v2014_v31, %s3208_s28 }
 0x418   : > { %v1948_v35 = vadd.f32 %v1947_v8, %v1919_v40  ;;  %v1893_v43 = vadd.f32 %v1892_v34, %v1864_v53 }
 0x41a   : > { %v1970_v44 = vmax.f32 %v1948_v35, 0.0 }
 0x41c   : > { %v1894_v5 = vpop.f32.mrf.mxu3  ;;  %v1921_v48 = vpop.f32.mrf.mxu0  ;;  %v1994_v46 = vsel %vm3417_vm12, %v1970_v44, 0.0 }
 0x41d   : > { %v1865_v10 = vpop.f32.mrf.mxu2  ;;  %v2016_v38 = vpack.c.bf16 %v1994_v46, %v1994_v46  ;;  %v1922_v12 = vadd.f32 %v1921_v48, %v1893_v43 }
 0x41e   : > { %v1866_v49 = vadd.f32 %v1865_v10, %v1837_v62 }
 0x41f   : > { %v1950_v45 = vpop.f32.mrf.mxu1  ;;  %2051 = vrot.lane.b32.xlu1 %v2016_v38, %s3208_s28 }
 0x420   : > { %v1951_v19 = vadd.f32 %v1950_v45, %v1922_v12  ;;  %v1895_v6 = vadd.f32 %v1894_v5, %v1866_v49 }
 0x422   : > { %v1973_v59 = vmax.f32 %v1951_v19, 0.0 }
 0x424   : > { %v1923_v41 = vpop.f32.mrf.mxu0  ;;  %v1897_v27 = vpop.f32.mrf.mxu3  ;;  %v1997_v42 = vsel %vm3417_vm12, %v1973_v59, 0.0 }
 0x425   : > { %v1868_v50 = vpop.f32.mrf.mxu2  ;;  %v2018_v2 = vpack.c.bf16 %v1997_v42, %v1997_v42  ;;  %v1924_v13 = vadd.f32 %v1923_v41, %v1895_v6 }
 0x426   : > { %v1869_v17 = vadd.f32 %v1868_v50, %v1840_v52 }
 0x427   : > { %v1952_v54 = vpop.f32.mrf.mxu1  ;;  %2055 = vrot.lane.b32.xlu0 %v2018_v2, %s3208_s28 }
 0x428   : > { %v1953_v21 = vadd.f32 %v1952_v54, %v1924_v13  ;;  %v1898_v60 = vadd.f32 %v1897_v27, %v1869_v17 }
 0x42a   : > { %v1976_v0 = vmax.f32 %v1953_v21, 0.0 }
 0x42c   : > { %v1926_v55 = vpop.f32.mrf.mxu0  ;;  %v2000_v1 = vsel %vm3417_vm12, %v1976_v0, 0.0  ;;  %v1899_v18 = vpop.f32.mrf.mxu3 }
 0x42d   : > { %v1870_v15 = vpop.f32.mrf.mxu2  ;;  %v2020_v4 = vpack.c.bf16 %v2000_v1, %v2000_v1  ;;  %v1927_v29 = vadd.f32 %v1926_v55, %v1898_v60 }
 0x42e   : > { %v1871_v47 = vadd.f32 %v1870_v15, %v1842_v26 }
 0x42f   : > { %v1955_v58 = vpop.f32.mrf.mxu1  ;;  %2059 = vrot.lane.b32.xlu0 %v2020_v4, %s3208_s28 }
 0x430   : > { %v1956_v3 = vadd.f32 %v1955_v58, %v1927_v29  ;;  %v1900_v39 = vadd.f32 %v1899_v18, %v1871_v47 }
 0x432   : > { %v1979_v24 = vmax.f32 %v1956_v3, 0.0 }
 0x434   : > { %v1928_v37 = vpop.f32.mrf.mxu0  ;;  %v2003_v7 = vsel %vm3417_vm12, %v1979_v24, 0.0  ;;  %v1902_v28 = vpop.f32.mrf.mxu3 }
 0x435   : > { %v1873_v56 = vpop.f32.mrf.mxu2  ;;  %v2022_v30 = vpack.c.bf16 %v2003_v7, %v2003_v7  ;;  %v1929_v63 = vadd.f32 %v1928_v37, %v1900_v39 }
 0x436   : > { %v1874_v22 = vadd.f32 %v1873_v56, %v1845_v16 }
 0x437   : > { %v1957_v32 = vpop.f32.mrf.mxu1  ;;  %2063 = vrot.lane.b32.xlu1 %v2022_v30, %s3208_s28 }
 0x438   : > { %v1958_v34 = vadd.f32 %v1957_v32, %v1929_v63  ;;  %v1903_v33 = vadd.f32 %v1902_v28, %v1874_v22 }
 0x43a   : > { %v1982_v61 = vmax.f32 %v1958_v34, 0.0 }
 0x43c   : > { %v1931_v51 = vpop.f32.mrf.mxu0  ;;  %v2006_v23 = vsel %vm3417_vm12, %v1982_v61, 0.0  ;;  %v1904_v48 = vpop.f32.mrf.mxu3 }
 0x43d   : > { %v2024_v36 = vpack.c.bf16 %v2006_v23, %v2006_v23  ;;  %v1875_v31 = vpop.f32.mrf.mxu2  ;;  %v1932_v25 = vadd.f32 %v1931_v51, %v1903_v33 }
 0x43e   : > { %v4680_v11 = vpop.permute.xlu2 %2053  ;;  %v1876_v53 = vadd.f32 %v1875_v31, %v1847_v9 }
 0x43f   : > { %v2079_v40 = vrot.slane %v4680_v11, 4  ;;  %v1960_v8 = vpop.f32.mrf.mxu1  ;;  %2067 = vrot.lane.b32.xlu2 %v2024_v36, %s3208_s28 }
 0x440   : > { %v1961_v5 = vadd.f32 %v1960_v8, %v1932_v25  ;;  %v1905_v57 = vadd.f32 %v1904_v48, %v1876_v53 }
 0x441   : > { %v2089_v35 = vsel %vm852_vm11, %v2079_v40, %v4680_v11 }
 0x442   : > { %2121 = vst.msk [vmem:[#allocation3 + $0x18] sm:$0xff] %vm3562_vm3, %v2089_v35  ;;  %v1985_v43 = vmax.f32 %v1961_v5, 0.0 }
 0x444   : > { %v1933_v46 = vpop.f32.mrf.mxu0  ;;  %v2009_v14 = vsel %vm3417_vm12, %v1985_v43, 0.0 }
 0x445   : > { %v2026_v10 = vpack.c.bf16 %v2009_v14, %v2009_v14  ;;  %v1934_v12 = vadd.f32 %v1933_v46, %v1905_v57 }
 0x446   : > { %v4694_v38 = vpop.permute.xlu2 %2057  ;;  %v2046_v62 = vpop.permute.xlu1 %2045 }
 0x447   : > { %v2080_v45 = vrot.slane %v4694_v38, 4  ;;  %v2077_v49 = vrot.slane %v2046_v62, 4  ;;  %v1962_v19 = vpop.f32.mrf.mxu1  ;;  %2071 = vrot.lane.b32.xlu0 %v2026_v10, %s3208_s28 }
 0x448   : > { %v1963_v27 = vadd.f32 %v1962_v19, %v1934_v12 }
 0x449   : > { %v2091_v59 = vsel %vm852_vm11, %v2080_v45, %v4694_v38  ;;  %v2085_v41 = vsel %vm852_vm11, %v2077_v49, %v2046_v62  ;;  %v3119_v30 = vld [vmem:[#allocation3 + $0x1c] sm:$0xf]  ;;  %v3041_v28 = vld [vmem:[#allocation3 + $0x18] sm:$0xf] }
 0x44a   : > { %2123 = vst.msk [vmem:[#allocation3 + $0x24] sm:$0xff] %vm3562_vm3, %v2091_v59  ;;  %v1988_v6 = vmax.f32 %v1963_v27, 0.0 }
 0x44b   : > { %2117 = vst.msk [vmem:[#allocation3] sm:$0xff] %vm3562_vm3, %v2085_v41 }
 0x44c   : > { %v2012_v42 = vsel %vm3417_vm12, %v1988_v6, 0.0 }
 0x44d   : > { %v2028_v50 = vpack.c.bf16 %v2012_v42, %v2012_v42 }
 0x44e   : > { %v2050_v2 = vpop.permute.xlu0 %2049 }
 0x44f   : > { %v2078_v52 = vrot.slane %v2050_v2, 4  ;;  %2075 = vrot.lane.b32.xlu1 %v2028_v50, %s3208_s28  ;;  %s3129_s28 = smul.u32 12, %s5491_s25 }
 0x451   : > { %v2087_v13 = vsel %vm852_vm11, %v2078_v52, %v2050_v2  ;;  %v3043_v7 = vld [vmem:[#allocation3 + $0x24] sm:$0xf0]  ;;  %v3120_v63 = vld [vmem:[#allocation3 + $0x20] sm:$0xf0]  ;;  %s278_s16 = scalar_lea.vmem %s5398_s7, %s3129_s28 }
 0x452   : > { %2119 = vst.msk [vmem:[#allocation3 + $0xc] sm:$0xff] %vm3562_vm3, %v2087_v13  ;;  %v3116_v54 = vld [vmem:[#allocation3 + $0x4] sm:$0xf]  ;;  %v3029_v17 = vld [vmem:[#allocation3] sm:$0xf]  ;;  %v4767_v16 = vor.u32 %v3119_v30, %v3043_v7  ;;  %v4775_v32 = vor.u32 %v3120_v63, %v3041_v28 }
 0x454   : > { %5464 = vst [vmem:[#allocation8_spill] sm:$0xff] %v4767_v16 }
 0x459   : > { %v3031_v21 = vld [vmem:[#allocation3 + $0xc] sm:$0xf0]  ;;  %v3117_v0 = vld [vmem:[#allocation3 + $0x8] sm:$0xf0] }
 0x45a   : > { %v4713_v55 = vor.u32 %v3117_v0, %v3029_v17  ;;  %v4715_v60 = vor.u32 %v3116_v54, %v3031_v21 }
 0x45c   : > { %5463 = vst [vmem:[#allocation9_spill] sm:$0xff] %v4715_v60  ;;  %2393 = vrot.lane.b32.xlu1 %v4713_v55, %s3203_s11  ;;  %2217 = vrot.lane.b32.xlu2 %v4713_v55, %s3206_s14 }
 0x45d   : > { %2219 = vrot.lane.b32.xlu0 %v4715_v60, %s3206_s14 }
 0x464   : > { %2481 = vrot.lane.b32.xlu1 %v4713_v55, %s3201_s9  ;;  %2305 = vrot.lane.b32.xlu2 %v4713_v55, %s3205_s13 }
 0x465   : > { %2307 = vrot.lane.b32.xlu0 %v4715_v60, %s3205_s13 }
 0x466   : > { %v4729_v20 = vpop.permute.xlu2 %2073  ;;  %v4731_v1 = vpop.permute.xlu0 %2061 }
 0x467   : > { %v2084_v15 = vrot.slane %v4729_v20, 4  ;;  %v2081_v4 = vrot.slane %v4731_v1, 4 }
 0x469   : > { %v2099_v18 = vsel %vm852_vm11, %v2084_v15, %v4729_v20  ;;  %v2093_v26 = vsel %vm852_vm11, %v2081_v4, %v4731_v1 }
 0x46a   : > { %2131 = vst.msk [vmem:[#allocation3 + $0x54] sm:$0xff] %vm3562_vm3, %v2099_v18 }
 0x46b   : > { %2125 = vst.msk [vmem:[#allocation3 + $0x30] sm:$0xff] %vm3562_vm3, %v2093_v26 }
 0x46c   : > { %2351 = vrot.lane.b32.xlu1 %v4715_v60, %s3202_s10  ;;  %2395 = vrot.lane.b32.xlu2 %v4715_v60, %s3203_s11 }
 0x46d   : > { %2263 = vrot.lane.b32.xlu0 %v4715_v60, %s3204_s12 }
 0x46e   : > { %v2066_v29 = vpop.permute.xlu1 %2065 }
 0x46f   : > { %v2082_v58 = vrot.slane %v2066_v29, 4 }
 0x471   : > { %v2095_v47 = vsel %vm852_vm11, %v2082_v58, %v2066_v29  ;;  %v2048_v3 = vpop.permute.xlu2 %2047  ;;  %v3067_v62 = vld [vmem:[#allocation3 + $0x54] sm:$0xf0]  ;;  %v3126_v41 = vld [vmem:[#allocation3 + $0x50] sm:$0xf0] }
 0x472   : > { %2127 = vst.msk [vmem:[#allocation3 + $0x3c] sm:$0xff] %vm3562_vm3, %v2095_v47  ;;  %v2086_v24 = vsel %vm852_vm11, %v2077_v49, %v2048_v3  ;;  %v3053_v9 = vld [vmem:[#allocation3 + $0x30] sm:$0xf]  ;;  %v3122_v35 = vld [vmem:[#allocation3 + $0x34] sm:$0xf] }
 0x473   : > { %2118 = vst.msk [vmem:[#allocation3 + $0x8] sm:$0xf] %vm889_vm0, %v2086_v24 }
 0x474   : > { %2437 = vrot.lane.b32.xlu1 %v4713_v55, %s3199_s30  ;;  %2261 = vrot.lane.b32.xlu2 %v4713_v55, %s3204_s12 }
 0x475   : > { %2349 = vrot.lane.b32.xlu0 %v4713_v55, %s3202_s10 }
 0x476   : > { %v2070_v37 = vpop.permute.xlu1 %2069 }
 0x477   : > { %v2083_v39 = vrot.slane %v2070_v37, 4 }
 0x479   : > { %v2097_v56 = vsel %vm852_vm11, %v2083_v39, %v2070_v37  ;;  %v3123_v11 = vld [vmem:[#allocation3 + $0x38] sm:$0xf0]  ;;  %v3055_v53 = vld [vmem:[#allocation3 + $0x3c] sm:$0xf0] }
 0x47a   : > { %2129 = vst.msk [vmem:[#allocation3 + $0x48] sm:$0xff] %vm3562_vm3, %v2097_v56  ;;  %v4831_v5 = vor.u32 %v3122_v35, %v3055_v53  ;;  %v3037_v29 = vld [vmem:[#allocation3 + $0x8] sm:$0xf] }
 0x47c   : > { %2525 = vrot.lane.b32.xlu1 %v4713_v55, %s3200_s8  ;;  %2483 = vrot.lane.b32.xlu2 %v4715_v60, %s3201_s9  ;;  %5465 = vst [vmem:[#allocation13_spill] sm:$0xff] %v4831_v5 }
 0x47d   : > { %2225 = vrot.lane.b32.xlu0 %v4767_v16, %s3206_s14 }
 0x481   : > { %v3125_v38 = vld [vmem:[#allocation3 + $0x4c] sm:$0xf]  ;;  %v3065_v19 = vld [vmem:[#allocation3 + $0x48] sm:$0xf] }
 0x482   : > { %v4863_v12 = vor.u32 %v3125_v38, %v3067_v62  ;;  %v4877_v27 = vor.u32 %v3126_v41, %v3065_v19 }
 0x484   : > { %2311 = vrot.lane.b32.xlu1 %v4775_v32, %s3205_s13  ;;  %2439 = vrot.lane.b32.xlu2 %v4715_v60, %s3199_s30  ;;  %5466 = vst [vmem:[#allocation10_spill] sm:$0xff] %v4863_v12 }
 0x485   : > { %2399 = vrot.lane.b32.xlu0 %v4775_v32, %s3203_s11 }
 0x48c   : > { %2401 = vrot.lane.b32.xlu1 %v4767_v16, %s3203_s11  ;;  %2527 = vrot.lane.b32.xlu2 %v4715_v60, %s3200_s8 }
 0x48d   : > { %2487 = vrot.lane.b32.xlu0 %v4775_v32, %s3201_s9 }
 0x491   : > { %v2052_v22 = vpop.permute.xlu1 %2051 }
 0x492   : > { %v2088_v34 = vsel %vm852_vm11, %v2078_v52, %v2052_v22 }
 0x493   : > { %2120 = vst.msk [vmem:[#allocation3 + $0x14] sm:$0xf] %vm889_vm0, %v2088_v34 }
 0x494   : > { %2267 = vrot.lane.b32.xlu1 %v4775_v32, %s3204_s12  ;;  %2223 = vrot.lane.b32.xlu2 %v4775_v32, %s3206_s14 }
 0x495   : > { %2357 = vrot.lane.b32.xlu0 %v4767_v16, %s3202_s10 }
 0x499   : > { %v2056_v61 = vpop.permute.xlu0 %2055  ;;  %v2068_v51 = vpop.permute.xlu2 %2067 }
 0x49a   : > { %v2090_v33 = vsel %vm852_vm11, %v2079_v40, %v2056_v61  ;;  %v2096_v23 = vsel %vm852_vm11, %v2082_v58, %v2068_v51  ;;  %v4819_v40 = vor.u32 %v3123_v11, %v3053_v9  ;;  %v3118_v18 = vld [vmem:[#allocation3 + $0x10] sm:$0xf0] }
 0x49b   : > { %2122 = vst.msk [vmem:[#allocation3 + $0x20] sm:$0xf] %vm889_vm0, %v2090_v33  ;;  %v4939_v58 = vor.u32 %v3118_v18, %v3037_v29 }
 0x49c   : > { %2489 = vrot.lane.b32.xlu1 %v4767_v16, %s3201_s9  ;;  %2313 = vrot.lane.b32.xlu2 %v4767_v16, %s3205_s13  ;;  %2128 = vst.msk [vmem:[#allocation3 + $0x44] sm:$0xf] %vm889_vm0, %v2096_v23 }
 0x49d   : > { %2443 = vrot.lane.b32.xlu0 %v4775_v32, %s3199_s30  ;;  %5468 = vst [vmem:[#allocation12_spill] sm:$0xff] %v4939_v58 }
 0x4a1   : > { %v2060_v36 = vpop.permute.xlu0 %2059 }
 0x4a2   : > { %v2092_v31 = vsel %vm852_vm11, %v2080_v45, %v2060_v36 }
 0x4a3   : > { %2124 = vst.msk [vmem:[#allocation3 + $0x2c] sm:$0xf] %vm889_vm0, %v2092_v31  ;;  %v3124_v22 = vld [vmem:[#allocation3 + $0x40] sm:$0xf0] }
 0x4a4   : > { %2445 = vrot.lane.b32.xlu1 %v4767_v16, %s3199_s30  ;;  %2269 = vrot.lane.b32.xlu2 %v4767_v16, %s3204_s12 }
 0x4a5   : > { %2531 = vrot.lane.b32.xlu0 %v4775_v32, %s3200_s8 }
 0x4a9   : > { %v2064_v25 = vpop.permute.xlu1 %2063 }
 0x4aa   : > { %v2094_v8 = vsel %vm852_vm11, %v2081_v4, %v2064_v25  ;;  %v3121_v24 = vld [vmem:[#allocation3 + $0x28] sm:$0xf0] }
 0x4ab   : > { %2126 = vst.msk [vmem:[#allocation3 + $0x38] sm:$0xf] %vm889_vm0, %v2094_v8 }
 0x4ac   : > { %2533 = vrot.lane.b32.xlu1 %v4767_v16, %s3200_s8  ;;  %2355 = vrot.lane.b32.xlu2 %v4775_v32, %s3202_s10 }
 0x4ad   : > { %2317 = vrot.lane.b32.xlu0 %v4819_v40, %s3205_s13 }
 0x4b2   : > { %v3061_v63 = vld [vmem:[#allocation3 + $0x38] sm:$0xf] }
 0x4b3   : > { %v4967_v34 = vor.u32 %v3124_v22, %v3061_v63 }
 0x4b4   : > { %2229 = vrot.lane.b32.xlu2 %v4819_v40, %s3206_s14  ;;  %2319 = vrot.lane.b32.xlu1 %v4831_v5, %s3205_s13 }
 0x4b5   : > { %2407 = vrot.lane.b32.xlu0 %v4831_v5, %s3203_s11  ;;  %5470 = vst [vmem:[#allocation4_spill] sm:$0xff] %v4967_v34 }
 0x4b6   : > { %v4839_v44 = vpop.permute.xlu2 %2217 }
 0x4b9   : > { %v2072_v48 = vpop.permute.xlu0 %2071 }
 0x4ba   : > { %v2098_v43 = vsel %vm852_vm11, %v2083_v39, %v2072_v48  ;;  %v3049_v39 = vld [vmem:[#allocation3 + $0x20] sm:$0xf] }
 0x4bb   : > { %2130 = vst.msk [vmem:[#allocation3 + $0x50] sm:$0xf] %vm889_vm0, %v2098_v43  ;;  %v4953_v7 = vor.u32 %v3121_v24, %v3049_v39 }
 0x4bc   : > { %2275 = vrot.lane.b32.xlu1 %v4831_v5, %s3204_s12  ;;  %2231 = vrot.lane.b32.xlu2 %v4831_v5, %s3206_s14 }
 0x4bd   : > { %2273 = vrot.lane.b32.xlu0 %v4819_v40, %s3204_s12  ;;  %5469 = vst [vmem:[#allocation14_spill] sm:$0xff] %v4953_v7 }
 0x4be   : > { %v4849_v46 = vpop.permute.xlu2 %2305 }
 0x4c1   : > { %v2076_v57 = vpop.permute.xlu1 %2075 }
 0x4c2   : > { %v2100_v14 = vsel %vm852_vm11, %v2084_v15, %v2076_v57  ;;  %v3073_v53 = vld [vmem:[#allocation3 + $0x50] sm:$0xf] }
 0x4c3   : > { %2132 = vst.msk [vmem:[#allocation3 + $0x5c] sm:$0xf] %vm889_vm0, %v2100_v14  ;;  %vm5472_vm0 = vmmov %vm5446_vm13 }
 0x4c4   : > { %2361 = vrot.lane.b32.xlu1 %v4819_v40, %s3202_s10  ;;  %2405 = vrot.lane.b32.xlu2 %v4819_v40, %s3203_s11  ;;  %vm5473_vm9 = vmmov %vm5472_vm0 }
 0x4c5   : > { %2495 = vrot.lane.b32.xlu0 %v4831_v5, %s3201_s9  ;;  %vm5474_vm10 = vmmov %vm5472_vm0 }
 0x4c6   : > { %v4861_v10 = vpop.permute.xlu2 %2395  ;;  %vm5476_vm12 = vmmov %vm5472_vm0 }
 0x4ca   : > { %v3127_v25 = vld [vmem:[#allocation3 + $0x58] sm:$0xf0] }
 0x4cb   : > { %v5001_v35 = vor.u32 %v3127_v25, %v3073_v53 }
 0x4cc   : > { %2493 = vrot.lane.b32.xlu2 %v4819_v40, %s3201_s9  ;;  %2237 = vrot.lane.b32.xlu1 %v4863_v12, %s3206_s14 }
 0x4cd   : > { %2451 = vrot.lane.b32.xlu0 %v4831_v5, %s3199_s30  ;;  %5471 = vst [vmem:[#allocation5_spill] sm:$0xff] %v5001_v35 }
 0x4ce   : > { %v4871_v45 = vpop.permute.xlu2 %2261  ;;  %v4873_v49 = vpop.permute.xlu1 %2393 }
 0x4cf   : > { %v4875_v59 = vpop.permute.xlu0 %2219 }
 0x4d4   : > { %2363 = vrot.lane.b32.xlu2 %v4831_v5, %s3202_s10  ;;  %2411 = vrot.lane.b32.xlu1 %v4877_v27, %s3203_s11 }
 0x4d5   : > { %2539 = vrot.lane.b32.xlu0 %v4831_v5, %s3200_s8 }
 0x4d6   : > { %v4885_v6 = vpop.permute.xlu2 %2483  ;;  %v4887_v42 = vpop.permute.xlu1 %2481 }
 0x4d7   : > { %v4889_v50 = vpop.permute.xlu0 %2307 }
 0x4dc   : > { %2449 = vrot.lane.b32.xlu2 %v4819_v40, %s3199_s30  ;;  %2281 = vrot.lane.b32.xlu1 %v4863_v12, %s3204_s12 }
 0x4dd   : > { %2235 = vrot.lane.b32.xlu0 %v4877_v27, %s3206_s14 }
 0x4de   : > { %v4897_v2 = vpop.permute.xlu2 %2439  ;;  %v4899_v52 = vpop.permute.xlu1 %2351 }
 0x4df   : > { %v4901_v13 = vpop.permute.xlu0 %2263 }
 0x4e4   : > { %2537 = vrot.lane.b32.xlu2 %v4819_v40, %s3200_s8  ;;  %2367 = vrot.lane.b32.xlu1 %v4877_v27, %s3202_s10 }
 0x4e5   : > { %2325 = vrot.lane.b32.xlu0 %v4863_v12, %s3205_s13 }
 0x4e6   : > { %v4909_v54 = vpop.permute.xlu2 %2527  ;;  %v4911_v17 = vpop.permute.xlu1 %2437 }
 0x4e7   : > { %v4913_v21 = vpop.permute.xlu0 %2349 }
 0x4ec   : > { %2323 = vrot.lane.b32.xlu2 %v4877_v27, %s3205_s13  ;;  %2455 = vrot.lane.b32.xlu1 %v4877_v27, %s3199_s30 }
 0x4ed   : > { %2279 = vrot.lane.b32.xlu0 %v4877_v27, %s3204_s12 }
 0x4ee   : > { %v4921_v0 = vpop.permute.xlu2 %2223  ;;  %v4923_v20 = vpop.permute.xlu1 %2525 }
 0x4ef   : > { %5467 = vst [vmem:[#allocation11_spill] sm:$0xff] %v4923_v20  ;;  %v4925_v1 = vpop.permute.xlu0 %2225 }
 0x4f4   : > { %2413 = vrot.lane.b32.xlu2 %v4863_v12, %s3203_s11  ;;  %2543 = vrot.lane.b32.xlu1 %v4877_v27, %s3200_s8 }
 0x4f5   : > { %2501 = vrot.lane.b32.xlu0 %v4863_v12, %s3201_s9 }
 0x4f6   : > { %v4933_v15 = vpop.permute.xlu2 %2313  ;;  %v4935_v4 = vpop.permute.xlu1 %2311 }
 0x4f7   : > { %v4937_v26 = vpop.permute.xlu0 %2399 }
 0x4fc   : > { %2499 = vrot.lane.b32.xlu2 %v4877_v27, %s3201_s9  ;;  %2221 = vrot.lane.b32.xlu1 %v4939_v58, %s3206_s14 }
 0x4fd   : > { %2309 = vrot.lane.b32.xlu0 %v4939_v58, %s3205_s13 }
 0x4fe   : > { %v4947_v47 = vpop.permute.xlu2 %2269  ;;  %v4949_v3 = vpop.permute.xlu1 %2401 }
 0x4ff   : > { %v4951_v37 = vpop.permute.xlu0 %2487 }
 0x504   : > { %2369 = vrot.lane.b32.xlu2 %v4863_v12, %s3202_s10  ;;  %2227 = vrot.lane.b32.xlu1 %v4953_v7, %s3206_s14 }
 0x505   : > { %2397 = vrot.lane.b32.xlu0 %v4939_v58, %s3203_s11 }
 0x506   : > { %v4961_v56 = vpop.permute.xlu2 %2355  ;;  %v4963_v30 = vpop.permute.xlu1 %2267 }
 0x507   : > { %v4965_v28 = vpop.permute.xlu0 %2357 }
 0x50c   : > { %2457 = vrot.lane.b32.xlu2 %v4863_v12, %s3199_s30  ;;  %2321 = vrot.lane.b32.xlu1 %v4967_v34, %s3205_s13 }
 0x50d   : > { %2485 = vrot.lane.b32.xlu0 %v4939_v58, %s3201_s9 }
 0x50e   : > { %v2230_v61 = vpop.permute.xlu2 %2229  ;;  %v4975_v51 = vpop.permute.xlu1 %2489 }
 0x50f   : > { %v4977_v33 = vpop.permute.xlu0 %2443 }
 0x514   : > { %2545 = vrot.lane.b32.xlu2 %v4863_v12, %s3200_s8  ;;  %2409 = vrot.lane.b32.xlu1 %v4967_v34, %s3203_s11 }
 0x515   : > { %2271 = vrot.lane.b32.xlu0 %v4953_v7, %s3204_s12 }
 0x516   : > { %v4985_v23 = vpop.permute.xlu2 %2231  ;;  %v4987_v36 = vpop.permute.xlu1 %2445 }
 0x517   : > { %v4989_v31 = vpop.permute.xlu0 %2531  ;;  %v2245_v5 = vsel %vm346_vm6, %v2230_v61, %v4985_v23  ;;  %v2136_v61 = vld [vmem:[%s5397_s6] sm:$0xff] }
 0x51c   : > { %2315 = vrot.lane.b32.xlu2 %v4953_v7, %s3205_s13  ;;  %2497 = vrot.lane.b32.xlu1 %v4967_v34, %s3201_s9 }
 0x51d   : > { %2233 = vrot.lane.b32.xlu0 %v4967_v34, %s3206_s14 }
 0x51e   : > { %v4997_v11 = vpop.permute.xlu2 %2405  ;;  %v4999_v9 = vpop.permute.xlu1 %2533 }
 0x51f   : > { %v2318_v8 = vpop.permute.xlu0 %2317 }
 0x524   : > { %2403 = vrot.lane.b32.xlu2 %v4953_v7, %s3203_s11  ;;  %2239 = vrot.lane.b32.xlu1 %v5001_v35, %s3206_s14 }
 0x525   : > { %2327 = vrot.lane.b32.xlu0 %v5001_v35, %s3205_s13 }
 0x526   : > { %v5009_v48 = vpop.permute.xlu2 %2493  ;;  %v5011_v43 = vpop.permute.xlu1 %2319 }
 0x527   : > { %v5013_v57 = vpop.permute.xlu0 %2407 }
 0x52c   : > { %2491 = vrot.lane.b32.xlu2 %v4953_v7, %s3201_s9  ;;  %2365 = vrot.lane.b32.xlu1 %v4967_v34, %s3202_s10 }
 0x52d   : > { %2415 = vrot.lane.b32.xlu0 %v5001_v35, %s3203_s11 }
 0x52e   : > { %v5021_v14 = vpop.permute.xlu2 %2363  ;;  %v5023_v38 = vpop.permute.xlu1 %2275 }
 0x52f   : > { %v5025_v62 = vpop.permute.xlu0 %2273 }
 0x534   : > { %2277 = vrot.lane.b32.xlu2 %v4967_v34, %s3204_s12  ;;  %2283 = vrot.lane.b32.xlu1 %v5001_v35, %s3204_s12 }
 0x535   : > { %2503 = vrot.lane.b32.xlu0 %v5001_v35, %s3201_s9 }
 0x536   : > { %v5033_v19 = vpop.permute.xlu2 %2449  ;;  %v5035_v41 = vpop.permute.xlu1 %2361 }
 0x537   : > { %v5037_v18 = vpop.permute.xlu0 %2495 }
 0x53c   : > { %2453 = vrot.lane.b32.xlu2 %v4967_v34, %s3199_s30  ;;  %2371 = vrot.lane.b32.xlu1 %v5001_v35, %s3202_s10 }
 0x53d   : > { %2265 = vrot.lane.b32.xlu0 %v4939_v58, %s3204_s12 }
 0x53e   : > { %v5045_v29 = vpop.permute.xlu2 %2537  ;;  %v5047_v24 = vpop.permute.xlu1 %2237 }
 0x53f   : > { %v5049_v39 = vpop.permute.xlu0 %2451 }
 0x544   : > { %2459 = vrot.lane.b32.xlu2 %v5001_v35, %s3199_s30  ;;  %2359 = vrot.lane.b32.xlu1 %v4953_v7, %s3202_s10 }
 0x545   : > { %2541 = vrot.lane.b32.xlu0 %v4967_v34, %s3200_s8 }
 0x546   : > { %v2324_v63 = vpop.permute.xlu2 %2323  ;;  %v2412_v22 = vpop.permute.xlu1 %2411 }
 0x547   : > { %v5057_v25 = vpop.permute.xlu0 %2539 }
 0x54c   : > { %2447 = vrot.lane.b32.xlu2 %v4953_v7, %s3199_s30  ;;  %2353 = vrot.lane.b32.xlu1 %v4939_v58, %s3202_s10 }
 0x54d   : > { %2547 = vrot.lane.b32.xlu0 %v5001_v35, %s3200_s8 }
 0x54e   : > { %v5065_v53 = vpop.permute.xlu2 %2413  ;;  %v5067_v60 = vpop.permute.xlu1 %2281 }
 0x54f   : > { %v2236_v16 = vpop.permute.xlu0 %2235 }
 0x550   : > { %v2247_v34 = vsel %vm346_vm6, %v2236_v16, %v5047_v24 }
 0x551   : > { %2594 = vmatpush.bf16.msra.mxu2 %v2247_v34  ;;  %v2243_v34 = vsel %vm346_vm6, %v4921_v0, %v4925_v1 }
 0x554   : > { %2441 = vrot.lane.b32.xlu2 %v4939_v58, %s3199_s30  ;;  %2529 = vrot.lane.b32.xlu1 %v4939_v58, %s3200_s8  ;;  %v2333_v58 = vsel %vm370_vm8, %v2318_v8, %v5011_v43 }
 0x555   : > { %2535 = vrot.lane.b32.xlu0 %v4953_v7, %s3200_s8  ;;  %2595 = vmatpush.bf16.msra.mxu2 %v2245_v5  ;;  %v2241_v5 = vsel %vm346_vm6, %v4839_v44, %v4875_v59  ;;  %v2329_v44 = vsel %vm370_vm8, %v4849_v46, %v4889_v50 }
 0x556   : > { %v2500_v35 = vpop.permute.xlu2 %2499  ;;  %v2368_v12 = vpop.permute.xlu1 %2367 }
 0x557   : > { %v5079_v20 = vpop.permute.xlu0 %2325 }
 0x558   : > { %v2335_v16 = vsel %vm370_vm8, %v2324_v63, %v5079_v20 }
 0x559   : > { %2596 = vmatpush.bf16.msra.mxu2 %v2243_v34  ;;  %2607 = vmatpush.bf16.msra.mxu3 %v2335_v16  ;;  %v2331_v16 = vsel %vm370_vm8, %v4935_v4, %v4933_v15 }
 0x55c   : > { %2571 = vperm.xlu2 %3189, %v2136_v61  }
 0x55d   : > { %2597 = vmatpush.bf16.msra.mxu2 %v2241_v5  ;;  %2608 = vmatpush.bf16.msra.mxu3 %v2333_v58  ;;  %v2133_v58 = vld [vmem:[%s5396_s5] sm:$0xff]  ;;  %v2423_v5 = vsel %vm394_vm4, %v2412_v22, %v5065_v53  ;;  %v2421_v22 = vsel %vm394_vm4, %v4997_v11, %v5013_v57 }
 0x55e   : > { %v5094_v63 = vpop.permute.xlu2 %2369  ;;  %v2456_v7 = vpop.permute.xlu1 %2455  ;;  %v2577_v4 = vunpack.c.l.b16 %v2133_v58 }
 0x55f   : > { %v2280_v0 = vpop.permute.xlu0 %2279 }
 0x560   : > { %v5117_v46 = vpack.c.b16 %v2577_v4, %v2577_v4 }
 0x561   : > { %2598 = vmatpush.bf16.msra.mxu2 %v4877_v27  ;;  %2609 = vmatpush.bf16.msra.mxu3 %v2331_v16  ;;  %v2291_v27 = vsel %vm358_vm7, %v2280_v0, %v5067_v60 }
 0x565   : > { %2599 = vmatpush.bf16.msra.mxu2 %v4819_v40  ;;  %2610 = vmatpush.bf16.msra.mxu3 %v2329_v44  ;;  %v2289_v40 = vsel %vm358_vm7, %v5025_v62, %v5023_v38  ;;  %v2578_v62 = vunpack.c.h.b16 %v2133_v58 }
 0x566   : > { %v2544_v8 = vpop.permute.xlu1 %2543  ;;  %v5109_v61 = vpop.permute.xlu2 %2457 }
 0x567   : > { %v5107_v34 = vpop.permute.xlu0 %2501 }
 0x568   : > { %v2511_v4 = vsel %vm418_vm2, %v2500_v35, %v5107_v34  ;;  %v2509_v35 = vsel %vm418_vm2, %v5009_v48, %v5037_v18  ;;  %v2377_v48 = vsel %vm382_vm5, %v5035_v41, %v5021_v14 }
 0x569   : > { %2600 = vmatpush.bf16.msra.mxu2 %v4775_v32  ;;  %2611 = vmatpush.bf16.msra.mxu3 %v2291_v27  ;;  %v2287_v32 = vsel %vm358_vm7, %v4963_v30, %v4947_v47  ;;  %v5138_v27 = vpack.c.b16 %v2578_v62, %v2578_v62  ;;  %v2419_v30 = vsel %vm394_vm4, %v4937_v26, %v4949_v3 }
 0x56a   : > { %v2379_v26 = vsel %vm382_vm5, %v2368_v12, %v5094_v63  ;;  %v2505_v62 = vsel %vm418_vm2, %v4887_v42, %v4885_v6  ;;  %v2134_v12 = vld [vmem:[%s5396_s5 + $0x8] sm:$0xff] }
 0x56d   : > { %2601 = vmatpush.bf16.msra.mxu2 %v4713_v55  ;;  %2612 = vmatpush.bf16.msra.mxu3 %v2289_v40  ;;  %v2285_v55 = vsel %vm358_vm7, %v4871_v45, %v4901_v13  ;;  %v2417_v45 = vsel %vm394_vm4, %v4873_v49, %v4861_v10 }
 0x56e   : > { %v5122_v16 = vpop.permute.xlu1 %2221  ;;  %v5133_v44 = vpop.permute.xlu2 %2545 }
 0x56f   : > { %v5124_v0 = vpop.permute.xlu0 %2309 }
 0x570   : > { %2602 = vmatmul.bf16.vlgmr.msra.gmra.mxu2 %v5117_v46 }
 0x571   : > { %2620 = vmatpush.bf16.msrb.mxu2 %v2423_v5  ;;  %2613 = vmatpush.bf16.msra.mxu3 %v2287_v32  ;;  %v2507_v5 = vsel %vm418_vm2, %v4951_v37, %v4975_v51  ;;  %v2375_v37 = vsel %vm382_vm5, %v4961_v56, %v4965_v28  ;;  %v2465_v56 = vsel %vm406_vm1, %v5033_v19, %v5049_v39 }
 0x575   : > { %2621 = vmatpush.bf16.msrb.mxu2 %v2421_v22  ;;  %2614 = vmatpush.bf16.msra.mxu3 %v2285_v55  ;;  %v2467_v22 = vsel %vm406_vm1, %v2456_v7, %v5109_v61  ;;  %v2579_v55 = vunpack.c.l.b16 %v2134_v12  ;;  %v2555_v7 = vsel %vm5472_vm0, %v2544_v8, %v5133_v44 }
 0x576   : > { %v5145_v11 = vpop.permute.xlu1 %2227  ;;  %v5156_v40 = vpop.permute.xlu2 %2315 }
 0x577   : > { %v5147_v58 = vpop.permute.xlu0 %2397 }
 0x578   : > { %2615 = vmatmul.bf16.vlgmr.msra.gmra.mxu3 %v5138_v27 }
 0x579   : > { %2622 = vmatpush.bf16.msrb.mxu2 %v2419_v30  ;;  %2633 = vmatpush.bf16.msrb.mxu3 %v2511_v4  ;;  %v2373_v30 = vsel %vm382_vm5, %v4913_v21, %v4899_v52  ;;  %v2553_v21 = vsel %vm5473_vm9, %v5045_v29, %v5057_v25  ;;  %v2135_v29 = vld [vmem:[%s5396_s5 + $0x10] sm:$0xf] }
 0x57d   : > { %2623 = vmatpush.bf16.msrb.mxu2 %v2417_v45  ;;  %2634 = vmatpush.bf16.msrb.mxu3 %v2509_v35  ;;  %v5193_v45 = vpack.c.b16 %v2579_v55, %v2579_v55  ;;  %v2463_v35 = vsel %vm406_vm1, %v4977_v33, %v4987_v36  ;;  %v2551_v33 = vsel %vm5474_vm10, %v4989_v31, %v4999_v9 }
 0x57e   : > { %v5163_v32 = vpop.permute.xlu1 %2321  ;;  %v5181_v4 = vpop.permute.xlu2 %2403 }
 0x57f   : > { %v5165_v49 = vpop.permute.xlu0 %2485 }
 0x581   : > { %2624 = vmatpush.bf16.msrb.mxu2 %v2379_v26  ;;  %2635 = vmatpush.bf16.msrb.mxu3 %v2507_v5  ;;  %v2580_v26 = vunpack.c.h.b16 %v2134_v12  ;;  %v2581_v12 = vunpack.c.l.b16 %v2135_v29 }
 0x585   : > { %2625 = vmatpush.bf16.msrb.mxu2 %v2377_v48  ;;  %2636 = vmatpush.bf16.msrb.mxu3 %v2505_v62  ;;  %v2461_v48 = vsel %vm406_vm1, %v4911_v17, %v4897_v2  ;;  %v5213_v62 = vpack.c.b16 %v2580_v26, %v2580_v26  ;;  %v2334_v26 = vsel %vm370_vm8, %v5011_v43, %v5163_v32 }
 0x586   : > { %v5183_v41 = vpop.permute.xlu1 %2409  ;;  %v5208_v8 = vpop.permute.xlu2 %2491  ;;  %v2332_v43 = vsel %vm370_vm8, %v4933_v15, %v5156_v40 }
 0x587   : > { %v5185_v42 = vpop.permute.xlu0 %2271 }
 0x589   : > { %2626 = vmatpush.bf16.msrb.mxu2 %v2375_v37  ;;  %2637 = vmatpush.bf16.msrb.mxu3 %v2467_v22  ;;  %v5475_v37 = vld [vmem:[#allocation11_spill] sm:$0xff] }
 0x58a   : > { %v2549_v22 = vsel %vm5476_vm12, %v5475_v37, %v4909_v54  ;;  %v5477_v37 = vld [vmem:[#allocation10_spill] sm:$0xff] }
 0x58d   : > { %2627 = vmatpush.bf16.msrb.mxu2 %v2373_v30  ;;  %2638 = vmatpush.bf16.msrb.mxu3 %v2465_v56  ;;  %v5232_v56 = vpack.c.b16 %v2581_v12, %v2581_v12 }
 0x58e   : > { %v5204_v19 = vpop.permute.xlu1 %2497 }
 0x58f   : > { %v5206_v5 = vpop.permute.xlu0 %2233 }
 0x590   : > { %2628 = vmatmul.bf16.vlgmr.msrb.gmra.mxu2 %v5193_v45 }
 0x591   : > { %2650 = vmatpush.bf16.msra.mxu2 %v2555_v7  ;;  %2639 = vmatpush.bf16.msrb.mxu3 %v2463_v35  ;;  %v5234_v7 = vpop.permute.xlu2 %2277  ;;  %v2246_v35 = vsel %vm346_vm6, %v4985_v23, %v5206_v5 }
 0x595   : > { %2651 = vmatpush.bf16.msra.mxu2 %v2553_v21  ;;  %2640 = vmatpush.bf16.msrb.mxu3 %v2461_v48  ;;  %v2244_v21 = vsel %vm346_vm6, %v4925_v1, %v5145_v11  ;;  %v2242_v48 = vsel %vm346_vm6, %v4875_v59, %v5122_v16  ;;  %v2330_v1 = vsel %vm370_vm8, %v4889_v50, %v5124_v0 }
 0x596   : > { %v2240_v17 = vpop.permute.xlu1 %2239  ;;  %v2420_v50 = vsel %vm394_vm4, %v4949_v3, %v5181_v4 }
 0x597   : > { %v5225_v55 = vpop.permute.xlu0 %2327  ;;  %v2248_v30 = vsel %vm346_vm6, %v5047_v24, %v2240_v17  ;;  %vm5489_vm6 = vcmask 1043456  }
 0x598   : > { %2641 = vmatmul.bf16.vlgmr.msrb.gmra.mxu3 %v5213_v62  ;;  %v2336_v31 = vsel %vm370_vm8, %v5079_v20, %v5225_v55  ;;  %2659 = vmatpush.bf16.msrb.mxu0 %v2248_v30 }
 0x599   : > { %2652 = vmatpush.bf16.msra.mxu2 %v2551_v33  ;;  %2672 = vmatpush.bf16.msrb.mxu1 %v2336_v31  ;;  %v5260_v33 = vpop.permute.xlu2 %2453 }
 0x59c   : > { %2660 = vmatpush.bf16.msrb.mxu0 %v2246_v35  ;;  %v5479_v35 = vld [vmem:[#allocation8_spill] sm:$0xff] }
 0x59d   : > { %2653 = vmatpush.bf16.msra.mxu2 %v2549_v22  ;;  %2673 = vmatpush.bf16.msrb.mxu1 %v2334_v26  ;;  %v2290_v22 = vsel %vm358_vm7, %v5023_v38, %v5234_v7  ;;  %v5480_v26 = vld [vmem:[#allocation9_spill] sm:$0xff] }
 0x59e   : > { %v5244_v20 = vpop.permute.xlu1 %2365 }
 0x59f   : > { %v5246_v24 = vpop.permute.xlu0 %2415 }
 0x5a0   : > { %3075 = vmatmul.msk.bf16.vlgmr.msra.gmra.mxu2 %vm1517_vm14, %v5232_v56  ;;  %v2424_v23 = vsel %vm394_vm4, %v5065_v53, %v5246_v24  ;;  %2661 = vmatpush.bf16.msrb.mxu0 %v2244_v21  ;;  %v2422_v53 = vsel %vm394_vm4, %v5013_v57, %v5183_v41  ;;  %v5478_v57 = vld [vmem:[#allocation13_spill] sm:$0xff] }
 0x5a1   : > { %2674 = vmatpush.bf16.msrb.mxu1 %v2332_v43  ;;  %2685 = vmatpush.bf16.msra.mxu3 %v2424_v23  ;;  %v5292_v3 = vpop.permute.xlu2 %2459 }
 0x5a4   : > { %2662 = vmatpush.bf16.msrb.mxu0 %v2242_v48 }
 0x5a5   : > { %2675 = vmatpush.bf16.msrb.mxu1 %v2330_v1  ;;  %2686 = vmatpush.bf16.msra.mxu3 %v2422_v53 }
 0x5a6   : > { %v5268_v15 = vpop.permute.xlu1 %2283 }
 0x5a7   : > { %v5270_v29 = vpop.permute.xlu0 %2503  ;;  %v2292_v59 = vsel %vm358_vm7, %v5067_v60, %v5268_v15  ;;  %v2418_v60 = vsel %vm394_vm4, %v4861_v10, %v5147_v58  ;;  %v2288_v10 = vsel %vm358_vm7, %v4947_v47, %v5185_v42  ;;  %v2506_v47 = vsel %vm418_vm2, %v4885_v6, %v5165_v49  ;;  %vm5482_vm4 = vmmov %vm5472_vm0 }
 0x5a8   : > { %v2512_v12 = vsel %vm418_vm2, %v5107_v34, %v5270_v29  ;;  %2663 = vmatpush.bf16.msrb.mxu0 %v5477_v37  ;;  %v2510_v34 = vsel %vm418_vm2, %v5037_v18, %v5204_v19  ;;  %v2508_v18 = vsel %vm418_vm2, %v4975_v51, %v5208_v8  ;;  %v2466_v6 = vsel %vm406_vm1, %v5049_v39, %v5260_v33  ;;  %vm5481_vm2 = vmmov %vm5472_vm0 }
 0x5a9   : > { %2676 = vmatpush.bf16.msrb.mxu1 %v2292_v59  ;;  %2687 = vmatpush.bf16.msra.mxu3 %v2420_v50  ;;  %v2448_v43 = vpop.permute.xlu2 %2447 }
 0x5aa   : > { %2698 = vmatpush.bf16.msrb.mxu2 %v2512_v12 }
 0x5ac   : > { %2664 = vmatpush.bf16.msrb.mxu0 %v5478_v57 }
 0x5ad   : > { %2677 = vmatpush.bf16.msrb.mxu1 %v2290_v22  ;;  %2688 = vmatpush.bf16.msra.mxu3 %v2418_v60 }
 0x5ae   : > { %2699 = vmatpush.bf16.msrb.mxu2 %v2510_v34  ;;  %v5294_v30 = vpop.permute.xlu1 %2371 }
 0x5af   : > { %v5296_v31 = vpop.permute.xlu0 %2265  ;;  %v2380_v38 = vsel %vm382_vm5, %v5094_v63, %v5294_v30  ;;  %v2378_v63 = vsel %vm382_vm5, %v5021_v14, %v5244_v20  ;;  %v2468_v14 = vsel %vm406_vm1, %v5109_v61, %v5292_v3  ;;  %v2464_v61 = vsel %vm406_vm1, %v4987_v36, %v2448_v43  ;;  %v5483_v36 = vld [vmem:[#allocation5_spill] sm:$0xff] }
 0x5b0   : > { %2665 = vmatpush.bf16.msrb.mxu0 %v5479_v35  ;;  %v2286_v21 = vsel %vm358_vm7, %v4901_v13, %v5296_v31  ;;  %vm2795_vm7 = vcmask 239616  }
 0x5b1   : > { %2678 = vmatpush.bf16.msrb.mxu1 %v2288_v10  ;;  %2689 = vmatpush.bf16.msra.mxu3 %v2380_v38 }
 0x5b2   : > { %2700 = vmatpush.bf16.msrb.mxu2 %v2508_v18 }
 0x5b4   : > { %2666 = vmatpush.bf16.msrb.mxu0 %v5480_v26 }
 0x5b5   : > { %2679 = vmatpush.bf16.msrb.mxu1 %v2286_v21  ;;  %2690 = vmatpush.bf16.msra.mxu3 %v2378_v63 }
 0x5b6   : > { %2701 = vmatpush.bf16.msrb.mxu2 %v2506_v47  ;;  %v5318_v51 = vpop.permute.xlu1 %2359 }
 0x5b7   : > { %v2542_v23 = vpop.permute.xlu0 %2541  ;;  %2667 = vmatmul.bf16.vlgmr.msrb.gmra.mxu0 %v5117_v46  ;;  %v2376_v13 = vsel %vm382_vm5, %v4965_v28, %v5318_v51 }
 0x5b8   : > { %2680 = vmatmul.bf16.vlgmr.msrb.gmra.mxu1 %v5138_v27  ;;  %v2554_v39 = vsel %vm5482_vm4, %v5057_v25, %v2542_v23  ;;  %v5485_v25 = vld [vmem:[#allocation4_spill] sm:$0xff] }
 0x5b9   : > { %2724 = vmatpush.bf16.msra.mxu1 %v2240_v17  ;;  %2691 = vmatpush.bf16.msra.mxu3 %v2376_v13 }
 0x5ba   : > { %2702 = vmatpush.bf16.msrb.mxu2 %v2468_v14 }
 0x5bd   : > { %2725 = vmatpush.bf16.msra.mxu1 %v5206_v5  ;;  %v2442_v5 = vpop.permute.xlu2 %2441 }
 0x5be   : > { %2703 = vmatpush.bf16.msrb.mxu2 %v2466_v6  ;;  %v2354_v17 = vpop.permute.xlu1 %2353 }
 0x5bf   : > { %v2548_v28 = vpop.permute.xlu0 %2547  ;;  %v2374_v48 = vsel %vm382_vm5, %v4899_v52, %v2354_v17  ;;  %v2462_v52 = vsel %vm406_vm1, %v4897_v2, %v2442_v5  ;;  %vm5484_vm5 = vmmov %vm5472_vm0 }
 0x5c0   : > { %v2556_v1 = vsel %vm5481_vm2, %v5133_v44, %v2548_v28  ;;  %2692 = vmatpush.bf16.msra.mxu3 %v2374_v48  ;;  %vm5486_vm1 = vmmov %vm5472_vm0 }
 0x5c1   : > { %2726 = vmatpush.bf16.msra.mxu1 %v5145_v11  ;;  %2715 = vmatpush.bf16.msra.mxu0 %v2556_v1 }
 0x5c2   : > { %2704 = vmatpush.bf16.msrb.mxu2 %v2464_v61 }
 0x5c3   : > { %2693 = vmatmul.bf16.vlgmr.msra.gmra.mxu3 %v5193_v45 }
 0x5c4   : > { %2737 = vmatpush.bf16.msrb.mxu3 %v5225_v55 }
 0x5c5   : > { %2727 = vmatpush.bf16.msra.mxu1 %v5122_v16  ;;  %2716 = vmatpush.bf16.msra.mxu0 %v2554_v39 }
 0x5c6   : > { %2705 = vmatpush.bf16.msrb.mxu2 %v2462_v52  ;;  %v2530_v11 = vpop.permute.xlu1 %2529 }
 0x5c7   : > { %v2536_v44 = vpop.permute.xlu0 %2535  ;;  %v2550_v2 = vsel %vm5486_vm1, %v4909_v54, %v2530_v11 }
 0x5c8   : > { %2738 = vmatpush.bf16.msrb.mxu3 %v5163_v32  ;;  %v2552_v16 = vsel %vm5484_vm5, %v4999_v9, %v2536_v44  ;;  %v5487_v32 = vld [vmem:[#allocation14_spill] sm:$0xff]  ;;  %v5488_v9 = vld [vmem:[#allocation12_spill] sm:$0xff] }
 0x5c9   : > { %2728 = vmatpush.bf16.msra.mxu1 %v5483_v36  ;;  %2706 = vmatmul.bf16.vlgmr.msrb.gmra.mxu2 %v5213_v62 }
 0x5ca   : > { %2763 = vmatpush.bf16.msra.mxu2 %v5270_v29  ;;  %2717 = vmatpush.bf16.msra.mxu0 %v2552_v16 }
 0x5cc   : > { %2739 = vmatpush.bf16.msrb.mxu3 %v5156_v40 }
 0x5cd   : > { %2729 = vmatpush.bf16.msra.mxu1 %v5485_v25 }
 0x5ce   : > { %2764 = vmatpush.bf16.msra.mxu2 %v5204_v19  ;;  %2718 = vmatpush.bf16.msra.mxu0 %v2550_v2 }
 0x5d0   : > { %2740 = vmatpush.bf16.msrb.mxu3 %v5124_v0 }
 0x5d1   : > { %2730 = vmatpush.bf16.msra.mxu1 %v5487_v32  ;;  %3076 = vmatmul.msk.bf16.vlgmr.msra.gmra.mxu0 %vm1517_vm14, %v5232_v56 }
 0x5d2   : > { %2750 = vmatpush.bf16.msrb.mxu0 %v5246_v24  ;;  %2765 = vmatpush.bf16.msra.mxu2 %v5208_v8 }
 0x5d4   : > { %2741 = vmatpush.bf16.msrb.mxu3 %v5268_v15 }
 0x5d5   : > { %2731 = vmatpush.bf16.msra.mxu1 %v5488_v9 }
 0x5d6   : > { %2751 = vmatpush.bf16.msrb.mxu0 %v5183_v41  ;;  %2766 = vmatpush.bf16.msra.mxu2 %v5165_v49 }
 0x5d8   : > { %2732 = vmatmul.bf16.vlgmr.msra.gmra.mxu1 %v5117_v46  ;;  %2742 = vmatpush.bf16.msrb.mxu3 %v5234_v7  ;;  %v2572_v46 = vpop.permute.xlu2 %2571 }
 0x5d9   : > { %2780 = vmatpush.bf16.msrb.mxu1 %v2548_v28 }
 0x5da   : > { %2752 = vmatpush.bf16.msrb.mxu0 %v5181_v4  ;;  %2767 = vmatpush.bf16.msra.mxu2 %v5292_v3 }
 0x5dc   : > { %2743 = vmatpush.bf16.msrb.mxu3 %v5185_v42 }
 0x5dd   : > { %2781 = vmatpush.bf16.msrb.mxu1 %v2542_v23 }
 0x5de   : > { %2753 = vmatpush.bf16.msrb.mxu0 %v5147_v58  ;;  %2768 = vmatpush.bf16.msra.mxu2 %v5260_v33 }
 0x5e0   : > { %2744 = vmatpush.bf16.msrb.mxu3 %v5296_v31 }
 0x5e1   : > { %2782 = vmatpush.bf16.msrb.mxu1 %v2536_v44 }
 0x5e2   : > { %2754 = vmatpush.bf16.msrb.mxu0 %v5294_v30  ;;  %2769 = vmatpush.bf16.msra.mxu2 %v2448_v43 }
 0x5e3   : > { %2745 = vmatmul.bf16.vlgmr.msrb.gmra.mxu3 %v5138_v27 }
 0x5e5   : > { %2783 = vmatpush.bf16.msrb.mxu1 %v2530_v11 }
 0x5e6   : > { %2755 = vmatpush.bf16.msrb.mxu0 %v5244_v20  ;;  %2770 = vmatpush.bf16.msra.mxu2 %v2442_v5 }
 0x5e8   : > { %3077 = vmatmul.msk.bf16.vlgmr.msrb.gmra.mxu1 %vm1517_vm14, %v5232_v56 }
 0x5e9   : > { %2771 = vmatmul.bf16.vlgmr.msra.gmra.mxu2 %v5213_v62 }
 0x5ea   : > { %2756 = vmatpush.bf16.msrb.mxu0 %v5318_v51 }
 0x5ee   : > { %2757 = vmatpush.bf16.msrb.mxu0 %v2354_v17 }
 0x5f1   : > { %2758 = vmatmul.bf16.vlgmr.msrb.gmra.mxu0 %v5193_v45 }
 0x5f3   : > { %v2603_v54 = vpop.f32.mrf.mxu2 }
 0x5f4   : > { %v2604_v0 = vadd.f32 %v2603_v54, %v2572_v46 }
 0x5fb   : > { %v2616_v58 = vpop.f32.mrf.mxu3  ;;  %v2605_v40 = vpop.f32.mrf.mxu2 }
 0x5fc   : > { %v2617_v49 = vadd.f32 %v2616_v58, %v2604_v0 }
 0x603   : > { %v2618_v27 = vpop.f32.mrf.mxu3 }
 0x613   : > { %v2629_v4 = vpop.f32.mrf.mxu2 }
 0x614   : > { %v2630_v29 = vadd.f32 %v2629_v4, %v2617_v49 }
 0x61b   : > { %v2631_v41 = vpop.f32.mrf.mxu2  ;;  %v2642_v42 = vpop.f32.mrf.mxu3 }
 0x61c   : > { %v2643_v50 = vadd.f32 %v2642_v42, %v2630_v29 }
 0x623   : > { %v2655_v19 = vpop.f32.mrf.mxu2  ;;  %v2644_v8 = vpop.f32.mrf.mxu3 }
 0x624   : > { %v2656_v22 = vadd.f32 %v2655_v19, %v2643_v50 }
 0x62b   : > { %v2657_v55 = vpop.f32.mrf.mxu2 }
 0x634   : > { %v2668_v62 = vpop.f32.mrf.mxu0 }
 0x635   : > { %v2681_v56 = vpop.f32.mrf.mxu1  ;;  %v2669_v24 = vadd.f32 %v2668_v62, %v2572_v46 }
 0x637   : > { %v2682_v33 = vadd.f32 %v2681_v56, %v2669_v24 }
 0x63c   : > { %v2670_v7 = vpop.f32.mrf.mxu0 }
 0x63d   : > { %v2683_v20 = vpop.f32.mrf.mxu1 }
 0x646   : > { %v2694_v45 = vpop.f32.mrf.mxu3 }
 0x647   : > { %v2695_v53 = vadd.f32 %v2694_v45, %v2682_v33 }
 0x64c   : > { %v2707_v15 = vpop.f32.mrf.mxu2 }
 0x64d   : > { %v2708_v59 = vadd.f32 %v2707_v15, %v2695_v53 }
 0x64e   : > { %v2720_v12 = vpop.f32.mrf.mxu0  ;;  %v2696_v37 = vpop.f32.mrf.mxu3 }
 0x64f   : > { %v2721_v57 = vadd.f32 %v2720_v12, %v2708_v59 }
 0x651   : > { %v2791_v60 = vrot.slane %v2721_v57, 4 }
 0x653   : > { %v2792_v3 = vsel %vm5489_vm6, %v2656_v22, %v2791_v60 }
 0x654   : > { %2794 = vst [vmem:[%s278_s16] sm:$0x77] %v2792_v3  ;;  %v2709_v30 = vpop.f32.mrf.mxu2 }
 0x655   : > { %v2733_v34 = vpop.f32.mrf.mxu1 }
 0x656   : > { %v2722_v31 = vpop.f32.mrf.mxu0  ;;  %v2734_v18 = vadd.f32 %v2733_v34, %v2572_v46 }
 0x65d   : > { %v2735_v38 = vpop.f32.mrf.mxu1 }
 0x665   : > { %v2785_v35 = vpop.f32.mrf.mxu1 }
 0x666   : > { %v2746_v10 = vpop.f32.mrf.mxu3 }
 0x667   : > { %v2747_v21 = vadd.f32 %v2746_v10, %v2734_v18 }
 0x66c   : > { %v2772_v26 = vpop.f32.mrf.mxu2 }
 0x66d   : > { %v2787_v63 = vpop.f32.mrf.mxu1 }
 0x66e   : > { %v2759_v47 = vpop.f32.mrf.mxu0  ;;  %v2748_v23 = vpop.f32.mrf.mxu3 }
 0x66f   : > { %v2760_v51 = vadd.f32 %v2759_v47, %v2747_v21 }
 0x671   : > { %v2773_v13 = vadd.f32 %v2772_v26, %v2760_v51 }
 0x673   : > { %v2786_v43 = vadd.f32 %v2785_v35, %v2773_v13 }
 0x674   : > { %v2774_v14 = vpop.f32.mrf.mxu2 }
 0x675   : > { %2796 = vst.msk [vmem:[%s278_s16 + $0x8] sm:$0x7] %vm2795_vm7, %v2786_v43 }
 0x676   : > { %v2761_v6 = vpop.f32.mrf.mxu0 }
 0x677 PF: > { %s17_s24 = sadd.s32 1, %s3197_s24  }
 0x678   : > { %p14_p4 = scmp.ge.s32.totalorder %s17_s24, 4  }
 0x67a   :  { %16 = sbr.rel (!%p14_p4) target bundleno = 1 (0x1), region = 78 }

</bundles_post_ra>
